<compile_context>
chip_gen: v7x
topology: tpu7x:2x2x1
jax: 0.10.0
libtpu: 0.0.40
codegen_flags: <defaults>
</compile_context>

<pallas_src>
import functools

import jax
import jax.numpy as jnp
from jax.experimental import pallas as pl
from jax.experimental.pallas import tpu as pltpu

EPS = 1e-5
MM_DTYPE = jnp.bfloat16              # matmul-operand dtype (accumulation stays f32)
PER_TAP_MIN_CIN = 128                # Cin >= this: skip im2col, use 9 per-tap matmuls
VMEM_LIMIT_BYTES = 64 * 1024 * 1024  # above 16/32 MiB scoped defaults, within v7x physical


def _pick_row_tile(hp, target=32):
    """Largest divisor of hp that is <= target (16-32 post-pool rows per grid step)."""
    th = min(target, hp)
    while hp % th:
        th -= 1
    return th


# ------------------------------------------------------------------ in-kernel helpers
def _zero_border_cols(pad, cols):
    """Zero only the left/right 1-px halo columns.  The interior and the halo rows are fully
    overwritten every grid step, so no full-buffer zero-fill is needed."""
    rows2, _, c = pad.shape
    z = jnp.zeros((rows2, 1, c), pad.dtype)
    pad[:, 0:1, :] = z
    pad[:, cols + 1:cols + 2, :] = z


def _set_halo_row(pad, row, halo, is_edge, cols):
    """Write one halo row of the pad buffer: zeros at the image edge, neighbour data inside."""
    c = pad.shape[-1]

    @pl.when(is_edge)
    def _():
        pad[row:row + 1, 1:cols + 1, :] = jnp.zeros((1, cols, c), pad.dtype)

    @pl.when(jnp.logical_not(is_edge))
    def _():
        pad[row:row + 1, 1:cols + 1, :] = halo.astype(pad.dtype)


def _conv3x3_from_pad(pad, w_ref, b_ref, rows, cols, cin, col):
    """3x3 'valid' conv over the halo'd pad buffer (rows+2, cols+2, cin) -> (rows, cols, cout).

    col is a bf16 (rows, cols, 9*cin) im2col scratch (single K=9*cin MXU matmul), or None for
    the per-tap path (9 accumulating K=cin matmuls; used when cin already saturates the MXU K
    dim, which removes the col scratch and its store traffic).  Operands bf16, accumulation f32.
    """
    if col is not None:
        for idx in range(9):                                   # static unroll
            dy, dx = idx // 3, idx % 3
            col[:, :, idx * cin:(idx + 1) * cin] = (
                pad[dy:dy + rows, dx:dx + cols, :].astype(col.dtype))
        y = jnp.einsum("hwk,ko->hwo", col[...], w_ref[...],
                       preferred_element_type=jnp.float32)
    else:
        y = None
        for idx in range(9):
            dy, dx = idx // 3, idx % 3
            t = jnp.einsum("hwc,co->hwo",
                           pad[dy:dy + rows, dx:dx + cols, :].astype(MM_DTYPE),
                           w_ref[idx * cin:(idx + 1) * cin, :],
                           preferred_element_type=jnp.float32)
            y = t if y is None else y + t
    return y + b_ref[...]                                      # f32 bias


def _write_stats(y, s_ref, q_ref):
    """Per-tile BN partial stats.  Reduce the leading (row) axis first -- pure VPU adds across
    vregs -- then a single cross-sublane (XLU) reduce; sum and sum-of-squares share the pass."""
    c = y.shape[-1]
    s_rows = jnp.sum(y, axis=0)                                # (cols, c)   VPU
    q_rows = jnp.sum(y * y, axis=0)                            # (cols, c)   VPU
    s_ref[...] = jnp.sum(s_rows, axis=0).reshape(1, 1, 1, c)   # one XLU reduce each
    q_ref[...] = jnp.sum(q_rows, axis=0).reshape(1, 1, 1, c)


# -------------------------------------- pass A: maxpool(2) + conv1 + BN1 partial stats
def _make_pool_conv_kernel(th, wp, cin, use_im2col):
    def body(x_ref, top_ref, bot_ref, w_ref, b_ref, y_ref, s_ref, q_ref, pad, col):
        h, n_h = pl.program_id(1), pl.num_programs(1)

        def pool(v):                              # (2r, wp, 2*cin) -> (r, wp, cin)
            hor = jnp.maximum(v[:, :, :cin], v[:, :, cin:])     # W-pair folded onto lanes
            v2 = hor.reshape(v.shape[0] // 2, 2, wp, cin)
            return jnp.maximum(v2[:, 0], v2[:, 1])

        center = pool(x_ref[0])                   # (th, wp, cin)
        top = pool(top_ref[0])                    # (1, wp, cin): post-pool row h*th - 1
        bot = pool(bot_ref[0])                    # (1, wp, cin): post-pool row h*th + th

        _zero_border_cols(pad, wp)
        pad[1:th + 1, 1:wp + 1, :] = center.astype(pad.dtype)
        _set_halo_row(pad, 0, top, h == 0, wp)
        _set_halo_row(pad, th + 1, bot, h == n_h - 1, wp)

        y = _conv3x3_from_pad(pad, w_ref, b_ref, th, wp, cin, col)
        y_ref[0] = y
        _write_stats(y, s_ref, q_ref)

    if use_im2col:
        def kernel(x_ref, top_ref, bot_ref, w_ref, b_ref, y_ref, s_ref, q_ref, pad, col):
            body(x_ref, top_ref, bot_ref, w_ref, b_ref, y_ref, s_ref, q_ref, pad, col)
    else:
        def kernel(x_ref, top_ref, bot_ref, w_ref, b_ref, y_ref, s_ref, q_ref, pad):
            body(x_ref, top_ref, bot_ref, w_ref, b_ref, y_ref, s_ref, q_ref, pad, None)
    return kernel


def pool_conv_stats(x_nhwc, w_col, bias, th):
    n, hh, ww, cin = x_nhwc.shape
    hp, wp = hh // 2, ww // 2
    cout = w_col.shape[-1]
    n_h = hp // th
    use_im2col = cin < PER_TAP_MIN_CIN
    x_r = x_nhwc.reshape(n, hh, wp, 2 * cin)      # free reshape: W-pair -> lane axis

    scratch = [pltpu.VMEM((th + 2, wp + 2, cin), jnp.float32)]   # halo'd pad (f32: its
    if use_im2col:                                               # sublane-offset tap reads)
        scratch.append(pltpu.VMEM((th, wp, 9 * cin), MM_DTYPE))  # bf16 im2col columns

    out_shapes = (
        jax.ShapeDtypeStruct((n, hp, wp, cout), jnp.float32),    # conv1 pre-BN
        jax.ShapeDtypeStruct((n, n_h, 1, cout), jnp.float32),    # per-tile sum
        jax.ShapeDtypeStruct((n, n_h, 1, cout), jnp.float32),    # per-tile sum of squares
    )
    return pl.pallas_call(
        _make_pool_conv_kernel(th, wp, cin, use_im2col),
        out_shape=out_shapes,
        grid=(n, n_h),
        in_specs=[
            # centre rows of the tile (2*th pre-pool rows)
            pl.BlockSpec((1, 2 * th, wp, 2 * cin), lambda i, h: (i, h, 0, 0)),
            # 1-row (2 pre-pool rows) top/bottom halos; clamped at the image edge and
            # replaced by zeros inside the kernel (SAME padding).
            pl.BlockSpec((1, 2, wp, 2 * cin),
                         lambda i, h: (i, jnp.maximum(h * th - 1, 0), 0, 0)),
            pl.BlockSpec((1, 2, wp, 2 * cin),
                         lambda i, h: (i, jnp.minimum(h * th + th, hp - 1), 0, 0)),
            pl.BlockSpec((9 * cin, cout), lambda i, h: (0, 0)),
            pl.BlockSpec((1, cout), lambda i, h: (0, 0)),
        ],
        out_specs=(
            pl.BlockSpec((1, th, wp, cout), lambda i, h: (i, h, 0, 0)),
            pl.BlockSpec((1, 1, 1, cout), lambda i, h: (i, h, 0, 0)),
            pl.BlockSpec((1, 1, 1, cout), lambda i, h: (i, h, 0, 0)),
        ),
        scratch_shapes=scratch,
        compiler_params=pltpu.CompilerParams(
            dimension_semantics=("parallel", "parallel"),
            vmem_limit_bytes=VMEM_LIMIT_BYTES),
    )(x_r, x_r, x_r, w_col, bias.reshape(1, cout))


# -------------------------------- pass B: BN1 + ReLU + conv2 + BN2 partial stats
def _make_bn_relu_conv_kernel(th, wp, cin, use_im2col):
    def body(x_ref, top_ref, bot_ref, sc_ref, sh_ref, w_ref, b_ref,
             y_ref, s_ref, q_ref, pad, col):
        h, n_h = pl.program_id(1), pl.num_programs(1)

        def bnr(v):                               # fused BN1 affine + ReLU (f32)
            return jnp.maximum(v * sc_ref[...] + sh_ref[...], 0.0)

        _zero_border_cols(pad, wp)
        pad[1:th + 1, 1:wp + 1, :] = bnr(x_ref[0]).astype(pad.dtype)
        _set_halo_row(pad, 0, bnr(top_ref[0]), h == 0, wp)
        _set_halo_row(pad, th + 1, bnr(bot_ref[0]), h == n_h - 1, wp)

        y = _conv3x3_from_pad(pad, w_ref, b_ref, th, wp, cin, col)
        y_ref[0] = y
        _write_stats(y, s_ref, q_ref)

    if use_im2col:
        def kernel(x_ref, top_ref, bot_ref, sc_ref, sh_ref, w_ref, b_ref,
                   y_ref, s_ref, q_ref, pad, col):
            body(x_ref, top_ref, bot_ref, sc_ref, sh_ref, w_ref, b_ref,
                 y_ref, s_ref, q_ref, pad, col)
    else:
        def kernel(x_ref, top_ref, bot_ref, sc_ref, sh_ref, w_ref, b_ref,
                   y_ref, s_ref, q_ref, pad):
            body(x_ref, top_ref, bot_ref, sc_ref, sh_ref, w_ref, b_ref,
                 y_ref, s_ref, q_ref, pad, None)
    return kernel


def bn_relu_conv_stats(x_nhwc, scale, shift, w_col, bias, th):
    n, hp, wp, cin = x_nhwc.shape
    cout = w_col.shape[-1]
    n_h = hp // th
    use_im2col = cin < PER_TAP_MIN_CIN

    scratch = [pltpu.VMEM((th + 2, wp + 2, cin), jnp.float32)]
    if use_im2col:
        scratch.append(pltpu.VMEM((th, wp, 9 * cin), MM_DTYPE))

    out_shapes = (
        jax.ShapeDtypeStruct((n, hp, wp, cout), jnp.float32),
        jax.ShapeDtypeStruct((n, n_h, 1, cout), jnp.float32),
        jax.ShapeDtypeStruct((n, n_h, 1, cout), jnp.float32),
    )
    return pl.pallas_call(
        _make_bn_relu_conv_kernel(th, wp, cin, use_im2col),
        out_shape=out_shapes,
        grid=(n, n_h),
        in_specs=[
            pl.BlockSpec((1, th, wp, cin), lambda i, h: (i, h, 0, 0)),
            pl.BlockSpec((1, 1, wp, cin),
                         lambda i, h: (i, jnp.maximum(h * th - 1, 0), 0, 0)),
            pl.BlockSpec((1, 1, wp, cin),
                         lambda i, h: (i, jnp.minimum(h * th + th, hp - 1), 0, 0)),
            pl.BlockSpec((1, cin), lambda i, h: (0, 0)),
            pl.BlockSpec((1, cin), lambda i, h: (0, 0)),
            pl.BlockSpec((9 * cin, cout), lambda i, h: (0, 0)),
            pl.BlockSpec((1, cout), lambda i, h: (0, 0)),
        ],
        out_specs=(
            pl.BlockSpec((1, th, wp, cout), lambda i, h: (i, h, 0, 0)),
            pl.BlockSpec((1, 1, 1, cout), lambda i, h: (i, h, 0, 0)),
            pl.BlockSpec((1, 1, 1, cout), lambda i, h: (i, h, 0, 0)),
        ),
        scratch_shapes=scratch,
        compiler_params=pltpu.CompilerParams(
            dimension_semantics=("parallel", "parallel"),
            vmem_limit_bytes=VMEM_LIMIT_BYTES),
    )(x_nhwc, x_nhwc, x_nhwc, scale, shift, w_col, bias.reshape(1, cout))


# -------------------------------------------------------------- pass C: BN2 + ReLU
def _bn_relu_kernel(x_ref, sc_ref, sh_ref, o_ref):
    o_ref[...] = jnp.maximum(x_ref[...] * sc_ref[...] + sh_ref[...], 0.0)


def bn_relu(x_nhwc, scale, shift, th):
    n, hp, wp, c = x_nhwc.shape
    n_h = hp // th
    return pl.pallas_call(
        _bn_relu_kernel,
        out_shape=jax.ShapeDtypeStruct((n, hp, wp, c), jnp.float32),
        grid=(n, n_h),
        in_specs=[
            pl.BlockSpec((1, th, wp, c), lambda i, h: (i, h, 0, 0)),
            pl.BlockSpec((1, c), lambda i, h: (0, 0)),
            pl.BlockSpec((1, c), lambda i, h: (0, 0)),
        ],
        out_specs=pl.BlockSpec((1, th, wp, c), lambda i, h: (i, h, 0, 0)),
        compiler_params=pltpu.CompilerParams(
            dimension_semantics=("parallel", "parallel"),
            vmem_limit_bytes=VMEM_LIMIT_BYTES),
    )(x_nhwc, scale, shift)


# ------------------------------------------------ BN finalize (tiny (C,)-sized math)
def _bn_affine(s, q, count, gamma, beta):
    """Partial (sum, sum-of-squares) -> per-channel BN affine (scale, shift), all f32.
    var = E[x^2] - mean^2 is fine for near-zero-mean conv outputs; for |mean| >> std or very
    large counts switch to a shifted / Welford-style accumulation."""
    s_tot = jnp.sum(s, axis=(0, 1, 2))
    q_tot = jnp.sum(q, axis=(0, 1, 2))
    mean = s_tot / count
    var = jnp.maximum(q_tot / count - mean * mean, 0.0)       # biased var (BN training norm)
    scale = gamma * jax.lax.rsqrt(var + EPS)
    shift = beta - mean * scale
    c = scale.shape[0]
    return scale.reshape(1, c), shift.reshape(1, c)


# --------------------------------------------------------------------------- Down
def init_params(key, cin, cout):
    k1, k2, k3, k4 = jax.random.split(key, 4)

    def conv_w(k, ci, co):
        w_oihw = jax.random.normal(k, (co, ci, 3, 3), jnp.float32) / jnp.sqrt(ci * 9.0)
        # OIHW -> (ky, kx, ci, co) -> (9*ci, co): tap-major, channel-minor = im2col ordering.
        # bf16 weights feed the MXU at rated bf16 rate; accumulation stays f32 in-kernel.
        w_col = jnp.transpose(w_oihw, (2, 3, 1, 0)).reshape(9 * ci, co).astype(MM_DTYPE)
        return w_oihw, w_col

    w1_oihw, w1 = conv_w(k1, cin, cout)
    w2_oihw, w2 = conv_w(k2, cout, cout)
    return {
        "w1": w1, "w1_oihw": w1_oihw,
        "b1": 0.1 * jax.random.normal(k3, (cout,), jnp.float32),
        "g1": jnp.ones((cout,), jnp.float32), "be1": jnp.zeros((cout,), jnp.float32),
        "w2": w2, "w2_oihw": w2_oihw,
        "b2": 0.1 * jax.random.normal(k4, (cout,), jnp.float32),
        "g2": jnp.ones((cout,), jnp.float32), "be2": jnp.zeros((cout,), jnp.float32),
    }


def down(x_nchw, p, row_tile=None):
    x = jnp.transpose(x_nchw, (0, 2, 3, 1))          # NCHW -> NHWC (module boundary only)
    n, hh, ww, _ = x.shape
    assert hh % 2 == 0 and ww % 2 == 0, "MaxPool2d(2) needs even spatial dims"
    hp, wp = hh // 2, ww // 2
    th = _pick_row_tile(hp) if row_tile is None else row_tile
    assert hp % th == 0, "row tile must divide the post-pool height"
    count = float(n * hp * wp)

    y1, s1, q1 = pool_conv_stats(x, p["w1"], p["b1"], th)              # pool+conv1+BN1 stats
    sc1, sh1 = _bn_affine(s1, q1, count, p["g1"], p["be1"])
    y2, s2, q2 = bn_relu_conv_stats(y1, sc1, sh1, p["w2"], p["b2"], th)  # BN1+ReLU+conv2+stats
    sc2, sh2 = _bn_affine(s2, q2, count, p["g2"], p["be2"])
    out = bn_relu(y2, sc2, sh2, th)                                    # BN2 + ReLU
    # Layout change only, kept in XLA to honour the PyTorch NCHW contract; a real pipeline
    # should stay NHWC and fuse pass C into the next layer's first Pallas pass instead.
    return jnp.transpose(out, (0, 3, 1, 2))


# --------------------------------------------------------------- pure-JAX reference
def _ref_down(x_nchw, p):
    n, c, hh, ww = x_nchw.shape
    xp = x_nchw.reshape(n, c, hh // 2, 2, ww // 2, 2).max(axis=(3, 5))   # MaxPool2d(2)

    def conv(x, w_oihw, b):
        y = jax.lax.conv_general_dilated(
            x, w_oihw, window_strides=(1, 1), padding="SAME",
            dimension_numbers=("NCHW", "OIHW", "NCHW"))
        return y + b.reshape(1, -1, 1, 1)

    def bnr(x, g, be):
        mean = x.mean(axis=(0, 2, 3), keepdims=True)
        var = ((x - mean) ** 2).mean(axis=(0, 2, 3), keepdims=True)
        y = (x - mean) * jax.lax.rsqrt(var + EPS) * g.reshape(1, -1, 1, 1) \
            + be.reshape(1, -1, 1, 1)
        return jnp.maximum(y, 0.0)

    y = bnr(conv(xp, p["w1_oihw"], p["b1"]), p["g1"], p["be1"])
    y = bnr(conv(y, p["w2_oihw"], p["b2"]), p["g2"], p["be2"])
    return y


if __name__ == "__main__":
    key = jax.random.PRNGKey(0)
    kx, kp = jax.random.split(key)

    N, CIN, COUT, H, W = 2, 4, 8, 16, 16
    x = jax.random.normal(kx, (N, CIN, H, W), jnp.float32)
    params = init_params(kp, CIN, COUT)

    # row_tile=4 -> two row tiles per image at this toy size, exercising both the zero-padded
    # edge halos and the neighbour-row interior halos (default would be 16-32 rows).
    down_fn = jax.jit(functools.partial(down, row_tile=4))
    out = jax.block_until_ready(down_fn(x, params))
    assert out.shape == (N, COUT, H // 2, W // 2), out.shape

    # Self-check vs a pure-f32 XLA reference.  Kernel matmuls use bf16 operands with f32
    # accumulation, so compare with a correspondingly loosened tolerance.
    ref = jax.block_until_ready(_ref_down(x, params))
    assert jnp.allclose(out, ref, atol=5e-2, rtol=5e-2), (
        "max abs diff = %f" % float(jnp.max(jnp.abs(out - ref))))

    print("KERNEL_OK")
</pallas_src>

<mosaic_0001>
module attributes {stable_mosaic.version = 11 : i64} {
  func.func @kernel(%arg0: i32, %arg1: i32, %arg2: memref<1x8x8x8xf32, #tpu.memory_space<vmem>>, %arg3: memref<1x2x8x8xf32, #tpu.memory_space<vmem>>, %arg4: memref<1x2x8x8xf32, #tpu.memory_space<vmem>>, %arg5: memref<36x8xbf16, #tpu.memory_space<vmem>>, %arg6: memref<1x8xf32, #tpu.memory_space<vmem>>, %arg7: memref<1x4x8x8xf32, #tpu.memory_space<vmem>>, %arg8: memref<1x1x1x8xf32, #tpu.memory_space<vmem>>, %arg9: memref<1x1x1x8xf32, #tpu.memory_space<vmem>>, %arg10: memref<6x10x4xf32, #tpu.memory_space<vmem>>, %arg11: memref<4x8x36xbf16, #tpu.memory_space<vmem>>) attributes {dimension_semantics = [#tpu.dimension_semantics<parallel>, #tpu.dimension_semantics<parallel>], iteration_bounds = array<i64: 2, 2>, scalar_prefetch = 0 : i64, scratch_operands = 2 : i64, tpu.core_type = #tpu.core_type<tc>, window_params = [{transform_indices = @transform_0, window_bounds = array<i64: 1, 8, 8, 8>}, {transform_indices = @transform_1, window_bounds = array<i64: 1, 2, 8, 8>}, {transform_indices = @transform_2, window_bounds = array<i64: 1, 2, 8, 8>}, {pipeline_mode = #tpu.pipeline_mode<synchronous>, transform_indices = @transform_3, window_bounds = array<i64: 36, 8>}, {pipeline_mode = #tpu.pipeline_mode<synchronous>, transform_indices = @transform_4, window_bounds = array<i64: 1, 8>}, {transform_indices = @transform_5, window_bounds = array<i64: 1, 4, 8, 8>}, {transform_indices = @transform_6, window_bounds = array<i64: 1, 1, 1, 8>}, {transform_indices = @transform_7, window_bounds = array<i64: 1, 1, 1, 8>}]} {
    %c0 = arith.constant 0 : index
    %c0_0 = arith.constant 0 : index
    %c0_1 = arith.constant 0 : index
    %c0_2 = arith.constant 0 : index
    %0 = vector.load %arg2[%c0, %c0_0, %c0_1, %c0_2] : memref<1x8x8x8xf32, #tpu.memory_space<vmem>>, vector<1x8x8x8xf32>
    %1 = vector.shape_cast %0 : vector<1x8x8x8xf32> to vector<8x8x8xf32>
    %2 = vector.extract_strided_slice %1 {offsets = [0, 0, 0], sizes = [8, 8, 4], strides = [1, 1, 1]} : vector<8x8x8xf32> to vector<8x8x4xf32>
    %3 = vector.extract_strided_slice %1 {offsets = [0, 0, 4], sizes = [8, 8, 4], strides = [1, 1, 1]} : vector<8x8x8xf32> to vector<8x8x4xf32>
    %4 = arith.maximumf %2, %3 : vector<8x8x4xf32>
    %5 = vector.shape_cast %4 : vector<8x8x4xf32> to vector<4x2x8x4xf32>
    %6 = vector.extract_strided_slice %5 {offsets = [0, 0, 0, 0], sizes = [4, 1, 8, 4], strides = [1, 1, 1, 1]} : vector<4x2x8x4xf32> to vector<4x1x8x4xf32>
    %7 = vector.shape_cast %6 : vector<4x1x8x4xf32> to vector<4x8x4xf32>
    %8 = vector.extract_strided_slice %5 {offsets = [0, 1, 0, 0], sizes = [4, 1, 8, 4], strides = [1, 1, 1, 1]} : vector<4x2x8x4xf32> to vector<4x1x8x4xf32>
    %9 = vector.shape_cast %8 : vector<4x1x8x4xf32> to vector<4x8x4xf32>
    %10 = arith.maximumf %7, %9 : vector<4x8x4xf32>
    %c0_3 = arith.constant 0 : index
    %c0_4 = arith.constant 0 : index
    %c0_5 = arith.constant 0 : index
    %c0_6 = arith.constant 0 : index
    %11 = vector.load %arg3[%c0_3, %c0_4, %c0_5, %c0_6] : memref<1x2x8x8xf32, #tpu.memory_space<vmem>>, vector<1x2x8x8xf32>
    %12 = vector.shape_cast %11 : vector<1x2x8x8xf32> to vector<2x8x8xf32>
    %13 = vector.extract_strided_slice %12 {offsets = [0, 0, 0], sizes = [2, 8, 4], strides = [1, 1, 1]} : vector<2x8x8xf32> to vector<2x8x4xf32>
    %14 = vector.extract_strided_slice %12 {offsets = [0, 0, 4], sizes = [2, 8, 4], strides = [1, 1, 1]} : vector<2x8x8xf32> to vector<2x8x4xf32>
    %15 = arith.maximumf %13, %14 : vector<2x8x4xf32>
    %16 = vector.shape_cast %15 : vector<2x8x4xf32> to vector<1x2x8x4xf32>
    %17 = vector.extract_strided_slice %16 {offsets = [0, 0, 0, 0], sizes = [1, 1, 8, 4], strides = [1, 1, 1, 1]} : vector<1x2x8x4xf32> to vector<1x1x8x4xf32>
    %18 = vector.shape_cast %17 : vector<1x1x8x4xf32> to vector<1x8x4xf32>
    %19 = vector.extract_strided_slice %16 {offsets = [0, 1, 0, 0], sizes = [1, 1, 8, 4], strides = [1, 1, 1, 1]} : vector<1x2x8x4xf32> to vector<1x1x8x4xf32>
    %20 = vector.shape_cast %19 : vector<1x1x8x4xf32> to vector<1x8x4xf32>
    %21 = arith.maximumf %18, %20 : vector<1x8x4xf32>
    %c0_7 = arith.constant 0 : index
    %c0_8 = arith.constant 0 : index
    %c0_9 = arith.constant 0 : index
    %c0_10 = arith.constant 0 : index
    %22 = vector.load %arg4[%c0_7, %c0_8, %c0_9, %c0_10] : memref<1x2x8x8xf32, #tpu.memory_space<vmem>>, vector<1x2x8x8xf32>
    %23 = vector.shape_cast %22 : vector<1x2x8x8xf32> to vector<2x8x8xf32>
    %24 = vector.extract_strided_slice %23 {offsets = [0, 0, 0], sizes = [2, 8, 4], strides = [1, 1, 1]} : vector<2x8x8xf32> to vector<2x8x4xf32>
    %25 = vector.extract_strided_slice %23 {offsets = [0, 0, 4], sizes = [2, 8, 4], strides = [1, 1, 1]} : vector<2x8x8xf32> to vector<2x8x4xf32>
    %26 = arith.maximumf %24, %25 : vector<2x8x4xf32>
    %27 = vector.shape_cast %26 : vector<2x8x4xf32> to vector<1x2x8x4xf32>
    %28 = vector.extract_strided_slice %27 {offsets = [0, 0, 0, 0], sizes = [1, 1, 8, 4], strides = [1, 1, 1, 1]} : vector<1x2x8x4xf32> to vector<1x1x8x4xf32>
    %29 = vector.shape_cast %28 : vector<1x1x8x4xf32> to vector<1x8x4xf32>
    %30 = vector.extract_strided_slice %27 {offsets = [0, 1, 0, 0], sizes = [1, 1, 8, 4], strides = [1, 1, 1, 1]} : vector<1x2x8x4xf32> to vector<1x1x8x4xf32>
    %31 = vector.shape_cast %30 : vector<1x1x8x4xf32> to vector<1x8x4xf32>
    %32 = arith.maximumf %29, %31 : vector<1x8x4xf32>
    %cst = arith.constant 0.000000e+00 : f32
    %33 = vector.broadcast %cst : f32 to vector<6x1x4xf32>
    %c0_11 = arith.constant 0 : index
    %c0_12 = arith.constant 0 : index
    %c0_13 = arith.constant 0 : index
    %34 = vector.load %arg10[%c0_11, %c0_12, %c0_13] : memref<6x10x4xf32, #tpu.memory_space<vmem>>, vector<6x1x4xf32>
    tpu.vector_store %arg10[%c0_11, %c0_12, %c0_13], %33 {strides = array<i32>} : memref<6x10x4xf32, #tpu.memory_space<vmem>>, vector<6x1x4xf32>,
    %c0_14 = arith.constant 0 : index
    %c9 = arith.constant 9 : index
    %c0_15 = arith.constant 0 : index
    %35 = vector.load %arg10[%c0_14, %c9, %c0_15] : memref<6x10x4xf32, #tpu.memory_space<vmem>>, vector<6x1x4xf32>
    tpu.vector_store %arg10[%c0_14, %c9, %c0_15], %33 {strides = array<i32>} : memref<6x10x4xf32, #tpu.memory_space<vmem>>, vector<6x1x4xf32>,
    %c1 = arith.constant 1 : index
    %c1_16 = arith.constant 1 : index
    %c0_17 = arith.constant 0 : index
    %36 = vector.load %arg10[%c1, %c1_16, %c0_17] : memref<6x10x4xf32, #tpu.memory_space<vmem>>, vector<4x8x4xf32>
    tpu.vector_store %arg10[%c1, %c1_16, %c0_17], %10 {strides = array<i32>} : memref<6x10x4xf32, #tpu.memory_space<vmem>>, vector<4x8x4xf32>,
    %c0_i32 = arith.constant 0 : i32
    %37 = arith.cmpi eq, %arg1, %c0_i32 : i32
    %38 = arith.extui %37 : i1 to i32
    %c0_i32_18 = arith.constant 0 : i32
    %39 = arith.cmpi ne, %38, %c0_i32_18 : i32
    scf.if %39 {
      %cst_92 = arith.constant 0.000000e+00 : f32
      %95 = vector.broadcast %cst_92 : f32 to vector<1x8x4xf32>
      %c0_93 = arith.constant 0 : index
      %c1_94 = arith.constant 1 : index
      %c0_95 = arith.constant 0 : index
      %96 = vector.load %arg10[%c0_93, %c1_94, %c0_95] : memref<6x10x4xf32, #tpu.memory_space<vmem>>, vector<1x8x4xf32>
      tpu.vector_store %arg10[%c0_93, %c1_94, %c0_95], %95 {strides = array<i32>} : memref<6x10x4xf32, #tpu.memory_space<vmem>>, vector<1x8x4xf32>,
    } else {
    }
    %true = arith.constant true
    %40 = arith.xori %37, %true : i1
    %41 = arith.extui %40 : i1 to i32
    %c0_i32_19 = arith.constant 0 : i32
    %42 = arith.cmpi ne, %41, %c0_i32_19 : i32
    scf.if %42 {
      %c0_92 = arith.constant 0 : index
      %c1_93 = arith.constant 1 : index
      %c0_94 = arith.constant 0 : index
      %95 = vector.load %arg10[%c0_92, %c1_93, %c0_94] : memref<6x10x4xf32, #tpu.memory_space<vmem>>, vector<1x8x4xf32>
      tpu.vector_store %arg10[%c0_92, %c1_93, %c0_94], %21 {strides = array<i32>} : memref<6x10x4xf32, #tpu.memory_space<vmem>>, vector<1x8x4xf32>,
    } else {
    }
    %c1_i32 = arith.constant 1 : i32
    %43 = arith.cmpi eq, %arg1, %c1_i32 : i32
    %44 = arith.extui %43 : i1 to i32
    %c0_i32_20 = arith.constant 0 : i32
    %45 = arith.cmpi ne, %44, %c0_i32_20 : i32
    scf.if %45 {
      %cst_92 = arith.constant 0.000000e+00 : f32
      %95 = vector.broadcast %cst_92 : f32 to vector<1x8x4xf32>
      %c5 = arith.constant 5 : index
      %c1_93 = arith.constant 1 : index
      %c0_94 = arith.constant 0 : index
      %96 = vector.load %arg10[%c5, %c1_93, %c0_94] : memref<6x10x4xf32, #tpu.memory_space<vmem>>, vector<1x8x4xf32>
      tpu.vector_store %arg10[%c5, %c1_93, %c0_94], %95 {strides = array<i32>} : memref<6x10x4xf32, #tpu.memory_space<vmem>>, vector<1x8x4xf32>,
    } else {
    }
    %true_21 = arith.constant true
    %46 = arith.xori %43, %true_21 : i1
    %47 = arith.extui %46 : i1 to i32
    %c0_i32_22 = arith.constant 0 : i32
    %48 = arith.cmpi ne, %47, %c0_i32_22 : i32
    scf.if %48 {
      %c5 = arith.constant 5 : index
      %c1_92 = arith.constant 1 : index
      %c0_93 = arith.constant 0 : index
      %95 = vector.load %arg10[%c5, %c1_92, %c0_93] : memref<6x10x4xf32, #tpu.memory_space<vmem>>, vector<1x8x4xf32>
      tpu.vector_store %arg10[%c5, %c1_92, %c0_93], %32 {strides = array<i32>} : memref<6x10x4xf32, #tpu.memory_space<vmem>>, vector<1x8x4xf32>,
    } else {
    }
    %c0_23 = arith.constant 0 : index
    %c0_24 = arith.constant 0 : index
    %c0_25 = arith.constant 0 : index
    %49 = vector.load %arg10[%c0_23, %c0_24, %c0_25] : memref<6x10x4xf32, #tpu.memory_space<vmem>>, vector<4x8x4xf32>
    %50 = arith.truncf %49 : vector<4x8x4xf32> to vector<4x8x4xbf16>
    %c0_26 = arith.constant 0 : index
    %c0_27 = arith.constant 0 : index
    %c0_28 = arith.constant 0 : index
    %51 = vector.load %arg11[%c0_26, %c0_27, %c0_28] : memref<4x8x36xbf16, #tpu.memory_space<vmem>>, vector<4x8x4xbf16>
    tpu.vector_store %arg11[%c0_26, %c0_27, %c0_28], %50 {strides = array<i32>} : memref<4x8x36xbf16, #tpu.memory_space<vmem>>, vector<4x8x4xbf16>,
    %c0_29 = arith.constant 0 : index
    %c1_30 = arith.constant 1 : index
    %c0_31 = arith.constant 0 : index
    %52 = vector.load %arg10[%c0_29, %c1_30, %c0_31] : memref<6x10x4xf32, #tpu.memory_space<vmem>>, vector<4x8x4xf32>
    %53 = arith.truncf %52 : vector<4x8x4xf32> to vector<4x8x4xbf16>
    %c0_32 = arith.constant 0 : index
    %c0_33 = arith.constant 0 : index
    %c4 = arith.constant 4 : index
    %54 = vector.load %arg11[%c0_32, %c0_33, %c4] : memref<4x8x36xbf16, #tpu.memory_space<vmem>>, vector<4x8x4xbf16>
    tpu.vector_store %arg11[%c0_32, %c0_33, %c4], %53 {strides = array<i32>} : memref<4x8x36xbf16, #tpu.memory_space<vmem>>, vector<4x8x4xbf16>,
    %c0_34 = arith.constant 0 : index
    %c2 = arith.constant 2 : index
    %c0_35 = arith.constant 0 : index
    %55 = vector.load %arg10[%c0_34, %c2, %c0_35] : memref<6x10x4xf32, #tpu.memory_space<vmem>>, vector<4x8x4xf32>
    %56 = arith.truncf %55 : vector<4x8x4xf32> to vector<4x8x4xbf16>
    %c0_36 = arith.constant 0 : index
    %c0_37 = arith.constant 0 : index
    %c8 = arith.constant 8 : index
    %57 = vector.load %arg11[%c0_36, %c0_37, %c8] : memref<4x8x36xbf16, #tpu.memory_space<vmem>>, vector<4x8x4xbf16>
    tpu.vector_store %arg11[%c0_36, %c0_37, %c8], %56 {strides = array<i32>} : memref<4x8x36xbf16, #tpu.memory_space<vmem>>, vector<4x8x4xbf16>,
    %c1_38 = arith.constant 1 : index
    %c0_39 = arith.constant 0 : index
    %c0_40 = arith.constant 0 : index
    %58 = vector.load %arg10[%c1_38, %c0_39, %c0_40] : memref<6x10x4xf32, #tpu.memory_space<vmem>>, vector<4x8x4xf32>
    %59 = arith.truncf %58 : vector<4x8x4xf32> to vector<4x8x4xbf16>
    %c0_41 = arith.constant 0 : index
    %c0_42 = arith.constant 0 : index
    %c12 = arith.constant 12 : index
    %60 = vector.load %arg11[%c0_41, %c0_42, %c12] : memref<4x8x36xbf16, #tpu.memory_space<vmem>>, vector<4x8x4xbf16>
    tpu.vector_store %arg11[%c0_41, %c0_42, %c12], %59 {strides = array<i32>} : memref<4x8x36xbf16, #tpu.memory_space<vmem>>, vector<4x8x4xbf16>,
    %c1_43 = arith.constant 1 : index
    %c1_44 = arith.constant 1 : index
    %c0_45 = arith.constant 0 : index
    %61 = vector.load %arg10[%c1_43, %c1_44, %c0_45] : memref<6x10x4xf32, #tpu.memory_space<vmem>>, vector<4x8x4xf32>
    %62 = arith.truncf %61 : vector<4x8x4xf32> to vector<4x8x4xbf16>
    %c0_46 = arith.constant 0 : index
    %c0_47 = arith.constant 0 : index
    %c16 = arith.constant 16 : index
    %63 = vector.load %arg11[%c0_46, %c0_47, %c16] : memref<4x8x36xbf16, #tpu.memory_space<vmem>>, vector<4x8x4xbf16>
    tpu.vector_store %arg11[%c0_46, %c0_47, %c16], %62 {strides = array<i32>} : memref<4x8x36xbf16, #tpu.memory_space<vmem>>, vector<4x8x4xbf16>,
    %c1_48 = arith.constant 1 : index
    %c2_49 = arith.constant 2 : index
    %c0_50 = arith.constant 0 : index
    %64 = vector.load %arg10[%c1_48, %c2_49, %c0_50] : memref<6x10x4xf32, #tpu.memory_space<vmem>>, vector<4x8x4xf32>
    %65 = arith.truncf %64 : vector<4x8x4xf32> to vector<4x8x4xbf16>
    %c0_51 = arith.constant 0 : index
    %c0_52 = arith.constant 0 : index
    %c20 = arith.constant 20 : index
    %66 = vector.load %arg11[%c0_51, %c0_52, %c20] : memref<4x8x36xbf16, #tpu.memory_space<vmem>>, vector<4x8x4xbf16>
    tpu.vector_store %arg11[%c0_51, %c0_52, %c20], %65 {strides = array<i32>} : memref<4x8x36xbf16, #tpu.memory_space<vmem>>, vector<4x8x4xbf16>,
    %c2_53 = arith.constant 2 : index
    %c0_54 = arith.constant 0 : index
    %c0_55 = arith.constant 0 : index
    %67 = vector.load %arg10[%c2_53, %c0_54, %c0_55] : memref<6x10x4xf32, #tpu.memory_space<vmem>>, vector<4x8x4xf32>
    %68 = arith.truncf %67 : vector<4x8x4xf32> to vector<4x8x4xbf16>
    %c0_56 = arith.constant 0 : index
    %c0_57 = arith.constant 0 : index
    %c24 = arith.constant 24 : index
    %69 = vector.load %arg11[%c0_56, %c0_57, %c24] : memref<4x8x36xbf16, #tpu.memory_space<vmem>>, vector<4x8x4xbf16>
    tpu.vector_store %arg11[%c0_56, %c0_57, %c24], %68 {strides = array<i32>} : memref<4x8x36xbf16, #tpu.memory_space<vmem>>, vector<4x8x4xbf16>,
    %c2_58 = arith.constant 2 : index
    %c1_59 = arith.constant 1 : index
    %c0_60 = arith.constant 0 : index
    %70 = vector.load %arg10[%c2_58, %c1_59, %c0_60] : memref<6x10x4xf32, #tpu.memory_space<vmem>>, vector<4x8x4xf32>
    %71 = arith.truncf %70 : vector<4x8x4xf32> to vector<4x8x4xbf16>
    %c0_61 = arith.constant 0 : index
    %c0_62 = arith.constant 0 : index
    %c28 = arith.constant 28 : index
    %72 = vector.load %arg11[%c0_61, %c0_62, %c28] : memref<4x8x36xbf16, #tpu.memory_space<vmem>>, vector<4x8x4xbf16>
    tpu.vector_store %arg11[%c0_61, %c0_62, %c28], %71 {strides = array<i32>} : memref<4x8x36xbf16, #tpu.memory_space<vmem>>, vector<4x8x4xbf16>,
    %c2_63 = arith.constant 2 : index
    %c2_64 = arith.constant 2 : index
    %c0_65 = arith.constant 0 : index
    %73 = vector.load %arg10[%c2_63, %c2_64, %c0_65] : memref<6x10x4xf32, #tpu.memory_space<vmem>>, vector<4x8x4xf32>
    %74 = arith.truncf %73 : vector<4x8x4xf32> to vector<4x8x4xbf16>
    %c0_66 = arith.constant 0 : index
    %c0_67 = arith.constant 0 : index
    %c32 = arith.constant 32 : index
    %75 = vector.load %arg11[%c0_66, %c0_67, %c32] : memref<4x8x36xbf16, #tpu.memory_space<vmem>>, vector<4x8x4xbf16>
    tpu.vector_store %arg11[%c0_66, %c0_67, %c32], %74 {strides = array<i32>} : memref<4x8x36xbf16, #tpu.memory_space<vmem>>, vector<4x8x4xbf16>,
    %c0_68 = arith.constant 0 : index
    %c0_69 = arith.constant 0 : index
    %c0_70 = arith.constant 0 : index
    %76 = vector.load %arg11[%c0_68, %c0_69, %c0_70] : memref<4x8x36xbf16, #tpu.memory_space<vmem>>, vector<4x8x36xbf16>
    %c0_71 = arith.constant 0 : index
    %c0_72 = arith.constant 0 : index
    %77 = vector.load %arg5[%c0_71, %c0_72] : memref<36x8xbf16, #tpu.memory_space<vmem>>, vector<36x8xbf16>
    "tpu.trace_start"() <{level = 10 : i32, message = "hwk,ko->hwo"}> : () -> ()
    %cst_73 = arith.constant dense<0.000000e+00> : vector<4x8x8xf32>
    %78 = tpu.matmul %76, %77, %cst_73 {dimension_numbers = #tpu.dot_dimension_numbers<[2], [0], [0, 1], [1], [0, 0, 0, 1, 1, 1], [], []>} : vector<4x8x36xbf16>, vector<36x8xbf16>, vector<4x8x8xf32> -> vector<4x8x8xf32>
    "tpu.trace_stop"() : () -> ()
    %c0_74 = arith.constant 0 : index
    %c0_75 = arith.constant 0 : index
    %79 = vector.load %arg6[%c0_74, %c0_75] : memref<1x8xf32, #tpu.memory_space<vmem>>, vector<1x8xf32>
    %80 = vector.shape_cast %79 : vector<1x8xf32> to vector<1x1x8xf32>
    %81 = vector.broadcast %80 : vector<1x1x8xf32> to vector<4x8x8xf32>
    %82 = arith.addf %78, %81 : vector<4x8x8xf32>
    %c0_76 = arith.constant 0 : index
    %c0_77 = arith.constant 0 : index
    %c0_78 = arith.constant 0 : index
    %c0_79 = arith.constant 0 : index
    %83 = vector.load %arg7[%c0_76, %c0_77, %c0_78, %c0_79] : memref<1x4x8x8xf32, #tpu.memory_space<vmem>>, vector<1x4x8x8xf32>
    %84 = vector.shape_cast %83 : vector<1x4x8x8xf32> to vector<4x8x8xf32>
    %85 = vector.shape_cast %82 : vector<4x8x8xf32> to vector<1x4x8x8xf32>
    tpu.vector_store %arg7[%c0_76, %c0_77, %c0_78, %c0_79], %85 {strides = array<i32>} : memref<1x4x8x8xf32, #tpu.memory_space<vmem>>, vector<1x4x8x8xf32>,
    %cst_80 = arith.constant dense<0.000000e+00> : vector<8x8xf32>
    %86 = vector.multi_reduction <add>, %82, %cst_80 [0] : vector<4x8x8xf32> to vector<8x8xf32>
    %87 = arith.mulf %82, %82 : vector<4x8x8xf32>
    %cst_81 = arith.constant dense<0.000000e+00> : vector<8x8xf32>
    %88 = vector.multi_reduction <add>, %87, %cst_81 [0] : vector<4x8x8xf32> to vector<8x8xf32>
    %cst_82 = arith.constant dense<0.000000e+00> : vector<8xf32>
    %89 = vector.multi_reduction <add>, %86, %cst_82 [0] : vector<8x8xf32> to vector<8xf32>
    %90 = vector.shape_cast %89 : vector<8xf32> to vector<1x1x1x8xf32>
    %c0_83 = arith.constant 0 : index
    %c0_84 = arith.constant 0 : index
    %c0_85 = arith.constant 0 : index
    %c0_86 = arith.constant 0 : index
    %91 = vector.load %arg8[%c0_83, %c0_84, %c0_85, %c0_86] : memref<1x1x1x8xf32, #tpu.memory_space<vmem>>, vector<1x1x1x8xf32>
    tpu.vector_store %arg8[%c0_83, %c0_84, %c0_85, %c0_86], %90 {strides = array<i32>} : memref<1x1x1x8xf32, #tpu.memory_space<vmem>>, vector<1x1x1x8xf32>,
    %cst_87 = arith.constant dense<0.000000e+00> : vector<8xf32>
    %92 = vector.multi_reduction <add>, %88, %cst_87 [0] : vector<8x8xf32> to vector<8xf32>
    %93 = vector.shape_cast %92 : vector<8xf32> to vector<1x1x1x8xf32>
    %c0_88 = arith.constant 0 : index
    %c0_89 = arith.constant 0 : index
    %c0_90 = arith.constant 0 : index
    %c0_91 = arith.constant 0 : index
    %94 = vector.load %arg9[%c0_88, %c0_89, %c0_90, %c0_91] : memref<1x1x1x8xf32, #tpu.memory_space<vmem>>, vector<1x1x1x8xf32>
    tpu.vector_store %arg9[%c0_88, %c0_89, %c0_90, %c0_91], %93 {strides = array<i32>} : memref<1x1x1x8xf32, #tpu.memory_space<vmem>>, vector<1x1x1x8xf32>,
    return
  }
  func.func @transform_0(%arg0: i32, %arg1: i32) -> (i32, i32, i32, i32) {
    %c0_i32 = arith.constant 0 : i32
    %c0_i32_0 = arith.constant 0 : i32
    %c0_i32_1 = arith.constant 0 : i32
    return %arg0, %arg1, %c0_i32, %c0_i32_0 : i32, i32, i32, i32
  }
  func.func @transform_1(%arg0: i32, %arg1: i32) -> (i32, i32, i32, i32) {
    %c4_i32 = arith.constant 4 : i32
    %0 = arith.muli %arg1, %c4_i32 : i32
    %c1_i32 = arith.constant 1 : i32
    %1 = arith.subi %0, %c1_i32 : i32
    %c0_i32 = arith.constant 0 : i32
    %2 = arith.maxsi %1, %c0_i32 : i32
    %c0_i32_0 = arith.constant 0 : i32
    %c0_i32_1 = arith.constant 0 : i32
    %c0_i32_2 = arith.constant 0 : i32
    return %arg0, %2, %c0_i32_0, %c0_i32_1 : i32, i32, i32, i32
  }
  func.func @transform_2(%arg0: i32, %arg1: i32) -> (i32, i32, i32, i32) {
    %c4_i32 = arith.constant 4 : i32
    %0 = arith.muli %arg1, %c4_i32 : i32
    %c4_i32_0 = arith.constant 4 : i32
    %1 = arith.addi %0, %c4_i32_0 : i32
    %c7_i32 = arith.constant 7 : i32
    %2 = arith.minsi %1, %c7_i32 : i32
    %c0_i32 = arith.constant 0 : i32
    %c0_i32_1 = arith.constant 0 : i32
    %c0_i32_2 = arith.constant 0 : i32
    return %arg0, %2, %c0_i32, %c0_i32_1 : i32, i32, i32, i32
  }
  func.func @transform_3(%arg0: i32, %arg1: i32) -> (i32, i32) {
    %c0_i32 = arith.constant 0 : i32
    %c0_i32_0 = arith.constant 0 : i32
    %c0_i32_1 = arith.constant 0 : i32
    return %c0_i32, %c0_i32_0 : i32, i32
  }
  func.func @transform_4(%arg0: i32, %arg1: i32) -> (i32, i32) {
    %c0_i32 = arith.constant 0 : i32
    %c0_i32_0 = arith.constant 0 : i32
    %c0_i32_1 = arith.constant 0 : i32
    return %c0_i32, %c0_i32_0 : i32, i32
  }
  func.func @transform_5(%arg0: i32, %arg1: i32) -> (i32, i32, i32, i32) {
    %c0_i32 = arith.constant 0 : i32
    %c0_i32_0 = arith.constant 0 : i32
    %c0_i32_1 = arith.constant 0 : i32
    return %arg0, %arg1, %c0_i32, %c0_i32_0 : i32, i32, i32, i32
  }
  func.func @transform_6(%arg0: i32, %arg1: i32) -> (i32, i32, i32, i32) {
    %c0_i32 = arith.constant 0 : i32
    %c0_i32_0 = arith.constant 0 : i32
    %c0_i32_1 = arith.constant 0 : i32
    return %arg0, %arg1, %c0_i32, %c0_i32_0 : i32, i32, i32, i32
  }
  func.func @transform_7(%arg0: i32, %arg1: i32) -> (i32, i32, i32, i32) {
    %c0_i32 = arith.constant 0 : i32
    %c0_i32_0 = arith.constant 0 : i32
    %c0_i32_1 = arith.constant 0 : i32
    return %arg0, %arg1, %c0_i32, %c0_i32_0 : i32, i32, i32, i32
  }
}

module attributes {stable_mosaic.version = 11 : i64} {
  func.func @_bn_relu_kernel(%arg0: i32, %arg1: i32, %arg2: memref<1x4x8x8xf32, #tpu.memory_space<vmem>>, %arg3: memref<1x8xf32, #tpu.memory_space<vmem>>, %arg4: memref<1x8xf32, #tpu.memory_space<vmem>>, %arg5: memref<1x4x8x8xf32, #tpu.memory_space<vmem>>) attributes {dimension_semantics = [#tpu.dimension_semantics<parallel>, #tpu.dimension_semantics<parallel>], iteration_bounds = array<i64: 2, 2>, scalar_prefetch = 0 : i64, scratch_operands = 0 : i64, tpu.core_type = #tpu.core_type<tc>, window_params = [{transform_indices = @transform_0, window_bounds = array<i64: 1, 4, 8, 8>}, {pipeline_mode = #tpu.pipeline_mode<synchronous>, transform_indices = @transform_1, window_bounds = array<i64: 1, 8>}, {pipeline_mode = #tpu.pipeline_mode<synchronous>, transform_indices = @transform_2, window_bounds = array<i64: 1, 8>}, {transform_indices = @transform_3, window_bounds = array<i64: 1, 4, 8, 8>}]} {
    %c0 = arith.constant 0 : index
    %c0_0 = arith.constant 0 : index
    %c0_1 = arith.constant 0 : index
    %c0_2 = arith.constant 0 : index
    %0 = vector.load %arg2[%c0, %c0_0, %c0_1, %c0_2] : memref<1x4x8x8xf32, #tpu.memory_space<vmem>>, vector<1x4x8x8xf32>
    %c0_3 = arith.constant 0 : index
    %c0_4 = arith.constant 0 : index
    %1 = vector.load %arg3[%c0_3, %c0_4] : memref<1x8xf32, #tpu.memory_space<vmem>>, vector<1x8xf32>
    %2 = vector.shape_cast %1 : vector<1x8xf32> to vector<1x1x1x8xf32>
    %3 = vector.broadcast %2 : vector<1x1x1x8xf32> to vector<1x4x8x8xf32>
    %4 = arith.mulf %0, %3 : vector<1x4x8x8xf32>
    %c0_5 = arith.constant 0 : index
    %c0_6 = arith.constant 0 : index
    %5 = vector.load %arg4[%c0_5, %c0_6] : memref<1x8xf32, #tpu.memory_space<vmem>>, vector<1x8xf32>
    %6 = vector.shape_cast %5 : vector<1x8xf32> to vector<1x1x1x8xf32>
    %7 = vector.broadcast %6 : vector<1x1x1x8xf32> to vector<1x4x8x8xf32>
    %8 = arith.addf %4, %7 : vector<1x4x8x8xf32>
    %cst = arith.constant 0.000000e+00 : f32
    %9 = vector.broadcast %cst : f32 to vector<1x4x8x8xf32>
    %10 = arith.maximumf %8, %9 : vector<1x4x8x8xf32>
    %c0_7 = arith.constant 0 : index
    %c0_8 = arith.constant 0 : index
    %c0_9 = arith.constant 0 : index
    %c0_10 = arith.constant 0 : index
    %11 = vector.load %arg5[%c0_7, %c0_8, %c0_9, %c0_10] : memref<1x4x8x8xf32, #tpu.memory_space<vmem>>, vector<1x4x8x8xf32>
    tpu.vector_store %arg5[%c0_7, %c0_8, %c0_9, %c0_10], %10 {strides = array<i32>} : memref<1x4x8x8xf32, #tpu.memory_space<vmem>>, vector<1x4x8x8xf32>,
    return
  }
  func.func @transform_0(%arg0: i32, %arg1: i32) -> (i32, i32, i32, i32) {
    %c0_i32 = arith.constant 0 : i32
    %c0_i32_0 = arith.constant 0 : i32
    %c0_i32_1 = arith.constant 0 : i32
    return %arg0, %arg1, %c0_i32, %c0_i32_0 : i32, i32, i32, i32
  }
  func.func @transform_1(%arg0: i32, %arg1: i32) -> (i32, i32) {
    %c0_i32 = arith.constant 0 : i32
    %c0_i32_0 = arith.constant 0 : i32
    %c0_i32_1 = arith.constant 0 : i32
    return %c0_i32, %c0_i32_0 : i32, i32
  }
  func.func @transform_2(%arg0: i32, %arg1: i32) -> (i32, i32) {
    %c0_i32 = arith.constant 0 : i32
    %c0_i32_0 = arith.constant 0 : i32
    %c0_i32_1 = arith.constant 0 : i32
    return %c0_i32, %c0_i32_0 : i32, i32
  }
  func.func @transform_3(%arg0: i32, %arg1: i32) -> (i32, i32, i32, i32) {
    %c0_i32 = arith.constant 0 : i32
    %c0_i32_0 = arith.constant 0 : i32
    %c0_i32_1 = arith.constant 0 : i32
    return %arg0, %arg1, %c0_i32, %c0_i32_0 : i32, i32, i32, i32
  }
}

module attributes {stable_mosaic.version = 11 : i64} {
  func.func @kernel(%arg0: i32, %arg1: i32, %arg2: memref<1x4x8x8xf32, #tpu.memory_space<vmem>>, %arg3: memref<1x1x8x8xf32, #tpu.memory_space<vmem>>, %arg4: memref<1x1x8x8xf32, #tpu.memory_space<vmem>>, %arg5: memref<1x8xf32, #tpu.memory_space<vmem>>, %arg6: memref<1x8xf32, #tpu.memory_space<vmem>>, %arg7: memref<72x8xbf16, #tpu.memory_space<vmem>>, %arg8: memref<1x8xf32, #tpu.memory_space<vmem>>, %arg9: memref<1x4x8x8xf32, #tpu.memory_space<vmem>>, %arg10: memref<1x1x1x8xf32, #tpu.memory_space<vmem>>, %arg11: memref<1x1x1x8xf32, #tpu.memory_space<vmem>>, %arg12: memref<6x10x8xf32, #tpu.memory_space<vmem>>, %arg13: memref<4x8x72xbf16, #tpu.memory_space<vmem>>) attributes {dimension_semantics = [#tpu.dimension_semantics<parallel>, #tpu.dimension_semantics<parallel>], iteration_bounds = array<i64: 2, 2>, scalar_prefetch = 0 : i64, scratch_operands = 2 : i64, tpu.core_type = #tpu.core_type<tc>, window_params = [{transform_indices = @transform_0, window_bounds = array<i64: 1, 4, 8, 8>}, {transform_indices = @transform_1, window_bounds = array<i64: 1, 1, 8, 8>}, {transform_indices = @transform_2, window_bounds = array<i64: 1, 1, 8, 8>}, {pipeline_mode = #tpu.pipeline_mode<synchronous>, transform_indices = @transform_3, window_bounds = array<i64: 1, 8>}, {pipeline_mode = #tpu.pipeline_mode<synchronous>, transform_indices = @transform_4, window_bounds = array<i64: 1, 8>}, {pipeline_mode = #tpu.pipeline_mode<synchronous>, transform_indices = @transform_5, window_bounds = array<i64: 72, 8>}, {pipeline_mode = #tpu.pipeline_mode<synchronous>, transform_indices = @transform_6, window_bounds = array<i64: 1, 8>}, {transform_indices = @transform_7, window_bounds = array<i64: 1, 4, 8, 8>}, {transform_indices = @transform_8, window_bounds = array<i64: 1, 1, 1, 8>}, {transform_indices = @transform_9, window_bounds = array<i64: 1, 1, 1, 8>}]} {
    %cst = arith.constant 0.000000e+00 : f32
    %0 = vector.broadcast %cst : f32 to vector<6x1x8xf32>
    %c0 = arith.constant 0 : index
    %c0_0 = arith.constant 0 : index
    %c0_1 = arith.constant 0 : index
    %1 = vector.load %arg12[%c0, %c0_0, %c0_1] : memref<6x10x8xf32, #tpu.memory_space<vmem>>, vector<6x1x8xf32>
    tpu.vector_store %arg12[%c0, %c0_0, %c0_1], %0 {strides = array<i32>} : memref<6x10x8xf32, #tpu.memory_space<vmem>>, vector<6x1x8xf32>,
    %c0_2 = arith.constant 0 : index
    %c9 = arith.constant 9 : index
    %c0_3 = arith.constant 0 : index
    %2 = vector.load %arg12[%c0_2, %c9, %c0_3] : memref<6x10x8xf32, #tpu.memory_space<vmem>>, vector<6x1x8xf32>
    tpu.vector_store %arg12[%c0_2, %c9, %c0_3], %0 {strides = array<i32>} : memref<6x10x8xf32, #tpu.memory_space<vmem>>, vector<6x1x8xf32>,
    %c0_4 = arith.constant 0 : index
    %c0_5 = arith.constant 0 : index
    %c0_6 = arith.constant 0 : index
    %c0_7 = arith.constant 0 : index
    %3 = vector.load %arg2[%c0_4, %c0_5, %c0_6, %c0_7] : memref<1x4x8x8xf32, #tpu.memory_space<vmem>>, vector<1x4x8x8xf32>
    %4 = vector.shape_cast %3 : vector<1x4x8x8xf32> to vector<4x8x8xf32>
    %c0_8 = arith.constant 0 : index
    %c0_9 = arith.constant 0 : index
    %5 = vector.load %arg5[%c0_8, %c0_9] : memref<1x8xf32, #tpu.memory_space<vmem>>, vector<1x8xf32>
    %6 = vector.shape_cast %5 : vector<1x8xf32> to vector<1x1x8xf32>
    %7 = vector.broadcast %6 : vector<1x1x8xf32> to vector<4x8x8xf32>
    %8 = arith.mulf %4, %7 : vector<4x8x8xf32>
    %c0_10 = arith.constant 0 : index
    %c0_11 = arith.constant 0 : index
    %9 = vector.load %arg6[%c0_10, %c0_11] : memref<1x8xf32, #tpu.memory_space<vmem>>, vector<1x8xf32>
    %10 = vector.shape_cast %9 : vector<1x8xf32> to vector<1x1x8xf32>
    %11 = vector.broadcast %10 : vector<1x1x8xf32> to vector<4x8x8xf32>
    %12 = arith.addf %8, %11 : vector<4x8x8xf32>
    %cst_12 = arith.constant 0.000000e+00 : f32
    %13 = vector.broadcast %cst_12 : f32 to vector<4x8x8xf32>
    %14 = arith.maximumf %12, %13 : vector<4x8x8xf32>
    %c1 = arith.constant 1 : index
    %c1_13 = arith.constant 1 : index
    %c0_14 = arith.constant 0 : index
    %15 = vector.load %arg12[%c1, %c1_13, %c0_14] : memref<6x10x8xf32, #tpu.memory_space<vmem>>, vector<4x8x8xf32>
    tpu.vector_store %arg12[%c1, %c1_13, %c0_14], %14 {strides = array<i32>} : memref<6x10x8xf32, #tpu.memory_space<vmem>>, vector<4x8x8xf32>,
    %c0_15 = arith.constant 0 : index
    %c0_16 = arith.constant 0 : index
    %c0_17 = arith.constant 0 : index
    %c0_18 = arith.constant 0 : index
    %16 = vector.load %arg3[%c0_15, %c0_16, %c0_17, %c0_18] : memref<1x1x8x8xf32, #tpu.memory_space<vmem>>, vector<1x1x8x8xf32>
    %17 = vector.shape_cast %16 : vector<1x1x8x8xf32> to vector<1x8x8xf32>
    %c0_19 = arith.constant 0 : index
    %c0_20 = arith.constant 0 : index
    %18 = vector.load %arg5[%c0_19, %c0_20] : memref<1x8xf32, #tpu.memory_space<vmem>>, vector<1x8xf32>
    %19 = vector.shape_cast %18 : vector<1x8xf32> to vector<1x1x8xf32>
    %20 = vector.broadcast %19 : vector<1x1x8xf32> to vector<1x8x8xf32>
    %21 = arith.mulf %17, %20 : vector<1x8x8xf32>
    %c0_21 = arith.constant 0 : index
    %c0_22 = arith.constant 0 : index
    %22 = vector.load %arg6[%c0_21, %c0_22] : memref<1x8xf32, #tpu.memory_space<vmem>>, vector<1x8xf32>
    %23 = vector.shape_cast %22 : vector<1x8xf32> to vector<1x1x8xf32>
    %24 = vector.broadcast %23 : vector<1x1x8xf32> to vector<1x8x8xf32>
    %25 = arith.addf %21, %24 : vector<1x8x8xf32>
    %cst_23 = arith.constant 0.000000e+00 : f32
    %26 = vector.broadcast %cst_23 : f32 to vector<1x8x8xf32>
    %27 = arith.maximumf %25, %26 : vector<1x8x8xf32>
    %c0_i32 = arith.constant 0 : i32
    %28 = arith.cmpi eq, %arg1, %c0_i32 : i32
    %29 = arith.extui %28 : i1 to i32
    %c0_i32_24 = arith.constant 0 : i32
    %30 = arith.cmpi ne, %29, %c0_i32_24 : i32
    scf.if %30 {
      %cst_107 = arith.constant 0.000000e+00 : f32
      %98 = vector.broadcast %cst_107 : f32 to vector<1x8x8xf32>
      %c0_108 = arith.constant 0 : index
      %c1_109 = arith.constant 1 : index
      %c0_110 = arith.constant 0 : index
      %99 = vector.load %arg12[%c0_108, %c1_109, %c0_110] : memref<6x10x8xf32, #tpu.memory_space<vmem>>, vector<1x8x8xf32>
      tpu.vector_store %arg12[%c0_108, %c1_109, %c0_110], %98 {strides = array<i32>} : memref<6x10x8xf32, #tpu.memory_space<vmem>>, vector<1x8x8xf32>,
    } else {
    }
    %true = arith.constant true
    %31 = arith.xori %28, %true : i1
    %32 = arith.extui %31 : i1 to i32
    %c0_i32_25 = arith.constant 0 : i32
    %33 = arith.cmpi ne, %32, %c0_i32_25 : i32
    scf.if %33 {
      %c0_107 = arith.constant 0 : index
      %c1_108 = arith.constant 1 : index
      %c0_109 = arith.constant 0 : index
      %98 = vector.load %arg12[%c0_107, %c1_108, %c0_109] : memref<6x10x8xf32, #tpu.memory_space<vmem>>, vector<1x8x8xf32>
      tpu.vector_store %arg12[%c0_107, %c1_108, %c0_109], %27 {strides = array<i32>} : memref<6x10x8xf32, #tpu.memory_space<vmem>>, vector<1x8x8xf32>,
    } else {
    }
    %c0_26 = arith.constant 0 : index
    %c0_27 = arith.constant 0 : index
    %c0_28 = arith.constant 0 : index
    %c0_29 = arith.constant 0 : index
    %34 = vector.load %arg4[%c0_26, %c0_27, %c0_28, %c0_29] : memref<1x1x8x8xf32, #tpu.memory_space<vmem>>, vector<1x1x8x8xf32>
    %35 = vector.shape_cast %34 : vector<1x1x8x8xf32> to vector<1x8x8xf32>
    %c0_30 = arith.constant 0 : index
    %c0_31 = arith.constant 0 : index
    %36 = vector.load %arg5[%c0_30, %c0_31] : memref<1x8xf32, #tpu.memory_space<vmem>>, vector<1x8xf32>
    %37 = vector.shape_cast %36 : vector<1x8xf32> to vector<1x1x8xf32>
    %38 = vector.broadcast %37 : vector<1x1x8xf32> to vector<1x8x8xf32>
    %39 = arith.mulf %35, %38 : vector<1x8x8xf32>
    %c0_32 = arith.constant 0 : index
    %c0_33 = arith.constant 0 : index
    %40 = vector.load %arg6[%c0_32, %c0_33] : memref<1x8xf32, #tpu.memory_space<vmem>>, vector<1x8xf32>
    %41 = vector.shape_cast %40 : vector<1x8xf32> to vector<1x1x8xf32>
    %42 = vector.broadcast %41 : vector<1x1x8xf32> to vector<1x8x8xf32>
    %43 = arith.addf %39, %42 : vector<1x8x8xf32>
    %cst_34 = arith.constant 0.000000e+00 : f32
    %44 = vector.broadcast %cst_34 : f32 to vector<1x8x8xf32>
    %45 = arith.maximumf %43, %44 : vector<1x8x8xf32>
    %c1_i32 = arith.constant 1 : i32
    %46 = arith.cmpi eq, %arg1, %c1_i32 : i32
    %47 = arith.extui %46 : i1 to i32
    %c0_i32_35 = arith.constant 0 : i32
    %48 = arith.cmpi ne, %47, %c0_i32_35 : i32
    scf.if %48 {
      %cst_107 = arith.constant 0.000000e+00 : f32
      %98 = vector.broadcast %cst_107 : f32 to vector<1x8x8xf32>
      %c5 = arith.constant 5 : index
      %c1_108 = arith.constant 1 : index
      %c0_109 = arith.constant 0 : index
      %99 = vector.load %arg12[%c5, %c1_108, %c0_109] : memref<6x10x8xf32, #tpu.memory_space<vmem>>, vector<1x8x8xf32>
      tpu.vector_store %arg12[%c5, %c1_108, %c0_109], %98 {strides = array<i32>} : memref<6x10x8xf32, #tpu.memory_space<vmem>>, vector<1x8x8xf32>,
    } else {
    }
    %true_36 = arith.constant true
    %49 = arith.xori %46, %true_36 : i1
    %50 = arith.extui %49 : i1 to i32
    %c0_i32_37 = arith.constant 0 : i32
    %51 = arith.cmpi ne, %50, %c0_i32_37 : i32
    scf.if %51 {
      %c5 = arith.constant 5 : index
      %c1_107 = arith.constant 1 : index
      %c0_108 = arith.constant 0 : index
      %98 = vector.load %arg12[%c5, %c1_107, %c0_108] : memref<6x10x8xf32, #tpu.memory_space<vmem>>, vector<1x8x8xf32>
      tpu.vector_store %arg12[%c5, %c1_107, %c0_108], %45 {strides = array<i32>} : memref<6x10x8xf32, #tpu.memory_space<vmem>>, vector<1x8x8xf32>,
    } else {
    }
    %c0_38 = arith.constant 0 : index
    %c0_39 = arith.constant 0 : index
    %c0_40 = arith.constant 0 : index
    %52 = vector.load %arg12[%c0_38, %c0_39, %c0_40] : memref<6x10x8xf32, #tpu.memory_space<vmem>>, vector<4x8x8xf32>
    %53 = arith.truncf %52 : vector<4x8x8xf32> to vector<4x8x8xbf16>
    %c0_41 = arith.constant 0 : index
    %c0_42 = arith.constant 0 : index
    %c0_43 = arith.constant 0 : index
    %54 = vector.load %arg13[%c0_41, %c0_42, %c0_43] : memref<4x8x72xbf16, #tpu.memory_space<vmem>>, vector<4x8x8xbf16>
    tpu.vector_store %arg13[%c0_41, %c0_42, %c0_43], %53 {strides = array<i32>} : memref<4x8x72xbf16, #tpu.memory_space<vmem>>, vector<4x8x8xbf16>,
    %c0_44 = arith.constant 0 : index
    %c1_45 = arith.constant 1 : index
    %c0_46 = arith.constant 0 : index
    %55 = vector.load %arg12[%c0_44, %c1_45, %c0_46] : memref<6x10x8xf32, #tpu.memory_space<vmem>>, vector<4x8x8xf32>
    %56 = arith.truncf %55 : vector<4x8x8xf32> to vector<4x8x8xbf16>
    %c0_47 = arith.constant 0 : index
    %c0_48 = arith.constant 0 : index
    %c8 = arith.constant 8 : index
    %57 = vector.load %arg13[%c0_47, %c0_48, %c8] : memref<4x8x72xbf16, #tpu.memory_space<vmem>>, vector<4x8x8xbf16>
    tpu.vector_store %arg13[%c0_47, %c0_48, %c8], %56 {strides = array<i32>} : memref<4x8x72xbf16, #tpu.memory_space<vmem>>, vector<4x8x8xbf16>,
    %c0_49 = arith.constant 0 : index
    %c2 = arith.constant 2 : index
    %c0_50 = arith.constant 0 : index
    %58 = vector.load %arg12[%c0_49, %c2, %c0_50] : memref<6x10x8xf32, #tpu.memory_space<vmem>>, vector<4x8x8xf32>
    %59 = arith.truncf %58 : vector<4x8x8xf32> to vector<4x8x8xbf16>
    %c0_51 = arith.constant 0 : index
    %c0_52 = arith.constant 0 : index
    %c16 = arith.constant 16 : index
    %60 = vector.load %arg13[%c0_51, %c0_52, %c16] : memref<4x8x72xbf16, #tpu.memory_space<vmem>>, vector<4x8x8xbf16>
    tpu.vector_store %arg13[%c0_51, %c0_52, %c16], %59 {strides = array<i32>} : memref<4x8x72xbf16, #tpu.memory_space<vmem>>, vector<4x8x8xbf16>,
    %c1_53 = arith.constant 1 : index
    %c0_54 = arith.constant 0 : index
    %c0_55 = arith.constant 0 : index
    %61 = vector.load %arg12[%c1_53, %c0_54, %c0_55] : memref<6x10x8xf32, #tpu.memory_space<vmem>>, vector<4x8x8xf32>
    %62 = arith.truncf %61 : vector<4x8x8xf32> to vector<4x8x8xbf16>
    %c0_56 = arith.constant 0 : index
    %c0_57 = arith.constant 0 : index
    %c24 = arith.constant 24 : index
    %63 = vector.load %arg13[%c0_56, %c0_57, %c24] : memref<4x8x72xbf16, #tpu.memory_space<vmem>>, vector<4x8x8xbf16>
    tpu.vector_store %arg13[%c0_56, %c0_57, %c24], %62 {strides = array<i32>} : memref<4x8x72xbf16, #tpu.memory_space<vmem>>, vector<4x8x8xbf16>,
    %c1_58 = arith.constant 1 : index
    %c1_59 = arith.constant 1 : index
    %c0_60 = arith.constant 0 : index
    %64 = vector.load %arg12[%c1_58, %c1_59, %c0_60] : memref<6x10x8xf32, #tpu.memory_space<vmem>>, vector<4x8x8xf32>
    %65 = arith.truncf %64 : vector<4x8x8xf32> to vector<4x8x8xbf16>
    %c0_61 = arith.constant 0 : index
    %c0_62 = arith.constant 0 : index
    %c32 = arith.constant 32 : index
    %66 = vector.load %arg13[%c0_61, %c0_62, %c32] : memref<4x8x72xbf16, #tpu.memory_space<vmem>>, vector<4x8x8xbf16>
    tpu.vector_store %arg13[%c0_61, %c0_62, %c32], %65 {strides = array<i32>} : memref<4x8x72xbf16, #tpu.memory_space<vmem>>, vector<4x8x8xbf16>,
    %c1_63 = arith.constant 1 : index
    %c2_64 = arith.constant 2 : index
    %c0_65 = arith.constant 0 : index
    %67 = vector.load %arg12[%c1_63, %c2_64, %c0_65] : memref<6x10x8xf32, #tpu.memory_space<vmem>>, vector<4x8x8xf32>
    %68 = arith.truncf %67 : vector<4x8x8xf32> to vector<4x8x8xbf16>
    %c0_66 = arith.constant 0 : index
    %c0_67 = arith.constant 0 : index
    %c40 = arith.constant 40 : index
    %69 = vector.load %arg13[%c0_66, %c0_67, %c40] : memref<4x8x72xbf16, #tpu.memory_space<vmem>>, vector<4x8x8xbf16>
    tpu.vector_store %arg13[%c0_66, %c0_67, %c40], %68 {strides = array<i32>} : memref<4x8x72xbf16, #tpu.memory_space<vmem>>, vector<4x8x8xbf16>,
    %c2_68 = arith.constant 2 : index
    %c0_69 = arith.constant 0 : index
    %c0_70 = arith.constant 0 : index
    %70 = vector.load %arg12[%c2_68, %c0_69, %c0_70] : memref<6x10x8xf32, #tpu.memory_space<vmem>>, vector<4x8x8xf32>
    %71 = arith.truncf %70 : vector<4x8x8xf32> to vector<4x8x8xbf16>
    %c0_71 = arith.constant 0 : index
    %c0_72 = arith.constant 0 : index
    %c48 = arith.constant 48 : index
    %72 = vector.load %arg13[%c0_71, %c0_72, %c48] : memref<4x8x72xbf16, #tpu.memory_space<vmem>>, vector<4x8x8xbf16>
    tpu.vector_store %arg13[%c0_71, %c0_72, %c48], %71 {strides = array<i32>} : memref<4x8x72xbf16, #tpu.memory_space<vmem>>, vector<4x8x8xbf16>,
    %c2_73 = arith.constant 2 : index
    %c1_74 = arith.constant 1 : index
    %c0_75 = arith.constant 0 : index
    %73 = vector.load %arg12[%c2_73, %c1_74, %c0_75] : memref<6x10x8xf32, #tpu.memory_space<vmem>>, vector<4x8x8xf32>
    %74 = arith.truncf %73 : vector<4x8x8xf32> to vector<4x8x8xbf16>
    %c0_76 = arith.constant 0 : index
    %c0_77 = arith.constant 0 : index
    %c56 = arith.constant 56 : index
    %75 = vector.load %arg13[%c0_76, %c0_77, %c56] : memref<4x8x72xbf16, #tpu.memory_space<vmem>>, vector<4x8x8xbf16>
    tpu.vector_store %arg13[%c0_76, %c0_77, %c56], %74 {strides = array<i32>} : memref<4x8x72xbf16, #tpu.memory_space<vmem>>, vector<4x8x8xbf16>,
    %c2_78 = arith.constant 2 : index
    %c2_79 = arith.constant 2 : index
    %c0_80 = arith.constant 0 : index
    %76 = vector.load %arg12[%c2_78, %c2_79, %c0_80] : memref<6x10x8xf32, #tpu.memory_space<vmem>>, vector<4x8x8xf32>
    %77 = arith.truncf %76 : vector<4x8x8xf32> to vector<4x8x8xbf16>
    %c0_81 = arith.constant 0 : index
    %c0_82 = arith.constant 0 : index
    %c64 = arith.constant 64 : index
    %78 = vector.load %arg13[%c0_81, %c0_82, %c64] : memref<4x8x72xbf16, #tpu.memory_space<vmem>>, vector<4x8x8xbf16>
    tpu.vector_store %arg13[%c0_81, %c0_82, %c64], %77 {strides = array<i32>} : memref<4x8x72xbf16, #tpu.memory_space<vmem>>, vector<4x8x8xbf16>,
    %c0_83 = arith.constant 0 : index
    %c0_84 = arith.constant 0 : index
    %c0_85 = arith.constant 0 : index
    %79 = vector.load %arg13[%c0_83, %c0_84, %c0_85] : memref<4x8x72xbf16, #tpu.memory_space<vmem>>, vector<4x8x72xbf16>
    %c0_86 = arith.constant 0 : index
    %c0_87 = arith.constant 0 : index
    %80 = vector.load %arg7[%c0_86, %c0_87] : memref<72x8xbf16, #tpu.memory_space<vmem>>, vector<72x8xbf16>
    "tpu.trace_start"() <{level = 10 : i32, message = "hwk,ko->hwo"}> : () -> ()
    %cst_88 = arith.constant dense<0.000000e+00> : vector<4x8x8xf32>
    %81 = tpu.matmul %79, %80, %cst_88 {dimension_numbers = #tpu.dot_dimension_numbers<[2], [0], [0, 1], [1], [0, 0, 0, 1, 1, 1], [], []>} : vector<4x8x72xbf16>, vector<72x8xbf16>, vector<4x8x8xf32> -> vector<4x8x8xf32>
    "tpu.trace_stop"() : () -> ()
    %c0_89 = arith.constant 0 : index
    %c0_90 = arith.constant 0 : index
    %82 = vector.load %arg8[%c0_89, %c0_90] : memref<1x8xf32, #tpu.memory_space<vmem>>, vector<1x8xf32>
    %83 = vector.shape_cast %82 : vector<1x8xf32> to vector<1x1x8xf32>
    %84 = vector.broadcast %83 : vector<1x1x8xf32> to vector<4x8x8xf32>
    %85 = arith.addf %81, %84 : vector<4x8x8xf32>
    %c0_91 = arith.constant 0 : index
    %c0_92 = arith.constant 0 : index
    %c0_93 = arith.constant 0 : index
    %c0_94 = arith.constant 0 : index
    %86 = vector.load %arg9[%c0_91, %c0_92, %c0_93, %c0_94] : memref<1x4x8x8xf32, #tpu.memory_space<vmem>>, vector<1x4x8x8xf32>
    %87 = vector.shape_cast %86 : vector<1x4x8x8xf32> to vector<4x8x8xf32>
    %88 = vector.shape_cast %85 : vector<4x8x8xf32> to vector<1x4x8x8xf32>
    tpu.vector_store %arg9[%c0_91, %c0_92, %c0_93, %c0_94], %88 {strides = array<i32>} : memref<1x4x8x8xf32, #tpu.memory_space<vmem>>, vector<1x4x8x8xf32>,
    %cst_95 = arith.constant dense<0.000000e+00> : vector<8x8xf32>
    %89 = vector.multi_reduction <add>, %85, %cst_95 [0] : vector<4x8x8xf32> to vector<8x8xf32>
    %90 = arith.mulf %85, %85 : vector<4x8x8xf32>
    %cst_96 = arith.constant dense<0.000000e+00> : vector<8x8xf32>
    %91 = vector.multi_reduction <add>, %90, %cst_96 [0] : vector<4x8x8xf32> to vector<8x8xf32>
    %cst_97 = arith.constant dense<0.000000e+00> : vector<8xf32>
    %92 = vector.multi_reduction <add>, %89, %cst_97 [0] : vector<8x8xf32> to vector<8xf32>
    %93 = vector.shape_cast %92 : vector<8xf32> to vector<1x1x1x8xf32>
    %c0_98 = arith.constant 0 : index
    %c0_99 = arith.constant 0 : index
    %c0_100 = arith.constant 0 : index
    %c0_101 = arith.constant 0 : index
    %94 = vector.load %arg10[%c0_98, %c0_99, %c0_100, %c0_101] : memref<1x1x1x8xf32, #tpu.memory_space<vmem>>, vector<1x1x1x8xf32>
    tpu.vector_store %arg10[%c0_98, %c0_99, %c0_100, %c0_101], %93 {strides = array<i32>} : memref<1x1x1x8xf32, #tpu.memory_space<vmem>>, vector<1x1x1x8xf32>,
    %cst_102 = arith.constant dense<0.000000e+00> : vector<8xf32>
    %95 = vector.multi_reduction <add>, %91, %cst_102 [0] : vector<8x8xf32> to vector<8xf32>
    %96 = vector.shape_cast %95 : vector<8xf32> to vector<1x1x1x8xf32>
    %c0_103 = arith.constant 0 : index
    %c0_104 = arith.constant 0 : index
    %c0_105 = arith.constant 0 : index
    %c0_106 = arith.constant 0 : index
    %97 = vector.load %arg11[%c0_103, %c0_104, %c0_105, %c0_106] : memref<1x1x1x8xf32, #tpu.memory_space<vmem>>, vector<1x1x1x8xf32>
    tpu.vector_store %arg11[%c0_103, %c0_104, %c0_105, %c0_106], %96 {strides = array<i32>} : memref<1x1x1x8xf32, #tpu.memory_space<vmem>>, vector<1x1x1x8xf32>,
    return
  }
  func.func @transform_0(%arg0: i32, %arg1: i32) -> (i32, i32, i32, i32) {
    %c0_i32 = arith.constant 0 : i32
    %c0_i32_0 = arith.constant 0 : i32
    %c0_i32_1 = arith.constant 0 : i32
    return %arg0, %arg1, %c0_i32, %c0_i32_0 : i32, i32, i32, i32
  }
  func.func @transform_1(%arg0: i32, %arg1: i32) -> (i32, i32, i32, i32) {
    %c4_i32 = arith.constant 4 : i32
    %0 = arith.muli %arg1, %c4_i32 : i32
    %c1_i32 = arith.constant 1 : i32
    %1 = arith.subi %0, %c1_i32 : i32
    %c0_i32 = arith.constant 0 : i32
    %2 = arith.maxsi %1, %c0_i32 : i32
    %c0_i32_0 = arith.constant 0 : i32
    %c0_i32_1 = arith.constant 0 : i32
    %c0_i32_2 = arith.constant 0 : i32
    return %arg0, %2, %c0_i32_0, %c0_i32_1 : i32, i32, i32, i32
  }
  func.func @transform_2(%arg0: i32, %arg1: i32) -> (i32, i32, i32, i32) {
    %c4_i32 = arith.constant 4 : i32
    %0 = arith.muli %arg1, %c4_i32 : i32
    %c4_i32_0 = arith.constant 4 : i32
    %1 = arith.addi %0, %c4_i32_0 : i32
    %c7_i32 = arith.constant 7 : i32
    %2 = arith.minsi %1, %c7_i32 : i32
    %c0_i32 = arith.constant 0 : i32
    %c0_i32_1 = arith.constant 0 : i32
    %c0_i32_2 = arith.constant 0 : i32
    return %arg0, %2, %c0_i32, %c0_i32_1 : i32, i32, i32, i32
  }
  func.func @transform_3(%arg0: i32, %arg1: i32) -> (i32, i32) {
    %c0_i32 = arith.constant 0 : i32
    %c0_i32_0 = arith.constant 0 : i32
    %c0_i32_1 = arith.constant 0 : i32
    return %c0_i32, %c0_i32_0 : i32, i32
  }
  func.func @transform_4(%arg0: i32, %arg1: i32) -> (i32, i32) {
    %c0_i32 = arith.constant 0 : i32
    %c0_i32_0 = arith.constant 0 : i32
    %c0_i32_1 = arith.constant 0 : i32
    return %c0_i32, %c0_i32_0 : i32, i32
  }
  func.func @transform_5(%arg0: i32, %arg1: i32) -> (i32, i32) {
    %c0_i32 = arith.constant 0 : i32
    %c0_i32_0 = arith.constant 0 : i32
    %c0_i32_1 = arith.constant 0 : i32
    return %c0_i32, %c0_i32_0 : i32, i32
  }
  func.func @transform_6(%arg0: i32, %arg1: i32) -> (i32, i32) {
    %c0_i32 = arith.constant 0 : i32
    %c0_i32_0 = arith.constant 0 : i32
    %c0_i32_1 = arith.constant 0 : i32
    return %c0_i32, %c0_i32_0 : i32, i32
  }
  func.func @transform_7(%arg0: i32, %arg1: i32) -> (i32, i32, i32, i32) {
    %c0_i32 = arith.constant 0 : i32
    %c0_i32_0 = arith.constant 0 : i32
    %c0_i32_1 = arith.constant 0 : i32
    return %arg0, %arg1, %c0_i32, %c0_i32_0 : i32, i32, i32, i32
  }
  func.func @transform_8(%arg0: i32, %arg1: i32) -> (i32, i32, i32, i32) {
    %c0_i32 = arith.constant 0 : i32
    %c0_i32_0 = arith.constant 0 : i32
    %c0_i32_1 = arith.constant 0 : i32
    return %arg0, %arg1, %c0_i32, %c0_i32_0 : i32, i32, i32, i32
  }
  func.func @transform_9(%arg0: i32, %arg1: i32) -> (i32, i32, i32, i32) {
    %c0_i32 = arith.constant 0 : i32
    %c0_i32_0 = arith.constant 0 : i32
    %c0_i32_1 = arith.constant 0 : i32
    return %arg0, %arg1, %c0_i32, %c0_i32_0 : i32, i32, i32, i32
  }
}

</mosaic_0001>

<bundles_post_ra>
// kernel: down.5
= control target key start
LH: loop header
LB: loop body
LE: loop exit
PB: predicated region body
PF: predicated region fallthrough
CT: control target
= control target key end

     0   :  { %s1009_s0 = inlined_call_operand.hbm [shape: f32[2,8,8,8], index: 0, kind: input, shape index: {}]   ;;  %s1010_s1 = inlined_call_operand.hbm [shape: f32[1,8], index: 1, kind: input, shape index: {}]   ;;  %s1011_s2 = inlined_call_operand.hbm [shape: f32[1,8], index: 2, kind: input, shape index: {}]   ;;  %s1012_s3 = inlined_call_operand.hbm [shape: f32[2,8,8,8], index: 3, kind: output, shape index: {}]  }
   0x1   :  { %1021 = sst [smem:[#allocation14_spill]] %s1010_s1 }
   0x2   :  { %1022 = sst [smem:[#allocation15_spill]] %s1011_s2 }
   0x3   :  { %8 = vsyncpa [#allocation3], 0 }
   0x4   :  { %10 = vsyncpa [#allocation3 + $0x1], 0 }
   0x5   :  { %11 = vsyncpa [#allocation6], 0 }
   0x6   :  { %12 = vsyncpa [#allocation4], 0 }
   0x7   :  { %14 = vsyncpa [#allocation4 + $0x1], 0  ;;  %s738_s12 = smov 0   ;;  %s740_s13 = smov 0  }
   0x8   :  { %s742_s14 = smov 0   ;;  %s744_s15 = smov 0  }
   0x9   :  { %s746_s16 = smov 0   ;;  %s748_s17 = smov 0  }
   0xa   :  { %s750_s18 = smov 0   ;;  %s752_s19 = smov 0  }
   0xb LB: > { %1023 = sst [smem:[#allocation12_spill]] %s700_s17  ;;  %s394_s20 = sadd.s32 4294967295, %s708_s19   ;;  %s708_s19 = sphi %s752_s19, %s20_s19   ;;  %s704_s18 = sphi %s750_s18, %s1048_s18   ;;  %s700_s17 = sphi %s748_s17, %s1043_s17   ;;  %s696_s16 = sphi %s746_s16, %s1047_s16   ;;  %s692_s15 = sphi %s744_s15, %s1042_s15   ;;  %s688_s14 = sphi %s742_s14, %s1046_s14   ;;  %s684_s13 = sphi %s740_s13, %s1045_s13   ;;  %s680_s12 = sphi %s738_s12, %s1044_s12  }
   0xc   : > { %s395_s21 = sadd.s32 4294967294, %s708_s19   ;;  %p48_p0 = scmp.ne.s32.totalorder %s688_s14, %s684_s13 }
   0xd   : > { %p49_p1 = scmp.eq.s32.totalorder %s708_s19, 0  ;;  %p54_p2 = scmp.ne.s32.totalorder %s684_s13, %s680_s12 }
   0xe   : > { %p786_p3 = scmp.eq.s32.totalorder %s394_s20, 0  ;;  %p122_p4 = scmp.eq.s32.totalorder %s394_s20, 3 }
   0xf   : > { %p790_p5 = por %p49_p1, %p48_p0  ;;  %p128_p6 = scmp.eq.s32.totalorder %s395_s21, 3 }
  0x10   : > { %s1024_s23 = scalar_select %p786_p3, 1, 0 }
  0x11   : > { %p796_p7 = por %p786_p3, %p54_p2  ;;  %p800_p8 = por %p122_p4, %p48_p0 }
  0x12   : > { %p804_p9 = por %p128_p6, %p54_p2  ;;  %p396_p10 = scmp.ge.s32.totalorder %s708_s19, 1 }
  0x13   : > { %s1026_s25 = scalar_select %p796_p7, 1, 0 }
  0x14   : > { %s1027_s26 = scalar_select %p800_p8, 1, 0 }
  0x15   : > { %s1028_s27 = scalar_select %p804_p9, 1, 0 }
  0x16   : > { %p135_p11 = scmp.lt.s32.totalorder %s708_s19, 5  ;;  %s710_s29 = smov [#allocation5]  }
  0x17   : > { %s148_s30 = sshll.u32 %s710_s29, 4  ;;  %p446_p13 = scmp.lt.s32.totalorder %s708_s19, 4  ;;  %s149_s30 = int_to_ptr.vmem [resolvable:$true] %s148_s30 }
  0x18   : > { %p810_p12 = pnand %p396_p10, %p135_p11  ;;  %s711_s5 = smov [#allocation7]  }
  0x19   : > { %p819_p1 = pnand %p446_p13, %p790_p5  ;;  %s159_s6 = sshll.u32 %s711_s5, 4  ;;  %s829_s6 = int_to_ptr.vmem [resolvable:$true] %s159_s6 }
  0x1a   : > { %s1029_s28 = scalar_select %p810_p12, 1, 0 }
  0x1b   : > { %p429_p0 = pneg %p810_p12  ;;  %s1032_s1 = sld [smem:[#allocation14_spill]] }
  0x1c   : > { %s1030_s4 = scalar_select %p819_p1, 1, 0 }
  0x1d   : > { %p825_p2 = pnand %p429_p0, %p786_p3 }
  0x1f   : > { %p522_p5 = pneg %p825_p2 }
  0x21   : > { %s520_s10 = scalar_lea.hbm %s1032_s1, 16 }
  0x22   : > { %p521_p4 = scmp.ne.s32.totalorder %s1032_s1, %s520_s10  ;;  %p527_p11 = scmp.lt.u32.totalorder %s520_s10, %s1032_s1 }
  0x24   : > { %p523_p6 = pnand %p522_p5, %p521_p4 }
  0x26   : > { %p524_p10 = pneg %p523_p6 }
  0x28   : > { %p529_p13 = pnand %p527_p11, %p524_p10 }
  0x2a   : > { %532 = shalt.err (!%p529_p13)
}
  0x2b   : > { %s533_s29 = scalar_lea.vmem %s149_s30, 16  ;;  %s540_s5 = scalar_lea.vmem %s149_s30, 32 }
  0x2c   : > { %p534_p0 = scmp.ne.s32.totalorder %s149_s30, %s533_s29  ;;  %p541_p3 = scmp.lt.s32.totalorder %s149_s30, %s149_s30 }
  0x2d   : > { %p542_p7 = scmp.lt.s32.totalorder %s540_s5, %s533_s29 }
  0x2e   : > { %p536_p9 = pnand %p534_p0, %p522_p5 }
  0x2f   : > { %p543_p12 = por %p542_p7, %p541_p3 }
  0x30   : > { %p537_p8 = pneg %p536_p9 }
  0x32   : > { %p544_p1 = pnand %p543_p12, %p537_p8 }
  0x34   : > { %547 = shalt.err (!%p544_p1)
}
  0x35   : > { %432 = dma.hbm_to_vmem [thread:$0]  (!%p825_p2), %s1032_s1, 16, %s149_s30, [#allocation6]  }
  0x36   : > { %s1033_s2 = sld [smem:[#allocation15_spill]] }
  0x3c   : > { %s548_s20 = scalar_lea.hbm %s1033_s2, 16 }
  0x3d   : > { %p549_p9 = scmp.ne.s32.totalorder %s1033_s2, %s548_s20  ;;  %p555_p8 = scmp.lt.u32.totalorder %s548_s20, %s1033_s2 }
  0x3f   : > { %p551_p3 = pnand %p549_p9, %p522_p5 }
  0x41   : > { %p552_p7 = pneg %p551_p3 }
  0x43   : > { %p557_p12 = pnand %p555_p8, %p552_p7 }
  0x45   : > { %560 = shalt.err (!%p557_p12)
}
  0x46   : > { %s561_s30 = scalar_lea.vmem %s829_s6, 16  ;;  %s568_s8 = scalar_lea.vmem %s829_s6, 32 }
  0x47   : > { %p562_p1 = scmp.ne.s32.totalorder %s829_s6, %s561_s30  ;;  %p569_p10 = scmp.lt.s32.totalorder %s829_s6, %s829_s6 }
  0x48   : > { %p570_p11 = scmp.lt.s32.totalorder %s568_s8, %s561_s30 }
  0x49   : > { %p564_p4 = pnand %p562_p1, %p522_p5 }
  0x4a   : > { %p571_p13 = por %p570_p11, %p569_p10 }
  0x4b   : > { %p565_p6 = pneg %p564_p4 }
  0x4d   : > { %p572_p0 = pnand %p571_p13, %p565_p6 }
  0x4f   : > { %575 = shalt.err (!%p572_p0)
}
  0x50   : > { %435 = dma.hbm_to_vmem [thread:$0]  (!%p825_p2), %s1033_s2, 16, %s829_s6, [#allocation6]  }
  0x51   : > { %s29_s11 = sadd.s32 1, %s700_s17  ;;  %s32_s20 = sadd.s32 1, %s704_s18 }
  0x52   : > { %p30_p5 = scmp.ge.s32.totalorder %s29_s11, 2  ;;  %s170_s21 = sand.u32 1, %s688_s14  }
  0x53   : > { %s400_s24 = sshll.u32 %s170_s21, 5  ;;  %s401_s29 = sshll.u32 %s700_s17, 2 }
  0x54   : > { %s1050_s11 = smov (%p30_p5, %s29_s11), 0  ;;  %s1052_s20 = smov (!%p30_p5, %s32_s20), %s704_s18 }
  0x55   : > { %1034 = sst [smem:[#allocation13_spill]] %s1050_s11  ;;  %s37_s7 = ssub.s32 %s700_s17, %s1050_s11 }
  0x56   : > { %p34_p9 = scmp.ge.s32.totalorder %s1052_s20, 2  ;;  %s402_s5 = sshll.u32 %s704_s18, 3 }
  0x57   : > { %s174_s30 = scalar_lea.vmem [#allocation2], %s400_s24  ;;  %s180_s8 = sadd.s32 %s402_s5, %s401_s29 }
  0x58   : > { %s183_s6 = sshll.u32 %s174_s30, 4  ;;  %s1054_s20 = smov (%p34_p9, %s1052_s20), 0  ;;  %s891_s6 = int_to_ptr.vmem [resolvable:$true] %s183_s6 }
  0x59   : > { %s36_s9 = ssub.s32 %s704_s18, %s1054_s20  ;;  %s403_s10 = sshll.u32 %s180_s8, 7 }
  0x5a   : > { %s38_s22 = sor.u32 %s37_s7, %s36_s9  ;;  %s898_s11 = scalar_lea.hbm %s1009_s0, %s403_s10 }
  0x5b   : > { %p39_p2 = scmp.eq.s32.totalorder %s38_s22, 0  ;;  %s1035_s24 = sadd.s32 1, %s688_s14 }
  0x5c   : > { %s905_s17 = scalar_lea.sflag [#allocation3], %s170_s21  ;;  %s576_s29 = scalar_lea.hbm %s898_s11, 512 }
  0x5d   : > { %s903_s30 = scalar_select %p39_p2, %s688_s14, %s1035_s24  }
  0x5e   : > { %p577_p3 = scmp.ne.s32.totalorder %s898_s11, %s576_s29  ;;  %p1036_p7 = scmp.ne.s32.totalorder %s1030_s4, 0 }
  0x5f   : > { %s581_s7 = scalar_lea.hbm %s1009_s0, 2048  ;;  %p582_p4 = scmp.lt.u32.totalorder %s898_s11, %s1009_s0 }
  0x60   : > { %p578_p8 = pneg %p1036_p7  ;;  %p583_p6 = scmp.lt.u32.totalorder %s581_s7, %s576_s29 }
  0x61   : > { %p585_p11 = scmp.lt.u32.totalorder %s576_s29, %s898_s11 }
  0x62   : > { %p579_p12 = pnand %p578_p8, %p577_p3  ;;  %p584_p10 = por %p583_p6, %p582_p4 }
  0x64   : > { %p580_p1 = pneg %p579_p12  ;;  %p586_p13 = por %p585_p11, %p584_p10 }
  0x66   : > { %p587_p0 = pnand %p586_p13, %p580_p1 }
  0x68   : > { %590 = shalt.err (!%p587_p0)
}
  0x69   : > { %s591_s22 = scalar_lea.vmem %s891_s6, 512  ;;  %s712_s21 = smov [#allocation2]  }
  0x6a   : > { %p592_p5 = scmp.ne.s32.totalorder %s891_s6, %s591_s22  ;;  %s596_s9 = sshll.u32 %s712_s21, 4  ;;  %s597_s9 = int_to_ptr.vmem [resolvable:$false] %s596_s9 }
  0x6b   : > { %s598_s10 = scalar_lea.vmem %s597_s9, 1024  ;;  %p599_p3 = scmp.lt.s32.totalorder %s891_s6, %s597_s9 }
  0x6c   : > { %p594_p9 = pnand %p592_p5, %p578_p8  ;;  %p600_p12 = scmp.lt.s32.totalorder %s598_s10, %s591_s22 }
  0x6e   : > { %p595_p2 = pneg %p594_p9  ;;  %p601_p4 = por %p600_p12, %p599_p3 }
  0x70   : > { %p602_p6 = pnand %p601_p4, %p595_p2 }
  0x72   : > { %605 = shalt.err (!%p602_p6)
}
  0x73   : > { %s713_s24 = smov 128   ;;  %s714_s29 = smov 8  }
  0x74   : > { %439 = dma.hbm_to_vmem [thread:$0]  (!%p1036_p7), %s898_s11, 512, %s891_s6, %s905_s17, %s713_s24, %s713_s24, %s714_s29  }
  0x75   : > { %p1037_p8 = scmp.ne.s32.totalorder %s1029_s28, 0 }
  0x76   : > { %s936_s1 = sand.u32 (!%p1037_p8), 1, %s684_s13   ;;  %p1038_p1 = scmp.ne.s32.totalorder (!%p1037_p8), %s1026_s25, 0 }
  0x77   : > { %195 = sbr.rel (%p1037_p8) target bundleno = 158 (0x9e), region = 32  ;;  %s405_s2 = sshll.u32 (!%p1037_p8), %s936_s1, 5 }
  0x78   : > { %s198_s7 = scalar_lea.sflag (!%p1037_p8), [#allocation3], %s936_s1  ;;  %s201_s5 = scalar_lea.vmem (!%p1037_p8), [#allocation2], %s405_s2 }
  0x7e   : > { %667 = dma.done.wait (%p1038_p1), %s198_s7, 512  }
  0x7f   : > { %669 = vsyncadd (%p1038_p1), %s198_s7, 4294966784  ;;  %p1039_p10 = scmp.ne.s32.totalorder %s1024_s23, 0 }
  0x81   : > { %671 = dma.done.wait (%p1039_p10), [#allocation6], 32  }
  0x82   : > { %673 = vsyncadd (%p1039_p10), [#allocation6], 4294967264  ;;  %s412_s17 = sshll.u32 %s692_s15, 2  ;;  %s413_s28 = sshll.u32 %s696_s16, 3  ;;  %v234_v0 = vld [vmem:[%s201_s5] sm:$0xff]  ;;  %v235_v4 = vld [vmem:[%s201_s5 + $0x8] sm:$0xff] }
  0x83   : > { %v409_v1 = vld [vmem:[#allocation5] ss:$0 sm:$0xff]  ;;  %v410_v2 = vld [vmem:[#allocation7] ss:$0 sm:$0xff]  ;;  %s282_s4 = sadd.s32 %s413_s28, %s412_s17  ;;  %v236_v5 = vld [vmem:[%s201_s5 + $0x10] sm:$0xff]  ;;  %s231_s25 = scalar_lea.vmem [#allocation8], %s405_s2 }
  0x84   : > { %v245_v3 = vmul.f32 %v409_v1, %v234_v0  ;;  %v237_v6 = vld [vmem:[%s201_s5 + $0x18] sm:$0xff]  ;;  %s285_s11 = sshll.u32 %s231_s25, 4  ;;  %v246_v7 = vmul.f32 %v409_v1, %v235_v4  ;;  %v247_v8 = vmul.f32 %v409_v1, %v236_v5  ;;  %s414_s23 = sshll.u32 %s282_s4, 7  ;;  %vm264_vm0 = vcmask 64512   ;;  %s950_s11 = int_to_ptr.vmem [resolvable:$true] %s285_s11 }
  0x85   : > { %v248_v9 = vmul.f32 %v409_v1, %v237_v6  ;;  %s955_s6 = scalar_lea.hbm %s1012_s3, %s414_s23  ;;  %s270_s8 = scalar_lea.sflag [#allocation4], %s936_s1 }
  0x86   : > { %v256_v10 = vadd.f32 %v410_v2, %v245_v3  ;;  %v257_v11 = vadd.f32 %v410_v2, %v246_v7  ;;  %v258_v12 = vadd.f32 %v410_v2, %v247_v8  ;;  %s606_s22 = scalar_lea.vmem %s950_s11, 512  ;;  %p1040_p11 = scmp.ne.s32.totalorder %s1027_s26, 0 }
  0x87   : > { %v259_v13 = vadd.f32 %v410_v2, %v248_v9  ;;  %p607_p7 = scmp.ne.s32.totalorder %s950_s11, %s606_s22  ;;  %s715_s21 = smov [#allocation8]  }
  0x88   : > { %v260_v14 = vmax.f32 %v256_v10, 0.0  ;;  %v261_v15 = vmax.f32 %v257_v11, 0.0  ;;  %v262_v16 = vmax.f32 %v258_v12, 0.0  ;;  %s610_s9 = sshll.u32 %s715_s21, 4  ;;  %s611_s9 = int_to_ptr.vmem [resolvable:$false] %s610_s9 }
  0x89   : > { %v263_v17 = vmax.f32 %v259_v13, 0.0  ;;  %p608_p13 = pnand %p607_p7, %p1040_p11  ;;  %s612_s10 = scalar_lea.vmem %s611_s9, 1024 }
  0x8a   : > { %265 = vst.msk [vmem:[%s231_s25] sm:$0xff] %vm264_vm0, %v260_v14  ;;  %266 = vst.msk [vmem:[%s231_s25 + $0x8] sm:$0xff] %vm264_vm0, %v261_v15  ;;  %p613_p5 = scmp.lt.s32.totalorder %s950_s11, %s611_s9  ;;  %p614_p9 = scmp.lt.s32.totalorder %s612_s10, %s606_s22 }
  0x8b   : > { %267 = vst.msk [vmem:[%s231_s25 + $0x10] sm:$0xff] %vm264_vm0, %v262_v16  ;;  %268 = vst.msk [vmem:[%s231_s25 + $0x18] sm:$0xff] %vm264_vm0, %v263_v17  ;;  %p609_p0 = pneg %p608_p13 }
  0x8c   : > { %p615_p2 = por %p614_p9, %p613_p5 }
  0x8e   : > { %p616_p3 = pnand %p615_p2, %p609_p0 }
  0x90   : > { %619 = shalt.err (!%p616_p3)
}
  0x91   : > { %s620_s24 = scalar_lea.hbm %s955_s6, 512  ;;  %s624_s7 = scalar_lea.hbm %s1012_s3, 2048 }
  0x92   : > { %p621_p12 = scmp.ne.s32.totalorder %s955_s6, %s620_s24  ;;  %p625_p8 = scmp.lt.u32.totalorder %s955_s6, %s1012_s3 }
  0x93   : > { %p626_p1 = scmp.lt.u32.totalorder %s624_s7, %s620_s24  ;;  %p628_p7 = scmp.lt.u32.totalorder %s620_s24, %s955_s6 }
  0x94   : > { %p622_p4 = pnand %p621_p12, %p1040_p11 }
  0x95   : > { %p627_p10 = por %p626_p1, %p625_p8 }
  0x96   : > { %p623_p6 = pneg %p622_p4 }
  0x97   : > { %p629_p13 = por %p628_p7, %p627_p10 }
  0x99   : > { %p630_p0 = pnand %p629_p13, %p623_p6 }
  0x9b   : > { %633 = shalt.err (!%p630_p0)
}
  0x9c   : > { %s716_s28 = smov 128   ;;  %s717_s4 = smov 8  }
  0x9d   : > { %427 = dma.vmem_to_hbm [thread:$0]  (%p1040_p11), %s950_s11, 512, %s955_s6, %s270_s8, %s716_s28, %s716_s28, %s717_s4  }
  0x9e PF: > { %p449_p5 = scmp.ge.s32.totalorder %s708_s19, 2  ;;  %s300_s25 = sand.u32 1, %s680_s12  }
  0x9f   : > { %p1041_p9 = scmp.ne.s32.totalorder %s1028_s27, 0  ;;  %s301_s23 = scalar_lea.sflag [#allocation4], %s300_s25 }
  0xa1   : > { %p441_p2 = pnand %p449_p5, %p1041_p9 }
  0xa3   : > { %675 = dma.done.wait (!%p441_p2), %s301_s23, 512  }
  0xa4   : > { %677 = vsyncadd (!%p441_p2), %s301_s23, 4294966784  ;;  %s20_s19 = sadd.s32 1, %s708_s19   ;;  %s1042_s15 = sld [smem:[#allocation12_spill]] }
  0xa5   : > { %p17_p3 = scmp.ge.s32.totalorder %s20_s19, 6   ;;  %s1043_s17 = sld [smem:[#allocation13_spill]] }
  0xa6   : > { %s1044_s12 = smov %s684_s13  ;;  %s1045_s13 = smov %s688_s14 }
  0xa7   : > { %s1046_s14 = smov %s903_s30  ;;  %s1047_s16 = smov %s704_s18 }
  0xa8   : > { %s1048_s18 = smov %s1054_s20  ;;  %19 = sbr.rel (!%p17_p3) target bundleno = 11 (0xb), region = 85 }
  0xaf   :  { %306 = vsyncpa [#allocation3], 1 }
  0xb0   :  { %308 = vsyncpa [#allocation3 + $0x1], 1 }
  0xb1   :  { %309 = vsyncpa [#allocation6], 1 }
  0xb2   :  { %310 = vsyncpa [#allocation4], 1 }
  0xb3   :  { %312 = vsyncpa [#allocation4 + $0x1], 1 }

// kernel: down.3
= control target key start
LH: loop header
LB: loop body
LE: loop exit
PB: predicated region body
PF: predicated region fallthrough
CT: control target
= control target key end

     0   :  { %s2740_s0 = inlined_call_operand.hbm [shape: f32[2,16,8,8], index: 0, kind: input, shape index: {}, may-alias: {0,1,2}]   ;;  %s2741_s1 = inlined_call_operand.hbm [shape: f32[2,16,8,8], index: 1, kind: input, shape index: {}, may-alias: {0,1,2}]   ;;  %s2742_s2 = inlined_call_operand.hbm [shape: f32[2,16,8,8], index: 2, kind: input, shape index: {}, may-alias: {0,1,2}]   ;;  %s2743_s3 = inlined_call_operand.hbm [shape: bf16[36,8], index: 3, kind: input, shape index: {}]   ;;  %s2744_s4 = inlined_call_operand.hbm [shape: f32[1,8], index: 4, kind: input, shape index: {}]   ;;  %s2745_s5 = inlined_call_operand.hbm [shape: f32[2,8,8,8], index: 5, kind: output, shape index: {0}]   ;;  %s2746_s6 = inlined_call_operand.hbm [shape: f32[2,2,1,8], index: 6, kind: output, shape index: {1}]   ;;  %s2747_s7 = inlined_call_operand.hbm [shape: f32[2,2,1,8], index: 7, kind: output, shape index: {2}]  }
   0x1   :  { %2778 = sst [smem:[#allocation37_spill]] %s2740_s0 }
   0x2   :  { %2779 = sst [smem:[#allocation38_spill]] %s2741_s1 }
   0x3   :  { %2780 = sst [smem:[#allocation39_spill]] %s2742_s2 }
   0x4   :  { %2781 = sst [smem:[#allocation40_spill]] %s2743_s3 }
   0x5   :  { %2782 = sst [smem:[#allocation41_spill]] %s2744_s4 }
   0x6   :  { %2783 = sst [smem:[#allocation42_spill]] %s2745_s5 }
   0x7   :  { %2784 = sst [smem:[#allocation43_spill]] %s2746_s6 }
   0x8   :  { %2785 = sst [smem:[#allocation44_spill]] %s2747_s7 }
   0x9   :  { %13 = vsyncpa [#allocation5], 0 }
   0xa   :  { %15 = vsyncpa [#allocation5 + $0x1], 0 }
   0xb   :  { %16 = vsyncpa [#allocation8], 0 }
   0xc   :  { %18 = vsyncpa [#allocation8 + $0x1], 0 }
   0xd   :  { %19 = vsyncpa [#allocation11], 0 }
   0xe   :  { %20 = vsyncpa [#allocation6], 0 }
   0xf   :  { %22 = vsyncpa [#allocation6 + $0x1], 0 }
  0x10   :  { %23 = vsyncpa [#allocation15], 0 }
  0x11   :  { %25 = vsyncpa [#allocation15 + $0x1], 0  ;;  %s2079_s24 = smov 0   ;;  %s2081_s25 = smov 0  }
  0x12   :  { %s2083_s26 = smov 0   ;;  %s2085_s27 = smov 0  }
  0x13   :  { %s2087_s28 = smov 0   ;;  %s2089_s29 = smov 0  }
  0x14   :  { %s2091_s30 = smov 0   ;;  %s2093_s8 = smov 0  }
  0x15   :  { %s2095_s9 = smov 0   ;;  %s2097_s10 = smov 0  }
  0x16   :  { %s2099_s11 = smov 0   ;;  %s2101_s12 = smov 0  }
  0x17   :  { %s2103_s13 = smov 0   ;;  %s2105_s14 = smov 0  }
  0x18 LB: > { %2786 = sst [smem:[#allocation23_spill]] %s1960_s24  ;;  %s2150_s15 = sadd.s32 4294967295, %s2012_s14   ;;  %s2012_s14 = sphi %s2105_s14, %s31_s14   ;;  %s2008_s13 = sphi %s2103_s13, %s2869_s13   ;;  %s2004_s12 = sphi %s2101_s12, %s2868_s12   ;;  %s2000_s11 = sphi %s2099_s11, %s2867_s11   ;;  %s1996_s10 = sphi %s2097_s10, %s2866_s10   ;;  %s1992_s9 = sphi %s2095_s9, %s2876_s9   ;;  %s1988_s8 = sphi %s2093_s8, %s2875_s8   ;;  %s1984_s30 = sphi %s2091_s30, %s2874_s30   ;;  %s1980_s29 = sphi %s2089_s29, %s2873_s29   ;;  %s1976_s28 = sphi %s2087_s28, %s2872_s28   ;;  %s1972_s27 = sphi %s2085_s27, %s2871_s27   ;;  %s1968_s26 = sphi %s2083_s26, %s2870_s26   ;;  %s1964_s25 = sphi %s2081_s25, %s2862_s25   ;;  %s1960_s24 = sphi %s2079_s24, %s2861_s24  }
  0x19   : > { %2787 = sst [smem:[#allocation24_spill]] %s1964_s25  ;;  %p1331_p0 = scmp.ge.s32.totalorder %s2012_s14, 1 }
  0x1a   : > { %2788 = sst [smem:[#allocation25_spill]] %s1968_s26  ;;  %p2750_p1 = scmp.eq.s32.totalorder %s2150_s15, 0 }
  0x1b   : > { %2789 = sst [smem:[#allocation26_spill]] %s1976_s28  ;;  %p274_p3 = scmp.lt.s32.totalorder %s2012_s14, 5 }
  0x1c   : > { %2790 = sst [smem:[#allocation27_spill]] %s1996_s10  ;;  %s2014_s17 = smov [#allocation10]  }
  0x1d   : > { %2791 = sst [smem:[#allocation28_spill]] %s2000_s11  ;;  %p2156_p4 = pnand %p1331_p0, %p274_p3 }
  0x1e   : > { %2792 = sst [smem:[#allocation29_spill]] %s2004_s12  ;;  %s286_s18 = sshll.u32 %s2014_s17, 4  ;;  %s287_s18 = int_to_ptr.vmem [resolvable:$true] %s286_s18 }
  0x1f   : > { %2793 = sst [smem:[#allocation30_spill]] %s2008_s13  ;;  %p1479_p5 = pneg %p2156_p4 }
  0x20   : > { %s2794_s16 = scalar_select %p2156_p4, 1, 0 }
  0x21   : > { %p2164_p6 = pnand %p1479_p5, %p2750_p1  ;;  %s2797_s3 = sld [smem:[#allocation40_spill]] }
  0x22   : > { %2795 = sst [smem:[#allocation31_spill]] %s2794_s16 }
  0x23   : > { %p2767_p8 = pneg %p2164_p6 }
  0x27   : > { %s1648_s22 = scalar_lea.hbm %s2797_s3, 320 }
  0x28   : > { %p1649_p7 = scmp.ne.s32.totalorder %s2797_s3, %s1648_s22  ;;  %p1655_p11 = scmp.lt.u32.totalorder %s1648_s22, %s2797_s3 }
  0x2a   : > { %p1651_p9 = pnand %p2767_p8, %p1649_p7 }
  0x2c   : > { %p1652_p10 = pneg %p1651_p9 }
  0x2e   : > { %p1657_p12 = pnand %p1655_p11, %p1652_p10 }
  0x30   : > { %1660 = shalt.err (!%p1657_p12)
}
  0x31   : > { %s1661_s20 = scalar_lea.vmem %s287_s18, 320  ;;  %p1669_p5 = scmp.lt.s32.totalorder %s287_s18, %s287_s18 }
  0x32   : > { %p1662_p13 = scmp.ne.s32.totalorder %s287_s18, %s1661_s20  ;;  %p1670_p2 = scmp.lt.s32.totalorder %s1661_s20, %s1661_s20 }
  0x34   : > { %p1664_p0 = pnand %p1662_p13, %p2767_p8  ;;  %p1671_p1 = por %p1670_p2, %p1669_p5 }
  0x36   : > { %p1665_p3 = pneg %p1664_p0 }
  0x38   : > { %p1672_p4 = pnand %p1671_p1, %p1665_p3 }
  0x3a   : > { %1675 = shalt.err (!%p1672_p4)
}
  0x3b   : > { %s2015_s7 = smov 64   ;;  %s2016_s6 = smov 4  }
  0x3c   : > { %1482 = dma.hbm_to_vmem [thread:$0]  (!%p2164_p6), %s2797_s3, 320, %s287_s18, [#allocation11], %s2015_s7, %s2015_s7, %s2016_s6  }
  0x3d   : > { %s40_s23 = sadd.s32 1, %s2004_s12  ;;  %s43_s17 = sadd.s32 1, %s2008_s13 }
  0x3e   : > { %p41_p1 = scmp.ge.s32.totalorder %s40_s23, 2  ;;  %p2766_p2 = scmp.eq.s32.totalorder %s2012_s14, 0 }
  0x3f   : > { %s1325_s20 = sshll.u32 %s2004_s12, 2  ;;  %s88_s5 = sadd.s32 1, %s1980_s29 }
  0x40   : > { %s2878_s23 = smov (%p41_p1, %s40_s23), 0  ;;  %s2880_s17 = smov (!%p41_p1, %s43_s17), %s2008_s13 }
  0x41   : > { %2798 = sst [smem:[#allocation32_spill]] %s2878_s23  ;;  %s48_s11 = ssub.s32 %s2004_s12, %s2878_s23 }
  0x42   : > { %s1326_s10 = sadd.s32 4294967295, %s1325_s20  ;;  %p45_p4 = scmp.ge.s32.totalorder %s2880_s17, 2 }
  0x43   : > { %p77_p7 = scmp.gt.s32.totalorder %s1326_s10, 0  ;;  %s1327_s18 = sshll.u32 %s2878_s23, 2 }
  0x44   : > { %p95_p9 = scmp.ne.s32.totalorder %s1980_s29, %s1976_s28  ;;  %s2882_s17 = smov (%p45_p4, %s2880_s17), 0 }
  0x45   : > { %2799 = sst [smem:[#allocation33_spill]] %s2882_s17  ;;  %s2884_s10 = smov (!%p77_p7, %s1326_s10), 0 }
  0x46   : > { %s2207_s7 = ssub.s32 %s2008_s13, %s2882_s17  ;;  %s1328_s6 = sadd.s32 4294967295, %s1327_s18 }
  0x47   : > { %2800 = sst [smem:[#allocation34_spill]] %s2207_s7  ;;  %s2210_s21 = sor.u32 %s48_s11, %s2207_s7 }
  0x48   : > { %p81_p10 = scmp.gt.s32.totalorder %s1328_s6, 0  ;;  %p2215_p12 = por %p95_p9, %p2766_p2 }
  0x49   : > { %p101_p13 = scmp.ne.s32.totalorder %s1976_s28, %s1972_s27  ;;  %s2221_s3 = sadd.s32 4, %s1325_s20 }
  0x4a   : > { %s2886_s6 = smov (!%p81_p10, %s1328_s6), 0  ;;  %p2802_p3 = scmp.eq.s32.totalorder %s2150_s15, 0 }
  0x4b   : > { %s84_s17 = ssub.s32 %s2884_s10, %s2886_s6  ;;  %s2231_s16 = sadd.s32 4, %s1327_s18 }
  0x4c   : > { %s85_s11 = sor.u32 %s84_s17, %s2207_s7  ;;  %p2227_p5 = por %p101_p13, %p2802_p3 }
  0x4d   : > { %p86_p1 = scmp.eq.s32.totalorder %s85_s11, 0  ;;  %p2765_p7 = scmp.lt.s32.totalorder %s2012_s14, 4 }
  0x4e   : > { %s2803_s23 = scalar_select %p2227_p5, 1, 0 }
  0x4f   : > { %s2236_s27 = scalar_select %p86_p1, %s1980_s29, %s88_s5  }
  0x50   : > { %2804 = sst [smem:[#allocation35_spill]] %s2803_s23  ;;  %s2239_s20 = sshll.u32 %s2008_s13, 4 }
  0x51   : > { %s334_s6 = sand.u32 1, %s2012_s14   ;;  %s336_s17 = sand.u32 1, %s1980_s29  }
  0x52   : > { %s1339_s28 = sshll.u32 %s336_s17, 4  ;;  %s1342_s2 = sshll.u32 %s2884_s10, 1 }
  0x53   : > { %s348_s7 = sadd.s32 %s1342_s2, %s2239_s20  ;;  %s338_s23 = scalar_lea.vmem [#allocation7], %s1339_s28 }
  0x54   : > { %s1344_s24 = sshll.u32 %s348_s7, 7  ;;  %s351_s11 = sshll.u32 %s338_s23, 4  ;;  %s2249_s11 = int_to_ptr.vmem [resolvable:$true] %s351_s11 }
  0x55   : > { %s2805_s1 = sld [smem:[#allocation38_spill]]  ;;  %p2255_p9 = pnand %p2765_p7, %p2215_p12 }
  0x56   : > { %s2017_s2 = smov [#allocation12]  }
  0x57   : > { %s300_s28 = sshll.u32 %s2017_s2, 4  ;;  %p1678_p13 = pneg %p2255_p9  ;;  %s2259_s28 = int_to_ptr.vmem [resolvable:$true] %s300_s28 }
  0x5b   : > { %s2247_s18 = scalar_lea.hbm %s2805_s1, %s1344_s24  ;;  %s2261_s24 = scalar_lea.sflag [#allocation8], %s334_s6 }
  0x5c   : > { %s1676_s25 = scalar_lea.hbm %s2247_s18, 256  ;;  %s1681_s23 = scalar_lea.hbm %s2805_s1, 4096 }
  0x5d   : > { %p1677_p10 = scmp.ne.s32.totalorder %s2247_s18, %s1676_s25  ;;  %p1682_p12 = scmp.lt.u32.totalorder %s2247_s18, %s2805_s1 }
  0x5e   : > { %p1683_p4 = scmp.lt.u32.totalorder %s1681_s23, %s1676_s25  ;;  %p1685_p7 = scmp.lt.u32.totalorder %s1676_s25, %s2247_s18 }
  0x5f   : > { %p1679_p3 = pnand %p1678_p13, %p1677_p10 }
  0x60   : > { %p1684_p0 = por %p1683_p4, %p1682_p12 }
  0x61   : > { %p1680_p1 = pneg %p1679_p3 }
  0x62   : > { %p1686_p2 = por %p1685_p7, %p1684_p0 }
  0x64   : > { %p1687_p11 = pnand %p1686_p2, %p1680_p1 }
  0x66   : > { %1690 = shalt.err (!%p1687_p11)
}
  0x67   : > { %s1691_s6 = scalar_lea.vmem %s2249_s11, 256  ;;  %s2018_s17 = smov [#allocation7]  }
  0x68   : > { %p1692_p10 = scmp.ne.s32.totalorder %s2249_s11, %s1691_s6  ;;  %s1696_s2 = sshll.u32 %s2018_s17, 4  ;;  %s1697_s2 = int_to_ptr.vmem [resolvable:$false] %s1696_s2 }
  0x69   : > { %s1698_s26 = scalar_lea.vmem %s1697_s2, 512  ;;  %p1699_p5 = scmp.lt.s32.totalorder %s2249_s11, %s1697_s2 }
  0x6a   : > { %p1694_p3 = pnand %p1692_p10, %p1678_p13  ;;  %p1700_p4 = scmp.lt.s32.totalorder %s1698_s26, %s1691_s6 }
  0x6c   : > { %p1695_p8 = pneg %p1694_p3  ;;  %p1701_p12 = por %p1700_p4, %p1699_p5 }
  0x6e   : > { %p1702_p0 = pnand %p1701_p12, %p1695_p8 }
  0x70   : > { %1705 = shalt.err (!%p1702_p0)
}
  0x71   : > { %s2769_s25 = smov 128   ;;  %s2771_s10 = smov 8  }
  0x72   : > { %1492 = dma.hbm_to_vmem [thread:$0]  (!%p2255_p9), %s2247_s18, 256, %s2249_s11, %s2261_s24, %s2769_s25, %s2769_s25, %s2771_s10  }
  0x73   : > { %s2807_s4 = sld [smem:[#allocation41_spill]]  ;;  %p2808_p2 = pneg %p2164_p6 }
  0x79   : > { %s1706_s22 = scalar_lea.hbm %s2807_s4, 16 }
  0x7a   : > { %p1707_p8 = scmp.ne.s32.totalorder %s2807_s4, %s1706_s22  ;;  %p1713_p7 = scmp.lt.u32.totalorder %s1706_s22, %s2807_s4 }
  0x7c   : > { %p1709_p11 = pnand %p1707_p8, %p2808_p2 }
  0x7e   : > { %p1710_p5 = pneg %p1709_p11 }
  0x80   : > { %p1715_p13 = pnand %p1713_p7, %p1710_p5 }
  0x82   : > { %1718 = shalt.err (!%p1715_p13)
}
  0x83   : > { %s1719_s11 = scalar_lea.vmem %s2259_s28, 16  ;;  %p2809_p1 = pmov %p2808_p2 }
  0x84   : > { %p1720_p9 = scmp.ne.s32.totalorder %s2259_s28, %s1719_s11  ;;  %s1726_s18 = scalar_lea.vmem %s2259_s28, 32 }
  0x85   : > { %p1727_p4 = scmp.lt.s32.totalorder %s2259_s28, %s2259_s28  ;;  %p1728_p12 = scmp.lt.s32.totalorder %s1726_s18, %s1719_s11 }
  0x86   : > { %p1722_p10 = pnand %p1720_p9, %p2809_p1 }
  0x87   : > { %p1729_p0 = por %p1728_p12, %p1727_p4 }
  0x88   : > { %p1723_p3 = pneg %p1722_p10 }
  0x8a   : > { %p1730_p8 = pnand %p1729_p0, %p1723_p3 }
  0x8c   : > { %1733 = shalt.err (!%p1730_p8)
}
  0x8d   : > { %1485 = dma.hbm_to_vmem [thread:$0]  (!%p2164_p6), %s2807_s4, 16, %s2259_s28, [#allocation11]  }
  0x8e   : > { %s2773_s19 = sadd.s32 4294967294, %s2012_s14   ;;  %s52_s7 = sadd.s32 1, %s1992_s9 }
  0x8f   : > { %p59_p2 = scmp.ne.s32.totalorder %s1992_s9, %s1988_s8  ;;  %p2810_p11 = scmp.eq.s32.totalorder %s2210_s21, 0 }
  0x90   : > { %p2812_p5 = scmp.eq.s32.totalorder %s2012_s14, 0  ;;  %p65_p13 = scmp.ne.s32.totalorder %s1988_s8, %s1984_s30 }
  0x91   : > { %s2325_s22 = scalar_select %p2810_p11, %s1992_s9, %s52_s7  }
  0x92   : > { %p2329_p7 = por %p2812_p5, %p59_p2  ;;  %p2814_p9 = scmp.eq.s32.totalorder %s2150_s15, 3 }
  0x93   : > { %2811 = sst [smem:[#allocation36_spill]] %s2325_s22  ;;  %p211_p6 = scmp.eq.s32.totalorder %s2773_s19, 3 }
  0x94   : > { %p2337_p1 = por %p2814_p9, %p59_p2  ;;  %p2816_p10 = scmp.eq.s32.totalorder %s2150_s15, 0 }
  0x95   : > { %s311_s28 = sand.u32 1, %s1992_s9   ;;  %p2350_p4 = por %p211_p6, %p65_p13 }
  0x96   : > { %s2815_s17 = scalar_select %p2337_p1, 1, 0 }
  0x97   : > { %p2345_p3 = por %p2816_p10, %p65_p13  ;;  %s1335_s26 = sshll.u32 %s311_s28, 6 }
  0x98   : > { %s2818_s2 = scalar_select %p2350_p4, 1, 0 }
  0x99   : > { %s1336_s11 = sshll.u32 %s2004_s12, 3  ;;  %s315_s23 = scalar_lea.vmem [#allocation4], %s1335_s26 }
  0x9a   : > { %s321_s18 = sadd.s32 %s2239_s20, %s1336_s11  ;;  %s324_s7 = sshll.u32 %s315_s23, 4  ;;  %s2361_s7 = int_to_ptr.vmem [resolvable:$true] %s324_s7 }
  0x9b   : > { %s1338_s5 = sshll.u32 %s321_s18, 7  ;;  %s2819_s0 = sld [smem:[#allocation37_spill]] }
  0x9c   : > { %p2820_p12 = scmp.lt.s32.totalorder %s2012_s14, 4  ;;  %s2371_s26 = scalar_lea.sflag [#allocation5], %s311_s28 }
  0x9e   : > { %p2367_p0 = pnand %p2820_p12, %p2329_p7 }
  0xa0   : > { %p1736_p2 = pneg %p2367_p0 }
  0xa1   : > { %s2359_s19 = scalar_lea.hbm %s2819_s0, %s1338_s5  ;;  %s1739_s6 = scalar_lea.hbm %s2819_s0, 4096 }
  0xa2   : > { %s1734_s11 = scalar_lea.hbm %s2359_s19, 1024  ;;  %p1740_p7 = scmp.lt.u32.totalorder %s2359_s19, %s2819_s0 }
  0xa3   : > { %p1735_p8 = scmp.ne.s32.totalorder %s2359_s19, %s1734_s11  ;;  %p1741_p13 = scmp.lt.u32.totalorder %s1739_s6, %s1734_s11 }
  0xa4   : > { %p1743_p6 = scmp.lt.u32.totalorder %s1734_s11, %s2359_s19 }
  0xa5   : > { %p1737_p11 = pnand %p1736_p2, %p1735_p8  ;;  %p1742_p9 = por %p1741_p13, %p1740_p7 }
  0xa7   : > { %p1738_p5 = pneg %p1737_p11  ;;  %p1744_p10 = por %p1743_p6, %p1742_p9 }
  0xa9   : > { %p1745_p12 = pnand %p1744_p10, %p1738_p5 }
  0xab   : > { %1748 = shalt.err (!%p1745_p12)
}
  0xac   : > { %s1749_s28 = scalar_lea.vmem %s2361_s7, 1024  ;;  %s2021_s23 = smov [#allocation4]  }
  0xad   : > { %p1750_p8 = scmp.ne.s32.totalorder %s2361_s7, %s1749_s28  ;;  %s1754_s25 = sshll.u32 %s2021_s23, 4  ;;  %s1755_s25 = int_to_ptr.vmem [resolvable:$false] %s1754_s25 }
  0xae   : > { %s1756_s10 = scalar_lea.vmem %s1755_s25, 2048  ;;  %p1757_p1 = scmp.lt.s32.totalorder %s2361_s7, %s1755_s25 }
  0xaf   : > { %p1752_p11 = pnand %p1750_p8, %p1736_p2  ;;  %p1758_p7 = scmp.lt.s32.totalorder %s1756_s10, %s1749_s28 }
  0xb1   : > { %p1753_p4 = pneg %p1752_p11  ;;  %p1759_p13 = por %p1758_p7, %p1757_p1 }
  0xb3   : > { %p1760_p9 = pnand %p1759_p13, %p1753_p4 }
  0xb5   : > { %1763 = shalt.err (!%p1760_p9)
}
  0xb6   : > { %s2822_s11 = smov 8   ;;  %s2823_s6 = smov 128  }
  0xb7   : > { %s2824_s18 = sld [smem:[#allocation25_spill]]  ;;  %s2825_s5 = sld [smem:[#allocation24_spill]] }
  0xb8   : > { %s2826_s23 = sld [smem:[#allocation23_spill]]  ;;  %s2827_s28 = sld [smem:[#allocation34_spill]] }
  0xb9   : > { %1489 = dma.hbm_to_vmem [thread:$0]  (!%p2367_p0), %s2359_s19, 1024, %s2361_s7, %s2371_s26, %s2823_s6, %s2823_s6, %s2822_s11  }
  0xba   : > { %p2828_p1 = scmp.lt.s32.totalorder %s2221_s3, 7  ;;  %p2829_p4 = scmp.lt.s32.totalorder %s2231_s16, 7 }
  0xbb   : > { %p2830_p6 = scmp.eq.s32.totalorder %s2012_s14, 0  ;;  %p2832_p8 = scmp.eq.s32.totalorder %s2150_s15, 0 }
  0xbc   : > { %s2888_s3 = smov (!%p2828_p1, %s2221_s3), 7  ;;  %s2890_s16 = smov (!%p2829_p4, %s2231_s16), 7 }
  0xbd   : > { %s124_s1 = sadd.s32 1, %s2824_s18  ;;  %p131_p2 = scmp.ne.s32.totalorder %s2824_s18, %s2825_s5 }
  0xbe   : > { %s120_s25 = ssub.s32 %s2888_s3, %s2890_s16  ;;  %p137_p5 = scmp.ne.s32.totalorder %s2825_s5, %s2826_s23 }
  0xbf   : > { %s121_s10 = sor.u32 %s120_s25, %s2827_s28  ;;  %p2416_p10 = por %p131_p2, %p2830_p6 }
  0xc0   : > { %p122_p12 = scmp.eq.s32.totalorder %s121_s10, 0  ;;  %p2422_p11 = por %p137_p5, %p2832_p8 }
  0xc1   : > { %s363_s7 = sand.u32 1, %s2824_s18   ;;  %s1347_s26 = sshll.u32 %s2888_s3, 1 }
  0xc2   : > { %s2833_s19 = scalar_select %p2422_p11, 1, 0 }
  0xc3   : > { %s2892_s18 = smov (!%p122_p12, %s2824_s18), %s124_s1  ;;  %s1345_s16 = sshll.u32 %s363_s7, 4 }
  0xc4   : > { %s375_s4 = sadd.s32 %s1347_s26, %s2239_s20  ;;  %s2834_s25 = sld [smem:[#allocation39_spill]] }
  0xc5   : > { %s1349_s5 = sshll.u32 %s375_s4, 7  ;;  %s365_s10 = scalar_lea.vmem [#allocation9], %s1345_s16 }
  0xc6   : > { %s378_s12 = sshll.u32 %s365_s10, 4  ;;  %p2836_p0 = scmp.lt.s32.totalorder %s2012_s14, 4  ;;  %s2436_s12 = int_to_ptr.vmem [resolvable:$true] %s378_s12 }
  0xc8   : > { %p2442_p7 = pnand %p2836_p0, %p2416_p10 }
  0xca   : > { %s2835_s22 = smov %s2834_s25  ;;  %s2434_s13 = scalar_lea.hbm %s2834_s25, %s1349_s5 }
  0xcb   : > { %s1764_s4 = scalar_lea.hbm %s2434_s13, 256  ;;  %p1766_p9 = pneg %p2442_p7 }
  0xcc   : > { %p1765_p13 = scmp.ne.s32.totalorder %s2434_s13, %s1764_s4  ;;  %s1769_s7 = scalar_lea.hbm %s2835_s22, 4096 }
  0xcd   : > { %p1770_p2 = scmp.lt.u32.totalorder %s2434_s13, %s2835_s22  ;;  %p1771_p5 = scmp.lt.u32.totalorder %s1769_s7, %s1764_s4 }
  0xce   : > { %p1767_p1 = pnand %p1766_p9, %p1765_p13  ;;  %p1773_p10 = scmp.lt.u32.totalorder %s1764_s4, %s2434_s13 }
  0xcf   : > { %p1772_p6 = por %p1771_p5, %p1770_p2 }
  0xd0   : > { %p1768_p4 = pneg %p1767_p1 }
  0xd1   : > { %p1774_p12 = por %p1773_p10, %p1772_p6 }
  0xd3   : > { %p1775_p8 = pnand %p1774_p12, %p1768_p4 }
  0xd5   : > { %1778 = shalt.err (!%p1775_p8)
}
  0xd6   : > { %s1779_s16 = scalar_lea.vmem %s2436_s12, 256  ;;  %s2022_s5 = smov [#allocation9]  }
  0xd7   : > { %p1780_p0 = scmp.ne.s32.totalorder %s2436_s12, %s1779_s16  ;;  %s1784_s23 = sshll.u32 %s2022_s5, 4  ;;  %s1785_s23 = int_to_ptr.vmem [resolvable:$false] %s1784_s23 }
  0xd8   : > { %s1786_s28 = scalar_lea.vmem %s1785_s23, 512  ;;  %p1787_p11 = scmp.lt.s32.totalorder %s2436_s12, %s1785_s23 }
  0xd9   : > { %p1782_p13 = pnand %p1780_p0, %p1766_p9  ;;  %p1788_p2 = scmp.lt.s32.totalorder %s1786_s28, %s1779_s16 }
  0xdb   : > { %p1783_p1 = pneg %p1782_p13  ;;  %p1789_p5 = por %p1788_p2, %p1787_p11 }
  0xdd   : > { %p1790_p6 = pnand %p1789_p5, %p1783_p1 }
  0xdf   : > { %1793 = shalt.err (!%p1790_p6)
}
  0xe0   : > { %1495 = dma.hbm_to_vmem [thread:$0]  (!%p2442_p7), %s2434_s13, 256, %s2436_s12, %s2261_s24, %s2823_s6, %s2823_s6, %s2822_s11  }
  0xe1   : > { %s2838_s25 = sld [smem:[#allocation31_spill]] }
  0xe7   : > { %p2839_p9 = scmp.ne.s32.totalorder %s2838_s25, 0 }
  0xe8   : > { %s2478_s10 = sand.u32 (!%p2839_p9), 1, %s1988_s8  }
  0xe9   : > { %390 = sbr.rel (%p2839_p9) target bundleno = 926 (0x39e), region = 40  ;;  %s1351_s4 = sshll.u32 (!%p2839_p9), %s2478_s10, 6 }
  0xea   : > { %s393_s20 = scalar_lea.sflag (!%p2839_p9), [#allocation5], %s2478_s10  ;;  %s2482_s1 = scalar_lea.vmem (!%p2839_p9), [#allocation4], %s1351_s4 }
  0xf0   : > { %1935 = dma.done.wait (%p2345_p3), %s393_s20, 1024  }
  0xf1   : > { %1937 = vsyncadd (%p2345_p3), %s393_s20, 4294966272  ;;  %s2840_s12 = sld [smem:[#allocation26_spill]]  ;;  %s2841_s13 = sld [smem:[#allocation35_spill]] }
  0xf2   : > { %s401_s24 = sand.u32 1, %s2150_s15  }
  0xf3   : > { %s402_s3 = scalar_lea.sflag [#allocation8], %s401_s24 }
  0xf7   : > { %s403_s11 = sand.u32 1, %s2840_s12   ;;  %p2842_p11 = scmp.ne.s32.totalorder %s2841_s13, 0 }
  0xf8   : > { %s2490_s6 = sshll.u32 %s403_s11, 4 }
  0xf9   : > { %s405_s7 = scalar_lea.vmem [#allocation7], %s2490_s6 }
  0xfa   : > { %1939 = dma.done.wait (%p2842_p11), %s402_s3, 256  }
  0xfb   : > { %1941 = vsyncadd (%p2842_p11), %s402_s3, 4294967040  ;;  %s2843_s0 = sld [smem:[#allocation24_spill]]  ;;  %p2844_p3 = scmp.ne.s32.totalorder %s2833_s19, 0 }
 0x101   : > { %s412_s21 = sand.u32 1, %s2843_s0  }
 0x102   : > { %s2500_s26 = sshll.u32 %s412_s21, 4 }
 0x103   : > { %s414_s16 = scalar_lea.vmem [#allocation9], %s2500_s26 }
 0x104   : > { %1943 = dma.done.wait (%p2844_p3), %s402_s3, 256  }
 0x105   : > { %1945 = vsyncadd (%p2844_p3), %s402_s3, 4294967040  ;;  %p2845_p7 = scmp.eq.s32.totalorder %s2150_s15, 0 }
 0x107   : > { %1947 = dma.done.wait (%p2845_p7), [#allocation11], 336   ;;  %p2846_p4 = pmov %p2845_p7 }
 0x108   : > { %vm562_vm0 = vcmask 24576   ;;  %v2023_v0 = vmov 0.0   ;;  %v486_v1 = vld [vmem:[%s2482_s1 + $0x10] sm:$0xff]  ;;  %v484_v2 = vld [vmem:[%s2482_s1] sm:$0xff]  ;;  %s2024_s19 = smov 124   ;;  %v487_v3 = vld [vmem:[%s2482_s1 + $0x18] sm:$0xff] }
 0x109   : > { %1949 = vsyncadd (%p2846_p4), [#allocation11], 4294966960  ;;  %563 = vst.msk [vmem:[#allocation2] sm:$0x1] %vm562_vm0, %v2023_v0  ;;  %504 = vrot.lane.b32.xlu1 %v486_v1, %s2024_s19  ;;  %500 = vrot.lane.b32.xlu0 %v484_v2, %s2024_s19  ;;  %v485_v4 = vld [vmem:[%s2482_s1 + $0x8] sm:$0xff]  ;;  %v488_v6 = vld [vmem:[%s2482_s1 + $0x20] sm:$0xff] }
 0x10a   : > { %564 = vst.msk [vmem:[#allocation2 + $0x10] sm:$0x1] %vm562_vm0, %v2023_v0  ;;  %565 = vst.msk [vmem:[#allocation2 + $0x20] sm:$0x1] %vm562_vm0, %v2023_v0  ;;  %v489_v5 = vld [vmem:[%s2482_s1 + $0x28] sm:$0xff]  ;;  %s1356_s5 = sshll.u32 %s2478_s10, 5 }
 0x10b   : > { %566 = vst.msk [vmem:[#allocation2 + $0x30] sm:$0x1] %vm562_vm0, %v2023_v0  ;;  %567 = vst.msk [vmem:[#allocation2 + $0x40] sm:$0x1] %vm562_vm0, %v2023_v0  ;;  %v491_v7 = vld [vmem:[%s2482_s1 + $0x38] sm:$0xff]  ;;  %v490_v8 = vld [vmem:[%s2482_s1 + $0x30] sm:$0xff] }
 0x10c   : > { %568 = vst.msk [vmem:[#allocation2 + $0x50] sm:$0x1] %vm562_vm0, %v2023_v0  ;;  %569 = vst.msk [vmem:[#allocation2 + $0x9] sm:$0x1] %vm562_vm0, %v2023_v0  ;;  %v537_v9 = vld [vmem:[%s405_s7 + $0x8] sm:$0xff]  ;;  %v536_v10 = vld [vmem:[%s405_s7] sm:$0xff] }
 0x10d   : > { %570 = vst.msk [vmem:[#allocation2 + $0x19] sm:$0x1] %vm562_vm0, %v2023_v0  ;;  %571 = vst.msk [vmem:[#allocation2 + $0x29] sm:$0x1] %vm562_vm0, %v2023_v0  ;;  %506 = vrot.lane.b32.xlu1 %v487_v3, %s2024_s19  ;;  %502 = vrot.lane.b32.xlu0 %v485_v4, %s2024_s19  ;;  %v550_v11 = vld [vmem:[%s414_s16 + $0x8] sm:$0xff]  ;;  %v549_v12 = vld [vmem:[%s414_s16] sm:$0xff] }
 0x10e   : > { %572 = vst.msk [vmem:[#allocation2 + $0x39] sm:$0x1] %vm562_vm0, %v2023_v0  ;;  %573 = vst.msk [vmem:[#allocation2 + $0x49] sm:$0x1] %vm562_vm0, %v2023_v0  ;;  %vm576_vm1 = vcmask 31744   ;;  %s2534_s23 = scalar_lea.vmem [#allocation13], %s1356_s5 }
 0x10f   : > { %574 = vst.msk [vmem:[#allocation2 + $0x59] sm:$0x1] %vm562_vm0, %v2023_v0  ;;  %s464_s28 = scalar_lea.vmem [#allocation14], %s2478_s10  ;;  %s470_s25 = scalar_lea.vmem [#allocation16], %s2478_s10 }
 0x110   : > { %s2847_s4 = sld [smem:[#allocation27_spill]] }
 0x111   : > { %510 = vrot.lane.b32.xlu1 %v489_v5, %s2024_s19  ;;  %508 = vrot.lane.b32.xlu0 %v488_v6, %s2024_s19 }
 0x115   : > { %514 = vrot.lane.b32.xlu1 %v491_v7, %s2024_s19  ;;  %512 = vrot.lane.b32.xlu0 %v490_v8, %s2024_s19 }
 0x116   : > { %p1357_p10 = scmp.ne.s32.totalorder %s2847_s4, 0 }
 0x117   : > { %v2025_v43 = vmov (!%p1357_p10), 0.0  }
 0x118   : > { %585 = vst.msk [vmem:[#allocation2 + $0x1] sm:$0xff] (!%p1357_p10), %vm576_vm1, %v2025_v43 }
 0x119   : > { %542 = vrot.lane.b32.xlu1 %v537_v9, %s2024_s19  ;;  %540 = vrot.lane.b32.xlu0 %v536_v10, %s2024_s19 }
 0x11d   : > { %555 = vrot.lane.b32.xlu1 %v550_v11, %s2024_s19  ;;  %553 = vrot.lane.b32.xlu0 %v549_v12, %s2024_s19 }
 0x17b   : > { %v505_v13 = vpop.permute.xlu1 %504  ;;  %v501_v14 = vpop.permute.xlu0 %500 }
 0x17c   : > { %v526_v17 = vmax.f32 %v486_v1, %v505_v13  ;;  %v524_v18 = vmax.f32 %v484_v2, %v501_v14 }
 0x17f   : > { %v507_v15 = vpop.permute.xlu1 %506  ;;  %v503_v16 = vpop.permute.xlu0 %502 }
 0x180   : > { %v527_v19 = vmax.f32 %v487_v3, %v507_v15  ;;  %v525_v20 = vmax.f32 %v485_v4, %v503_v16 }
 0x182   : > { %v533_v21 = vmax.f32 %v526_v17, %v527_v19  ;;  %v532_v22 = vmax.f32 %v524_v18, %v525_v20 }
 0x183   : > { %v511_v23 = vpop.permute.xlu1 %510  ;;  %v509_v24 = vpop.permute.xlu0 %508 }
 0x184   : > { %578 = vst.msk [vmem:[#allocation2 + $0x21] sm:$0xff] %vm576_vm1, %v533_v21  ;;  %577 = vst.msk [vmem:[#allocation2 + $0x11] sm:$0xff] %vm576_vm1, %v532_v22  ;;  %v529_v25 = vmax.f32 %v489_v5, %v511_v23  ;;  %v528_v26 = vmax.f32 %v488_v6, %v509_v24 }
 0x186   : > { %v534_v27 = vmax.f32 %v528_v26, %v529_v25 }
 0x187   : > { %v515_v28 = vpop.permute.xlu1 %514  ;;  %v513_v29 = vpop.permute.xlu0 %512 }
 0x188   : > { %579 = vst.msk [vmem:[#allocation2 + $0x31] sm:$0xff] %vm576_vm1, %v534_v27  ;;  %v531_v30 = vmax.f32 %v491_v7, %v515_v28  ;;  %v530_v31 = vmax.f32 %v490_v8, %v513_v29 }
 0x18a   : > { %v535_v32 = vmax.f32 %v530_v31, %v531_v30 }
 0x18b   : > { %v543_v33 = vpop.permute.xlu1 %542  ;;  %v541_v34 = vpop.permute.xlu0 %540 }
 0x18c   : > { %580 = vst.msk [vmem:[#allocation2 + $0x41] sm:$0xff] %vm576_vm1, %v535_v32  ;;  %v547_v35 = vmax.f32 %v537_v9, %v543_v33  ;;  %v546_v36 = vmax.f32 %v536_v10, %v541_v34  ;;  %584 = sbr.rel (%p1357_p10) target bundleno = 403 (0x193), region = 64 }
 0x18e   : > { %v548_v37 = vmax.f32 %v546_v36, %v547_v35 }
 0x18f   : > { %v556_v38 = vpop.permute.xlu1 %555  ;;  %v554_v39 = vpop.permute.xlu0 %553 }
 0x190   : > { %v560_v40 = vmax.f32 %v550_v11, %v556_v38  ;;  %v559_v41 = vmax.f32 %v549_v12, %v554_v39 }
 0x192   : > { %v561_v42 = vmax.f32 %v559_v41, %v560_v40 }
 0x193 PF: > { %s2848_s20 = sld [smem:[#allocation27_spill]] }
 0x199   : > { %p1358_p12 = scmp.eq.s32.totalorder %s2848_s20, 0 }
 0x19a   : > { %590 = vst.msk [vmem:[#allocation2 + $0x1] sm:$0xff] (!%p1358_p12), %vm576_vm1, %v548_v37 }
 0x19b   : > { %589 = sbr.rel (%p1358_p12) target bundleno = 418 (0x1a2), region = 68 }
 0x1a2 PF: > { %s2849_s1 = sld [smem:[#allocation27_spill]] }
 0x1a8   : > { %p1359_p8 = scmp.ne.s32.totalorder %s2849_s1, 1 }
 0x1a9   : > { %v2026_v44 = vmov (!%p1359_p8), 0.0  }
 0x1aa   : > { %594 = sbr.rel (%p1359_p8) target bundleno = 433 (0x1b1), region = 72  ;;  %596 = vst.msk [vmem:[#allocation2 + $0x51] sm:$0xff] (!%p1359_p8), %vm576_vm1, %v2026_v44 }
 0x1b1 PF: > { %s2850_s12 = sld [smem:[#allocation27_spill]] }
 0x1b7   : > { %p1360_p0 = scmp.eq.s32.totalorder %s2850_s12, 1 }
 0x1b8   : > { %602 = vst.msk [vmem:[#allocation2 + $0x51] sm:$0xff] (!%p1360_p0), %vm576_vm1, %v561_v42 }
 0x1b9   : > { %600 = sbr.rel (%p1360_p0) target bundleno = 448 (0x1c0), region = 76 }
 0x1c0 PF: > { %v618_v45 = vld [vmem:[#allocation2 + $0x21] sm:$0xff]  ;;  %v619_v47 = vld [vmem:[#allocation2 + $0x31] sm:$0xff]  ;;  %vm611_vm2 = vcmask 27648   ;;  %s2027_s13 = smov 4   ;;  %s2028_s11 = smov 8   ;;  %vm961_vm3 = vcmask 1041408  }
 0x1c1   : > { %v616_v46 = vld [vmem:[#allocation2 + $0x1] sm:$0xff]  ;;  %v2546_v48 = vpack.c.bf16 %v618_v45, %v618_v45  ;;  %v617_v50 = vld [vmem:[#allocation2 + $0x11] sm:$0xff]  ;;  %v1414_v52 = vpack.c.bf16 %v619_v47, %v619_v47  ;;  %s2029_s6 = smov 12   ;;  %s2030_s3 = smov 16   ;;  %vm648_vm4 = vcmask 60448   ;;  %vm685_vm5 = vcmask 93248  }
 0x1c2   : > { %v1411_v49 = vpack.c.bf16 %v616_v46, %v616_v46  ;;  %v691_v51 = vld [vmem:[#allocation2 + $0x20] sm:$0xff]  ;;  %v1412_v53 = vpack.c.bf16 %v617_v50, %v617_v50  ;;  %v690_v55 = vld [vmem:[#allocation2 + $0x10] sm:$0xff]  ;;  %s2031_s7 = smov 20   ;;  %s2032_s0 = smov 24   ;;  %v1644_v15 = vld [vmem:[#allocation10 + $0x8] sm:$0xff]   ;;  %vm722_vm6 = vcmask 126048  }
 0x1c3   : > { %640 = vrot.lane.b32.xlu1 %v2546_v48, %s2027_s13  ;;  %v1420_v54 = vpack.c.bf16 %v691_v51, %v691_v51  ;;  %v692_v56 = vld [vmem:[#allocation2 + $0x30] sm:$0xff]  ;;  %v653_v58 = vld [vmem:[#allocation2 + $0x2] sm:$0xff]  ;;  %v1419_v59 = vpack.c.bf16 %v690_v55, %v690_v55  ;;  %v1645_v16 = vld [vmem:[#allocation10 + $0x10] ss:$0 sps:$4 sm:$0x33]   ;;  %s2033_s21 = smov 28  }
 0x1c4   : > { %636 = vrot.lane.b32.xlu0 %v1411_v49, %s2027_s13  ;;  %v654_v57 = vld [vmem:[#allocation2 + $0x12] sm:$0xff]  ;;  %v1421_v60 = vpack.c.bf16 %v692_v56, %v692_v56  ;;  %v603_v61 = vld [vmem:[#allocation2] sm:$0xff]  ;;  %v1415_v0 = vpack.c.bf16 %v653_v58, %v653_v58  ;;  %v963_v18 = vsel %vm961_vm3, %v1645_v16, 0  ;;  %s2034_s26 = smov 32   ;;  %vm759_vm7 = vcmask 158848   ;;  %s2851_s16 = sld [smem:[#allocation27_spill]] }
 0x1c5   : > { %614 = vst.msk [vmem:[#allocation3 + $0x8] sm:$0xf] %vm611_vm2, %v1420_v54  ;;  %v607_v62 = vpack.c.bf16 %v603_v61, %v603_v61  ;;  %613 = vst.msk [vmem:[#allocation3 + $0x4] sm:$0xf] %vm611_vm2, %v1419_v59  ;;  %v1416_v63 = vpack.c.bf16 %v654_v57, %v654_v57  ;;  %v656_v1 = vld [vmem:[#allocation2 + $0x32] sm:$0xff]  ;;  %v655_v2 = vld [vmem:[#allocation2 + $0x22] sm:$0xff] }
 0x1c6   : > { %615 = vst.msk [vmem:[#allocation3 + $0xc] sm:$0xf] %vm611_vm2, %v1421_v60  ;;  %v1418_v3 = vpack.c.bf16 %v656_v1, %v656_v1  ;;  %v1417_v4 = vpack.c.bf16 %v655_v2, %v655_v2  ;;  %v693_v5 = vld [vmem:[#allocation2 + $0x40] sm:$0xff]  ;;  %v805_v11 = vld [vmem:[#allocation2 + $0x50] sm:$0xff]  ;;  %vm796_vm8 = vcmask 191648   ;;  %vm834_vm9 = vcmask 224448  }
 0x1c7   : > { %642 = vrot.lane.b32.xlu1 %v1414_v52, %s2027_s13  ;;  %612 = vst.msk [vmem:[#allocation3] sm:$0xf] %vm611_vm2, %v607_v62  ;;  %v1422_v6 = vpack.c.bf16 %v693_v5, %v693_v5  ;;  %v730_v7 = vld [vmem:[#allocation2 + $0x41] sm:$0xff]  ;;  %v1434_v12 = vpack.c.bf16 %v805_v11, %v805_v11  ;;  %v1643_v13 = vld [vmem:[#allocation10] sm:$0xff]   ;;  %vm871_vm10 = vcmask 257248   ;;  %s2852_s19 = sld [smem:[#allocation28_spill]] }
 0x1c8   : > { %638 = vrot.lane.b32.xlu0 %v1412_v53, %s2027_s13  ;;  %v1426_v8 = vpack.c.bf16 %v730_v7, %v730_v7  ;;  %v767_v9 = vld [vmem:[#allocation2 + $0x42] sm:$0xff]  ;;  %v842_v14 = vld [vmem:[#allocation2 + $0x51] sm:$0xff]  ;;  %1448 = vmatprep.subr.bf16.mxu0 %v1643_v13  ;;  %vm908_vm11 = vcmask 290048   ;;  %vm954_vm12 = vcmask 293888   ;;  %vm1014_vm13 = vcmask 64512   ;;  %s1078_s1 = sshll.u32 %s2534_s23, 4  ;;  %s2564_s1 = int_to_ptr.vmem [resolvable:$true] %s1078_s1 }
 0x1c9   : > { %v1430_v10 = vpack.c.bf16 %v767_v9, %v767_v9  ;;  %1449 = vmatpush3.bf16.msra.mxu0 %v1643_v13  ;;  %v1438_v17 = vpack.c.bf16 %v842_v14, %v842_v14  ;;  %v879_v19 = vld [vmem:[#allocation2 + $0x52] sm:$0xff]  ;;  %v1393_v55 = vld [vmem:[#allocation12] ss:$0 sm:$0xff]  ;;  %p2854_p1 = scmp.ne.s32.totalorder %s2815_s17, 0 }
 0x1ca   : > { %1450 = vmatprep.subr.bf16.mxu0 %v1644_v15  ;;  %v1442_v20 = vpack.c.bf16 %v879_v19, %v879_v19  ;;  %s1402_s5 = sshll.u32 %s2851_s16, 2 }
 0x1cb   : > { %675 = vrot.lane.b32.xlu1 %v1416_v63, %s2028_s11 }
 0x1cc   : > { %673 = vrot.lane.b32.xlu0 %v1415_v0, %s2028_s11 }
 0x1cd   : > { %1451 = vmatpush3.bf16.msra.mxu0 %v1644_v15  ;;  %s1403_s4 = sshll.u32 %s2852_s19, 3 }
 0x1ce   : > { %1458 = vmatprep.subr.msk.bf16.mxu0 %vm961_vm3, %v1645_v16  ;;  %s1075_s20 = sadd.s32 %s1403_s4, %s1402_s5 }
 0x1cf   : > { %679 = vrot.lane.b32.xlu1 %v1418_v3, %s2028_s11  ;;  %s1404_s12 = sshll.u32 %s1075_s20, 7 }
 0x1d0   : > { %677 = vrot.lane.b32.xlu0 %v1417_v4, %s2028_s11 }
 0x1d1   : > { %1453 = vmatpush3.bf16.msra.mxu0 %v963_v18 }
 0x1d3   : > { %712 = vrot.lane.b32.xlu1 %v1420_v54, %s2029_s6 }
 0x1d4   : > { %710 = vrot.lane.b32.xlu0 %v1419_v59, %s2029_s6 }
 0x1d7   : > { %716 = vrot.lane.b32.xlu1 %v1422_v6, %s2029_s6 }
 0x1d8   : > { %714 = vrot.lane.b32.xlu0 %v1421_v60, %s2029_s6 }
 0x1db   : > { %749 = vrot.lane.b32.xlu1 %v2546_v48, %s2030_s3 }
 0x1dc   : > { %747 = vrot.lane.b32.xlu0 %v1412_v53, %s2030_s3 }
 0x1df   : > { %753 = vrot.lane.b32.xlu1 %v1426_v8, %s2030_s3 }
 0x1e0   : > { %751 = vrot.lane.b32.xlu0 %v1414_v52, %s2030_s3  ;;  %s2853_s3 = sld [smem:[#allocation42_spill]] }
 0x1e3   : > { %786 = vrot.lane.b32.xlu1 %v1417_v4, %s2031_s7 }
 0x1e4   : > { %784 = vrot.lane.b32.xlu0 %v1416_v63, %s2031_s7 }
 0x1e7   : > { %790 = vrot.lane.b32.xlu1 %v1430_v10, %s2031_s7 }
 0x1e8   : > { %788 = vrot.lane.b32.xlu0 %v1418_v3, %s2031_s7  ;;  %s2571_s7 = scalar_lea.hbm %s2853_s3, %s1404_s12 }
 0x1eb   : > { %824 = vrot.lane.b32.xlu1 %v1421_v60, %s2032_s0 }
 0x1ec   : > { %822 = vrot.lane.b32.xlu0 %v1420_v54, %s2032_s0 }
 0x1ef   : > { %828 = vrot.lane.b32.xlu1 %v1434_v12, %s2032_s0 }
 0x1f0   : > { %826 = vrot.lane.b32.xlu0 %v1422_v6, %s2032_s0  ;;  %s1055_s0 = scalar_lea.sflag [#allocation6], %s2478_s10 }
 0x1f3   : > { %861 = vrot.lane.b32.xlu1 %v1414_v52, %s2033_s21 }
 0x1f4   : > { %859 = vrot.lane.b32.xlu0 %v2546_v48, %s2033_s21 }
 0x1f7   : > { %865 = vrot.lane.b32.xlu1 %v1438_v17, %s2033_s21 }
 0x1f8   : > { %863 = vrot.lane.b32.xlu0 %v1426_v8, %s2033_s21  ;;  %s1794_s21 = scalar_lea.vmem %s2564_s1, 512 }
 0x1f9   : > { %p1795_p13 = scmp.ne.s32.totalorder %s2564_s1, %s1794_s21 }
 0x1fb   : > { %898 = vrot.lane.b32.xlu1 %v1418_v3, %s2034_s26  ;;  %p1796_p2 = pnand %p1795_p13, %p2854_p1 }
 0x1fc   : > { %896 = vrot.lane.b32.xlu0 %v1417_v4, %s2034_s26 }
 0x1fd   : > { %p1797_p5 = pneg %p1796_p2 }
 0x1ff   : > { %902 = vrot.lane.b32.xlu1 %v1442_v20, %s2034_s26 }
 0x200   : > { %900 = vrot.lane.b32.xlu0 %v1430_v10, %s2034_s26  ;;  %s2035_s26 = smov [#allocation13]  }
 0x201   : > { %s1798_s5 = sshll.u32 %s2035_s26, 4  ;;  %s1799_s5 = int_to_ptr.vmem [resolvable:$false] %s1798_s5 }
 0x202   : > { %s1800_s4 = scalar_lea.vmem %s1799_s5, 1024  ;;  %p1801_p6 = scmp.lt.s32.totalorder %s2564_s1, %s1799_s5 }
 0x203   : > { %p1802_p9 = scmp.lt.s32.totalorder %s1800_s4, %s1794_s21 }
 0x205   : > { %p1803_p11 = por %p1802_p9, %p1801_p6 }
 0x207   : > { %p1804_p3 = pnand %p1803_p11, %p1797_p5 }
 0x235   : > { %v641_v21 = vpop.permute.xlu1 %640 }
 0x236   : > { %v637_v22 = vpop.permute.xlu0 %636  ;;  %651 = vst.msk [vmem:[#allocation3 + $0x8] sm:$0xf] %vm648_vm4, %v641_v21 }
 0x237   : > { %649 = vst.msk [vmem:[#allocation3] sm:$0xf] %vm648_vm4, %v637_v22 }
 0x239   : > { %v643_v23 = vpop.permute.xlu1 %642 }
 0x23a   : > { %v639_v24 = vpop.permute.xlu0 %638  ;;  %652 = vst.msk [vmem:[#allocation3 + $0xc] sm:$0xf] %vm648_vm4, %v643_v23 }
 0x23b   : > { %650 = vst.msk [vmem:[#allocation3 + $0x4] sm:$0xf] %vm648_vm4, %v639_v24 }
 0x23d   : > { %v676_v25 = vpop.permute.xlu1 %675 }
 0x23e   : > { %v674_v26 = vpop.permute.xlu0 %673  ;;  %687 = vst.msk [vmem:[#allocation3 + $0x4] sm:$0xf] %vm685_vm5, %v676_v25 }
 0x23f   : > { %686 = vst.msk [vmem:[#allocation3] sm:$0xf] %vm685_vm5, %v674_v26 }
 0x241   : > { %v680_v27 = vpop.permute.xlu1 %679 }
 0x242   : > { %v678_v28 = vpop.permute.xlu0 %677  ;;  %689 = vst.msk [vmem:[#allocation3 + $0xc] sm:$0xf] %vm685_vm5, %v680_v27 }
 0x243   : > { %688 = vst.msk [vmem:[#allocation3 + $0x8] sm:$0xf] %vm685_vm5, %v678_v28 }
 0x245   : > { %v713_v29 = vpop.permute.xlu1 %712 }
 0x246   : > { %v711_v30 = vpop.permute.xlu0 %710  ;;  %724 = vst.msk [vmem:[#allocation3 + $0x4] sm:$0xf] %vm722_vm6, %v713_v29 }
 0x247   : > { %723 = vst.msk [vmem:[#allocation3] sm:$0xf] %vm722_vm6, %v711_v30 }
 0x249   : > { %v717_v31 = vpop.permute.xlu1 %716 }
 0x24a   : > { %v715_v32 = vpop.permute.xlu0 %714  ;;  %726 = vst.msk [vmem:[#allocation3 + $0xc] sm:$0xf] %vm722_vm6, %v717_v31 }
 0x24b   : > { %725 = vst.msk [vmem:[#allocation3 + $0x8] sm:$0xf] %vm722_vm6, %v715_v32 }
 0x24d   : > { %v750_v33 = vpop.permute.xlu1 %749 }
 0x24e   : > { %v748_v34 = vpop.permute.xlu0 %747  ;;  %761 = vst.msk [vmem:[#allocation3 + $0x4] sm:$0xf] %vm759_vm7, %v750_v33 }
 0x24f   : > { %760 = vst.msk [vmem:[#allocation3] sm:$0xf] %vm759_vm7, %v748_v34 }
 0x251   : > { %v754_v35 = vpop.permute.xlu1 %753 }
 0x252   : > { %v752_v36 = vpop.permute.xlu0 %751  ;;  %763 = vst.msk [vmem:[#allocation3 + $0xc] sm:$0xf] %vm759_vm7, %v754_v35 }
 0x253   : > { %762 = vst.msk [vmem:[#allocation3 + $0x8] sm:$0xf] %vm759_vm7, %v752_v36 }
 0x255   : > { %v787_v37 = vpop.permute.xlu1 %786 }
 0x256   : > { %v785_v38 = vpop.permute.xlu0 %784  ;;  %798 = vst.msk [vmem:[#allocation3 + $0x4] sm:$0xf] %vm796_vm8, %v787_v37 }
 0x257   : > { %797 = vst.msk [vmem:[#allocation3] sm:$0xf] %vm796_vm8, %v785_v38 }
 0x259   : > { %v791_v39 = vpop.permute.xlu1 %790 }
 0x25a   : > { %v789_v40 = vpop.permute.xlu0 %788  ;;  %800 = vst.msk [vmem:[#allocation3 + $0xc] sm:$0xf] %vm796_vm8, %v791_v39 }
 0x25b   : > { %799 = vst.msk [vmem:[#allocation3 + $0x8] sm:$0xf] %vm796_vm8, %v789_v40 }
 0x25d   : > { %v825_v41 = vpop.permute.xlu1 %824 }
 0x25e   : > { %v823_v42 = vpop.permute.xlu0 %822  ;;  %836 = vst.msk [vmem:[#allocation3 + $0x4] sm:$0xf] %vm834_vm9, %v825_v41 }
 0x25f   : > { %835 = vst.msk [vmem:[#allocation3] sm:$0xf] %vm834_vm9, %v823_v42 }
 0x261   : > { %v829_v43 = vpop.permute.xlu1 %828 }
 0x262   : > { %v827_v44 = vpop.permute.xlu0 %826  ;;  %838 = vst.msk [vmem:[#allocation3 + $0xc] sm:$0xf] %vm834_vm9, %v829_v43 }
 0x263   : > { %837 = vst.msk [vmem:[#allocation3 + $0x8] sm:$0xf] %vm834_vm9, %v827_v44 }
 0x265   : > { %v862_v45 = vpop.permute.xlu1 %861 }
 0x266   : > { %v860_v46 = vpop.permute.xlu0 %859  ;;  %873 = vst.msk [vmem:[#allocation3 + $0x4] sm:$0xf] %vm871_vm10, %v862_v45 }
 0x267   : > { %872 = vst.msk [vmem:[#allocation3] sm:$0xf] %vm871_vm10, %v860_v46 }
 0x269   : > { %v866_v47 = vpop.permute.xlu1 %865 }
 0x26a   : > { %v864_v48 = vpop.permute.xlu0 %863  ;;  %875 = vst.msk [vmem:[#allocation3 + $0xc] sm:$0xf] %vm871_vm10, %v866_v47 }
 0x26b   : > { %874 = vst.msk [vmem:[#allocation3 + $0x8] sm:$0xf] %vm871_vm10, %v864_v48 }
 0x26d   : > { %v899_v49 = vpop.permute.xlu1 %898 }
 0x26e   : > { %v897_v50 = vpop.permute.xlu0 %896  ;;  %910 = vst.msk [vmem:[#allocation3 + $0x4] sm:$0xf] %vm908_vm11, %v899_v49 }
 0x26f   : > { %909 = vst.msk [vmem:[#allocation3] sm:$0xf] %vm908_vm11, %v897_v50 }
 0x271   : > { %v903_v51 = vpop.permute.xlu1 %902 }
 0x272   : > { %v901_v52 = vpop.permute.xlu0 %900  ;;  %912 = vst.msk [vmem:[#allocation3 + $0xc] sm:$0xf] %vm908_vm11, %v903_v51 }
 0x273   : > { %911 = vst.msk [vmem:[#allocation3 + $0x8] sm:$0xf] %vm908_vm11, %v901_v52 }
 0x276   : > { %v1646_v53 = vld [vmem:[#allocation3] sm:$0xff]  }
 0x277   : > { %1454 = vmatprep.mubr.msk.bf16.mxu0 %vm954_vm12, %v1646_v53 }
 0x27a   : > { %v1647_v54 = vld [vmem:[#allocation3 + $0x8] sm:$0xff]  }
 0x27b   : > { %1455 = vmatmul.mubr.msk.bf16.vlgmr.msra.gmra.mrb[0].mxu0 %vm954_vm12, %v1647_v54 }
 0x34e   : > { %v1456_v56 = vpop.f32.mrb[0].mxu0 }
 0x34f   : > { %v1008_v57 = vadd.f32 %v1456_v56, %v1393_v55  ;;  %v999_v58 = vpop.f32.mrb[1].mxu0 }
 0x350   : > { %v1000_v59 = vadd.f32 %v1393_v55, %v999_v58  ;;  %v1457_v60 = vpop.f32.mrb[2].mxu0 }
 0x351   : > { %1017 = vst.msk [vmem:[%s2534_s23 + $0x10] sm:$0xff] %vm1014_vm13, %v1008_v57  ;;  %v1011_v61 = vadd.f32 %v1457_v60, %v1393_v55  ;;  %v1002_v62 = vpop.f32.mrb[3].mxu0  ;;  %v1028_v1 = vmul.f32 %v1008_v57, %v1008_v57 }
 0x352   : > { %1015 = vst.msk [vmem:[%s2534_s23] sm:$0xff] %vm1014_vm13, %v1000_v59  ;;  %v1026_v63 = vmul.f32 %v1000_v59, %v1000_v59  ;;  %v1003_v0 = vadd.f32 %v1393_v55, %v1002_v62  ;;  %v1019_v2 = vsel %vm1014_vm13, %v1000_v59, 0.0 }
 0x353   : > { %1018 = vst.msk [vmem:[%s2534_s23 + $0x18] sm:$0xff] %vm1014_vm13, %v1011_v61 }
 0x354   : > { %1016 = vst.msk [vmem:[%s2534_s23 + $0x8] sm:$0xff] %vm1014_vm13, %v1003_v0  ;;  %v1020_v3 = vsel %vm1014_vm13, %v1003_v0, 0.0  ;;  %v1027_v4 = vmul.f32 %v1003_v0, %v1003_v0 }
 0x355   : > { %v1021_v5 = vadd.f32 %v1020_v3, %v1019_v2 }
 0x356   : > { %1807 = shalt.err (!%p1804_p3)
}
 0x357   : > { %s1808_s23 = scalar_lea.hbm %s2571_s7, 512  ;;  %s1812_s13 = scalar_lea.hbm %s2853_s3, 2048 }
 0x358   : > { %p1809_p7 = scmp.ne.s32.totalorder %s2571_s7, %s1808_s23  ;;  %p1813_p12 = scmp.lt.u32.totalorder %s2571_s7, %s2853_s3 }
 0x359   : > { %p1814_p8 = scmp.lt.u32.totalorder %s1812_s13, %s1808_s23  ;;  %p1816_p13 = scmp.lt.u32.totalorder %s1808_s23, %s2571_s7 }
 0x35a   : > { %p1810_p4 = pnand %p1809_p7, %p2854_p1 }
 0x35b   : > { %p1815_p0 = por %p1814_p8, %p1813_p12 }
 0x35c   : > { %p1811_p10 = pneg %p1810_p4 }
 0x35d   : > { %p1817_p2 = por %p1816_p13, %p1815_p0 }
 0x35f   : > { %p1818_p5 = pnand %p1817_p2, %p1811_p10 }
 0x361   : > { %1821 = shalt.err (!%p1818_p5)
}
 0x362   : > { %s2036_s21 = smov 128   ;;  %v1022_v6 = vsel %vm1014_vm13, %v1008_v57, 0.0  ;;  %v1030_v7 = vsel %vm1014_vm13, %v1026_v63, 0.0  ;;  %v1029_v8 = vmul.f32 %v1011_v61, %v1011_v61  ;;  %v1031_v9 = vsel %vm1014_vm13, %v1027_v4, 0.0  ;;  %s1111_s5 = sshll.u32 %s470_s25, 4  ;;  %s2633_s5 = int_to_ptr.vmem [resolvable:$true] %s1111_s5 }
 0x363   : > { %1473 = dma.vmem_to_hbm [thread:$0]  (%p2854_p1), %s2564_s1, 512, %s2571_s7, %s1055_s0, %s2036_s21, %s2036_s21, %s2028_s11   ;;  %v1023_v10 = vadd.f32 %v1022_v6, %v1021_v5  ;;  %v1032_v11 = vadd.f32 %v1031_v9, %v1030_v7  ;;  %v1033_v12 = vsel %vm1014_vm13, %v1028_v1, 0.0  ;;  %v1024_v13 = vsel %vm1014_vm13, %v1011_v61, 0.0 }
 0x364   : > { %v1035_v16 = vsel %vm1014_vm13, %v1029_v8, 0.0  ;;  %s1405_s11 = sshll.u32 %s2852_s19, 1  ;;  %s1096_s0 = sshll.u32 %s464_s28, 4  ;;  %vm1044_vm14 = vcmask 57344   ;;  %s2623_s0 = int_to_ptr.vmem [resolvable:$true] %s1096_s0 }
 0x365   : > { %v1025_v14 = vadd.f32 %v1024_v13, %v1023_v10  ;;  %v1034_v15 = vadd.f32 %v1033_v12, %v1032_v11  ;;  %s1092_s1 = sadd.s32 %s2851_s16, %s1405_s11  ;;  %s2855_s23 = sld [smem:[#allocation43_spill]] }
 0x366   : > { %s1406_s7 = sshll.u32 %s1092_s1, 4  ;;  %s2856_s13 = sld [smem:[#allocation44_spill]] }
 0x367   : > { %v1036_v17 = vadd.f32 %v1035_v16, %v1034_v15  ;;  %v1037_v18 = vsel %vm1014_vm13, %v1025_v14, 0.0  ;;  %s2637_s21 = scalar_lea.sflag [#allocation15], %s401_s24  ;;  %s1822_s11 = scalar_lea.vmem %s2623_s0, 16 }
 0x368   : > { %v1038_v19 = vrot.slane %v1037_v18, 4  ;;  %p1823_p6 = scmp.ne.s32.totalorder %s2623_s0, %s1822_s11  ;;  %s2037_s1 = smov [#allocation14]  }
 0x369   : > { %v1046_v20 = vsel %vm1014_vm13, %v1036_v17, 0.0  ;;  %s1826_s19 = sshll.u32 %s2037_s1, 4  ;;  %s1827_s19 = int_to_ptr.vmem [resolvable:$false] %s1826_s19 }
 0x36a   : > { %v1039_v21 = vadd.f32 %v1038_v19, %v1037_v18  ;;  %v1047_v22 = vrot.slane %v1046_v20, 4  ;;  %p1824_p9 = pnand %p1823_p6, %p2854_p1  ;;  %p1829_p3 = scmp.lt.s32.totalorder %s2623_s0, %s1827_s19 }
 0x36b   : > { %s2621_s20 = scalar_lea.hbm %s2855_s23, %s1406_s7 }
 0x36c   : > { %v1040_v23 = vrot.slane %v1039_v21, 2  ;;  %v1048_v24 = vadd.f32 %v1047_v22, %v1046_v20  ;;  %s2857_s6 = smov %s2856_s13  ;;  %s2631_s26 = scalar_lea.hbm %s2856_s13, %s1406_s7 }
 0x36d   : > { %p1825_p11 = pneg %p1824_p9 }
 0x36e   : > { %v1041_v25 = vadd.f32 %v1040_v23, %v1039_v21  ;;  %v1049_v26 = vrot.slane %v1048_v24, 2 }
 0x370   : > { %v1042_v27 = vrot.slane %v1041_v25, 1  ;;  %v1050_v28 = vadd.f32 %v1049_v26, %v1048_v24 }
 0x372   : > { %v1043_v29 = vadd.f32 %v1042_v27, %v1041_v25  ;;  %v1051_v30 = vrot.slane %v1050_v28, 1 }
 0x374   : > { %1045 = vst.msk [vmem:[%s464_s28] sm:$0x1] %vm1044_vm14, %v1043_v29  ;;  %v1052_v31 = vadd.f32 %v1051_v30, %v1050_v28  ;;  %s1828_s28 = scalar_lea.vmem %s1827_s19, 32 }
 0x375   : > { %p1830_p7 = scmp.lt.s32.totalorder %s1828_s28, %s1822_s11 }
 0x377   : > { %p1831_p4 = por %p1830_p7, %p1829_p3 }
 0x379   : > { %p1832_p10 = pnand %p1831_p4, %p1825_p11 }
 0x37b   : > { %1835 = shalt.err (!%p1832_p10)
}
 0x37c   : > { %s1836_s15 = scalar_lea.hbm %s2621_s20, 16  ;;  %s1840_s4 = scalar_lea.hbm %s2855_s23, 64 }
 0x37d   : > { %p1837_p12 = scmp.ne.s32.totalorder %s2621_s20, %s1836_s15  ;;  %p1841_p13 = scmp.lt.u32.totalorder %s2621_s20, %s2855_s23 }
 0x37e   : > { %p1842_p2 = scmp.lt.u32.totalorder %s1840_s4, %s1836_s15  ;;  %p1844_p6 = scmp.lt.u32.totalorder %s1836_s15, %s2621_s20 }
 0x37f   : > { %p1838_p8 = pnand %p1837_p12, %p2854_p1 }
 0x380   : > { %p1843_p5 = por %p1842_p2, %p1841_p13 }
 0x381   : > { %p1839_p0 = pneg %p1838_p8 }
 0x382   : > { %p1845_p9 = por %p1844_p6, %p1843_p5 }
 0x384   : > { %p1846_p11 = pnand %p1845_p9, %p1839_p0 }
 0x386   : > { %1849 = shalt.err (!%p1846_p11)
}
 0x387   : > { %1474 = dma.vmem_to_hbm [thread:$0]  (%p2854_p1), %s2623_s0, 16, %s2621_s20, %s2637_s21   ;;  %1053 = vst.msk [vmem:[%s470_s25] sm:$0x1] %vm1044_vm14, %v1052_v31 }
 0x388   : > { %s1850_s13 = scalar_lea.vmem %s2633_s5, 16  ;;  %s2038_s11 = smov [#allocation16]  }
 0x389   : > { %p1851_p3 = scmp.ne.s32.totalorder %s2633_s5, %s1850_s13  ;;  %s1854_s1 = sshll.u32 %s2038_s11, 4  ;;  %s1855_s1 = int_to_ptr.vmem [resolvable:$false] %s1854_s1 }
 0x38a   : > { %s1856_s19 = scalar_lea.vmem %s1855_s1, 32  ;;  %p1857_p10 = scmp.lt.s32.totalorder %s2633_s5, %s1855_s1 }
 0x38b   : > { %p1852_p7 = pnand %p1851_p3, %p2854_p1  ;;  %p1858_p12 = scmp.lt.s32.totalorder %s1856_s19, %s1850_s13 }
 0x38d   : > { %p1853_p4 = pneg %p1852_p7  ;;  %p1859_p8 = por %p1858_p12, %p1857_p10 }
 0x38f   : > { %p1860_p0 = pnand %p1859_p8, %p1853_p4 }
 0x391   : > { %1863 = shalt.err (!%p1860_p0)
}
 0x392   : > { %s1864_s10 = scalar_lea.hbm %s2631_s26, 16  ;;  %s1868_s20 = scalar_lea.hbm %s2857_s6, 64 }
 0x393   : > { %p1865_p13 = scmp.ne.s32.totalorder %s2631_s26, %s1864_s10  ;;  %p1869_p6 = scmp.lt.u32.totalorder %s2631_s26, %s2857_s6 }
 0x394   : > { %p1870_p9 = scmp.lt.u32.totalorder %s1868_s20, %s1864_s10  ;;  %p1872_p3 = scmp.lt.u32.totalorder %s1864_s10, %s2631_s26 }
 0x395   : > { %p1866_p2 = pnand %p1865_p13, %p2854_p1 }
 0x396   : > { %p1871_p11 = por %p1870_p9, %p1869_p6 }
 0x397   : > { %p1867_p5 = pneg %p1866_p2 }
 0x398   : > { %p1873_p7 = por %p1872_p3, %p1871_p11 }
 0x39a   : > { %p1874_p4 = pnand %p1873_p7, %p1867_p5 }
 0x39c   : > { %1877 = shalt.err (!%p1874_p4)
}
 0x39d   : > { %1475 = dma.vmem_to_hbm [thread:$0]  (%p2854_p1), %s2633_s5, 16, %s2631_s26, %s2637_s21  }
 0x39e PF: > { %p1511_p10 = scmp.ge.s32.totalorder %s2012_s14, 2  ;;  %s1123_s24 = sand.u32 1, %s1984_s30  }
 0x39f   : > { %p2858_p12 = scmp.ne.s32.totalorder %s2818_s2, 0  ;;  %s1124_s7 = scalar_lea.sflag [#allocation6], %s1123_s24 }
 0x3a1   : > { %p1497_p8 = pnand %p1511_p10, %p2858_p12 }
 0x3a3   : > { %1951 = dma.done.wait (!%p1497_p8), %s1124_s7, 512  }
 0x3a4   : > { %1953 = vsyncadd (!%p1497_p8), %s1124_s7, 4294966784  ;;  %s2859_s4 = sadd.s32 4294967294, %s2012_s14  }
 0x3a5   : > { %s1132_s16 = sand.u32 1, %s2859_s4  }
 0x3a6   : > { %s1133_s12 = scalar_lea.sflag [#allocation15], %s1132_s16 }
 0x3a7   : > { %1955 = dma.done.wait (!%p1497_p8), %s1133_s12, 32  }
 0x3a8   : > { %1957 = vsyncadd (!%p1497_p8), %s1133_s12, 4294967264  ;;  %s31_s14 = sadd.s32 1, %s2012_s14   ;;  %s2861_s24 = sld [smem:[#allocation24_spill]] }
 0x3a9   : > { %p2693_p1 = scmp.ge.s32.totalorder %s31_s14, 6   ;;  %s2862_s25 = sld [smem:[#allocation25_spill]] }
 0x3aa   : > { %s2863_s30 = sld [smem:[#allocation26_spill]]  ;;  %s2864_s2 = smov %s2236_s27 }
 0x3ab   : > { %s2865_s5 = sld [smem:[#allocation36_spill]]  ;;  %s2866_s10 = sld [smem:[#allocation29_spill]] }
 0x3ac   : > { %s2867_s11 = sld [smem:[#allocation30_spill]]  ;;  %s2868_s12 = sld [smem:[#allocation32_spill]] }
 0x3ad   : > { %s2869_s13 = sld [smem:[#allocation33_spill]]  ;;  %s2870_s26 = smov %s2892_s18 }
 0x3ae   : > { %s2872_s28 = smov %s1980_s29  ;;  %s2873_s29 = smov %s2864_s2 }
 0x3af   :  { %30 = sbr.rel (!%p2693_p1) target bundleno = 24 (0x18), region = 169 }
 0x3b0   : > { %s2871_s27 = smov %s2863_s30  ;;  %s2874_s30 = smov %s1988_s8 }
 0x3b1   : > { %s2875_s8 = smov %s1992_s9  ;;  %s2876_s9 = smov %s2865_s5 }
 0x3b6   :  { %1145 = vsyncpa [#allocation5], 1 }
 0x3b7   :  { %1147 = vsyncpa [#allocation5 + $0x1], 1 }
 0x3b8   :  { %1148 = vsyncpa [#allocation8], 1 }
 0x3b9   :  { %1150 = vsyncpa [#allocation8 + $0x1], 1 }
 0x3ba   :  { %1151 = vsyncpa [#allocation11], 1 }
 0x3bb   :  { %1152 = vsyncpa [#allocation6], 1 }
 0x3bc   :  { %1154 = vsyncpa [#allocation6 + $0x1], 1 }
 0x3bd   :  { %1155 = vsyncpa [#allocation15], 1 }
 0x3be   :  { %1157 = vsyncpa [#allocation15 + $0x1], 1 }

// kernel: down.4
= control target key start
LH: loop header
LB: loop body
LE: loop exit
PB: predicated region body
PF: predicated region fallthrough
CT: control target
= control target key end

     0   :  { %s2969_s0 = inlined_call_operand.hbm [shape: f32[2,8,8,8], index: 0, kind: input, shape index: {}, may-alias: {0,1,2}]   ;;  %s2970_s1 = inlined_call_operand.hbm [shape: f32[2,8,8,8], index: 1, kind: input, shape index: {}, may-alias: {0,1,2}]   ;;  %s2971_s2 = inlined_call_operand.hbm [shape: f32[2,8,8,8], index: 2, kind: input, shape index: {}, may-alias: {0,1,2}]   ;;  %s2972_s3 = inlined_call_operand.hbm [shape: f32[1,8], index: 3, kind: input, shape index: {}]   ;;  %s2973_s4 = inlined_call_operand.hbm [shape: f32[1,8], index: 4, kind: input, shape index: {}]   ;;  %s2974_s5 = inlined_call_operand.hbm [shape: bf16[72,8], index: 5, kind: input, shape index: {}]   ;;  %s2975_s6 = inlined_call_operand.hbm [shape: f32[1,8], index: 6, kind: input, shape index: {}]   ;;  %s2976_s7 = inlined_call_operand.hbm [shape: f32[2,8,8,8], index: 7, kind: output, shape index: {0}]   ;;  %s2977_s8 = inlined_call_operand.hbm [shape: f32[2,2,1,8], index: 8, kind: output, shape index: {1}]   ;;  %s2978_s9 = inlined_call_operand.hbm [shape: f32[2,2,1,8], index: 9, kind: output, shape index: {2}]  }
   0x1   :  { %3007 = sst [smem:[#allocation43_spill]] %s2969_s0 }
   0x2   :  { %3008 = sst [smem:[#allocation44_spill]] %s2970_s1 }
   0x3   :  { %3009 = sst [smem:[#allocation45_spill]] %s2971_s2 }
   0x4   :  { %3010 = sst [smem:[#allocation46_spill]] %s2972_s3 }
   0x5   :  { %3011 = sst [smem:[#allocation47_spill]] %s2973_s4 }
   0x6   :  { %3012 = sst [smem:[#allocation48_spill]] %s2974_s5 }
   0x7   :  { %3013 = sst [smem:[#allocation49_spill]] %s2975_s6 }
   0x8   :  { %3014 = sst [smem:[#allocation50_spill]] %s2976_s7 }
   0x9   :  { %3015 = sst [smem:[#allocation51_spill]] %s2977_s8 }
   0xa   :  { %3016 = sst [smem:[#allocation52_spill]] %s2978_s9 }
   0xb   :  { %15 = vsyncpa [#allocation5], 0 }
   0xc   :  { %17 = vsyncpa [#allocation5 + $0x1], 0 }
   0xd   :  { %18 = vsyncpa [#allocation8], 0 }
   0xe   :  { %20 = vsyncpa [#allocation8 + $0x1], 0 }
   0xf   :  { %21 = vsyncpa [#allocation11], 0 }
  0x10   :  { %22 = vsyncpa [#allocation14], 0 }
  0x11   :  { %23 = vsyncpa [#allocation6], 0 }
  0x12   :  { %25 = vsyncpa [#allocation6 + $0x1], 0 }
  0x13   :  { %26 = vsyncpa [#allocation18], 0 }
  0x14   :  { %28 = vsyncpa [#allocation18 + $0x1], 0  ;;  %s2277_s30 = smov 0   ;;  %s2279_s10 = smov 0  }
  0x15   :  { %s2281_s11 = smov 0   ;;  %s2283_s12 = smov 0  }
  0x16   :  { %s2285_s13 = smov 0   ;;  %s2287_s14 = smov 0  }
  0x17   :  { %s2289_s15 = smov 0   ;;  %s2291_s16 = smov 0  }
  0x18   :  { %s2293_s17 = smov 0   ;;  %s2295_s18 = smov 0  }
  0x19   :  { %s2297_s19 = smov 0   ;;  %s2299_s20 = smov 0  }
  0x1a   :  { %s2301_s21 = smov 0   ;;  %s2303_s22 = smov 0  }
  0x1b LB: > { %3017 = sst [smem:[#allocation27_spill]] %s2147_s30  ;;  %s2348_s23 = sadd.s32 4294967295, %s2199_s22   ;;  %s2199_s22 = sphi %s2303_s22, %s34_s22   ;;  %s2195_s21 = sphi %s2301_s21, %s3110_s21   ;;  %s2191_s20 = sphi %s2299_s20, %s3100_s20   ;;  %s2187_s19 = sphi %s2297_s19, %s3099_s19   ;;  %s2183_s18 = sphi %s2295_s18, %s3109_s18   ;;  %s2179_s17 = sphi %s2293_s17, %s3097_s17   ;;  %s2175_s16 = sphi %s2291_s16, %s3108_s16   ;;  %s2171_s15 = sphi %s2289_s15, %s3107_s15   ;;  %s2167_s14 = sphi %s2287_s14, %s3106_s14   ;;  %s2163_s13 = sphi %s2285_s13, %s3105_s13   ;;  %s2159_s12 = sphi %s2283_s12, %s3094_s12   ;;  %s2155_s11 = sphi %s2281_s11, %s3104_s11   ;;  %s2151_s10 = sphi %s2279_s10, %s3093_s10   ;;  %s2147_s30 = sphi %s2277_s30, %s3103_s30  }
  0x1c   : > { %3018 = sst [smem:[#allocation28_spill]] %s2151_s10  ;;  %p1421_p0 = scmp.ge.s32.totalorder %s2199_s22, 1 }
  0x1d   : > { %3019 = sst [smem:[#allocation29_spill]] %s2155_s11  ;;  %p2985_p1 = scmp.eq.s32.totalorder %s2348_s23, 0 }
  0x1e   : > { %3020 = sst [smem:[#allocation30_spill]] %s2163_s13  ;;  %p319_p2 = scmp.lt.s32.totalorder %s2199_s22, 5 }
  0x1f   : > { %3021 = sst [smem:[#allocation31_spill]] %s2179_s17  ;;  %s2201_s25 = smov [#allocation10]  }
  0x20   : > { %3022 = sst [smem:[#allocation32_spill]] %s2183_s18  ;;  %p2353_p3 = pnand %p1421_p0, %p319_p2 }
  0x21   : > { %3023 = sst [smem:[#allocation33_spill]] %s2187_s19  ;;  %s332_s26 = sshll.u32 %s2201_s25, 4  ;;  %s333_s26 = int_to_ptr.vmem [resolvable:$true] %s332_s26 }
  0x22   : > { %3024 = sst [smem:[#allocation34_spill]] %s2191_s20  ;;  %p1593_p4 = pneg %p2353_p3 }
  0x23   : > { %3025 = sst [smem:[#allocation35_spill]] %s2195_s21  ;;  %s2202_s27 = smov [#allocation13]  }
  0x24   : > { %s3026_s24 = scalar_select %p2353_p3, 1, 0 }
  0x25   : > { %s353_s28 = sshll.u32 %s2202_s27, 4  ;;  %p2361_p5 = pnand %p1593_p4, %p2985_p1  ;;  %s2365_s28 = int_to_ptr.vmem [resolvable:$true] %s353_s28 }
  0x26   : > { %3027 = sst [smem:[#allocation36_spill]] %s3026_s24  ;;  %s3029_s3 = sld [smem:[#allocation46_spill]] }
  0x27   : > { %s3028_s29 = scalar_select %p2361_p5, 1, 0 }
  0x28   : > { %p2375_p7 = pneg %p2361_p5 }
  0x2c   : > { %s1775_s7 = scalar_lea.hbm %s3029_s3, 16 }
  0x2d   : > { %p1776_p6 = scmp.ne.s32.totalorder %s3029_s3, %s1775_s7  ;;  %p1782_p10 = scmp.lt.u32.totalorder %s1775_s7, %s3029_s3 }
  0x2f   : > { %p1778_p8 = pnand %p2375_p7, %p1776_p6 }
  0x31   : > { %p1779_p9 = pneg %p1778_p8 }
  0x33   : > { %p1784_p11 = pnand %p1782_p10, %p1779_p9 }
  0x35   : > { %1787 = shalt.err (!%p1784_p11)
}
  0x36   : > { %s1788_s8 = scalar_lea.vmem %s333_s26, 16  ;;  %s1795_s9 = scalar_lea.vmem %s333_s26, 32 }
  0x37   : > { %p1789_p12 = scmp.ne.s32.totalorder %s333_s26, %s1788_s8  ;;  %p1796_p2 = scmp.lt.s32.totalorder %s333_s26, %s333_s26 }
  0x38   : > { %p1797_p4 = scmp.lt.s32.totalorder %s1795_s9, %s1788_s8 }
  0x39   : > { %p1791_p13 = pnand %p1789_p12, %p2375_p7 }
  0x3a   : > { %p1798_p1 = por %p1797_p4, %p1796_p2 }
  0x3b   : > { %p1792_p0 = pneg %p1791_p13 }
  0x3d   : > { %p1799_p3 = pnand %p1798_p1, %p1792_p0 }
  0x3f   : > { %1802 = shalt.err (!%p1799_p3)
}
  0x40   : > { %1596 = dma.hbm_to_vmem [thread:$0]  (!%p2361_p5), %s3029_s3, 16, %s333_s26, [#allocation11]  }
  0x41   : > { %s3031_s5 = sld [smem:[#allocation48_spill]] }
  0x47   : > { %s1803_s27 = scalar_lea.hbm %s3031_s5, 576 }
  0x48   : > { %p1804_p6 = scmp.ne.s32.totalorder %s3031_s5, %s1803_s27  ;;  %p1810_p1 = scmp.lt.u32.totalorder %s1803_s27, %s3031_s5 }
  0x4a   : > { %p1806_p8 = pnand %p1804_p6, %p2375_p7 }
  0x4c   : > { %p1807_p9 = pneg %p1806_p8 }
  0x4e   : > { %p1812_p3 = pnand %p1810_p1, %p1807_p9 }
  0x50   : > { %1815 = shalt.err (!%p1812_p3)
}
  0x51   : > { %s1816_s26 = scalar_lea.vmem %s2365_s28, 576  ;;  %p1824_p13 = scmp.lt.s32.totalorder %s2365_s28, %s2365_s28 }
  0x52   : > { %p1817_p10 = scmp.ne.s32.totalorder %s2365_s28, %s1816_s26  ;;  %p1825_p0 = scmp.lt.s32.totalorder %s1816_s26, %s1816_s26 }
  0x54   : > { %p1819_p11 = pnand %p1817_p10, %p2375_p7  ;;  %p1826_p2 = por %p1825_p0, %p1824_p13 }
  0x56   : > { %p1820_p12 = pneg %p1819_p11 }
  0x58   : > { %p1827_p4 = pnand %p1826_p2, %p1820_p12 }
  0x5a   : > { %1830 = shalt.err (!%p1827_p4)
}
  0x5b   : > { %s2203_s2 = smov 64   ;;  %s2204_s30 = smov 4  }
  0x5c   : > { %1602 = dma.hbm_to_vmem [thread:$0]  (!%p2361_p5), %s3031_s5, 576, %s2365_s28, [#allocation14], %s2203_s2, %s2203_s2, %s2204_s30  }
  0x5d   : > { %s43_s7 = sadd.s32 1, %s2191_s20  ;;  %s46_s24 = sadd.s32 1, %s2195_s21 }
  0x5e   : > { %p44_p6 = scmp.ge.s32.totalorder %s43_s7, 2  ;;  %p2999_p8 = scmp.eq.s32.totalorder %s2199_s22, 0 }
  0x5f   : > { %s2418_s27 = sshll.u32 %s2191_s20, 2  ;;  %s91_s8 = sadd.s32 1, %s2167_s14 }
  0x60   : > { %s3112_s7 = smov (%p44_p6, %s43_s7), 0  ;;  %s3114_s24 = smov (!%p44_p6, %s46_s24), %s2195_s21 }
  0x61   : > { %3032 = sst [smem:[#allocation37_spill]] %s3112_s7  ;;  %s51_s9 = ssub.s32 %s2191_s20, %s3112_s7 }
  0x62   : > { %s1416_s26 = sadd.s32 4294967295, %s2418_s27  ;;  %p48_p9 = scmp.ge.s32.totalorder %s3114_s24, 2 }
  0x63   : > { %p80_p1 = scmp.gt.s32.totalorder %s1416_s26, 0  ;;  %s1417_s28 = sshll.u32 %s3112_s7, 2 }
  0x64   : > { %p98_p3 = scmp.ne.s32.totalorder %s2167_s14, %s2163_s13  ;;  %s3116_s24 = smov (%p48_p9, %s3114_s24), 0 }
  0x65   : > { %3033 = sst [smem:[#allocation38_spill]] %s3116_s24  ;;  %s3118_s26 = smov (!%p80_p1, %s1416_s26), 0 }
  0x66   : > { %s2434_s2 = ssub.s32 %s2195_s21, %s3116_s24  ;;  %s1418_s30 = sadd.s32 4294967295, %s1417_s28 }
  0x67   : > { %3034 = sst [smem:[#allocation39_spill]] %s2434_s2  ;;  %s2437_s18 = sor.u32 %s51_s9, %s2434_s2 }
  0x68   : > { %p84_p10 = scmp.gt.s32.totalorder %s1418_s30, 0  ;;  %p2442_p12 = por %p98_p3, %p2999_p8 }
  0x69   : > { %p104_p13 = scmp.ne.s32.totalorder %s2163_s13, %s2159_s12  ;;  %s2448_s3 = sadd.s32 4, %s1417_s28 }
  0x6a   : > { %s3120_s30 = smov (!%p84_p10, %s1418_s30), 0  ;;  %3036 = sst [smem:[#allocation40_spill]] %s2448_s3 }
  0x6b   : > { %s87_s5 = ssub.s32 %s3118_s26, %s3120_s30  ;;  %p3037_p2 = scmp.eq.s32.totalorder %s2348_s23, 0 }
  0x6c   : > { %s88_s9 = sor.u32 %s87_s5, %s2434_s2  ;;  %p2998_p9 = scmp.lt.s32.totalorder %s2199_s22, 4 }
  0x6d   : > { %p2454_p4 = por %p104_p13, %p3037_p2  ;;  %p89_p6 = scmp.eq.s32.totalorder %s88_s9, 0 }
  0x6e   : > { %s2460_s7 = sshll.u32 %s2195_s21, 3  ;;  %s401_s12 = sand.u32 1, %s2199_s22  }
  0x6f   : > { %s3038_s24 = scalar_select %p2454_p4, 1, 0 }
  0x70   : > { %s2464_s28 = scalar_select %p89_p6, %s2167_s14, %s91_s8  }
  0x71   : > { %s388_s20 = sadd.s32 %s2460_s7, %s2418_s27  ;;  %s403_s30 = sand.u32 1, %s2167_s14  }
  0x72   : > { %3039 = sst [smem:[#allocation41_spill]] %s2464_s28  ;;  %s414_s13 = sadd.s32 %s2460_s7, %s3118_s26 }
  0x73   : > { %s1431_s3 = sshll.u32 %s403_s30, 3  ;;  %s1435_s10 = sshll.u32 %s414_s13, 7 }
  0x74   : > { %s3040_s1 = sld [smem:[#allocation44_spill]]  ;;  %s405_s9 = scalar_lea.vmem [#allocation7], %s1431_s3 }
  0x75   : > { %s418_s21 = sshll.u32 %s405_s9, 4  ;;  %p2479_p1 = pnand %p2998_p9, %p2442_p12  ;;  %s2483_s21 = int_to_ptr.vmem [resolvable:$true] %s418_s21 }
  0x76   : > { %s2205_s13 = smov [#allocation12]  }
  0x77   : > { %s2485_s26 = sshll.u32 %s2205_s13, 4  ;;  %p1833_p10 = pneg %p2479_p1  ;;  %s344_s26 = int_to_ptr.vmem [resolvable:$true] %s2485_s26 }
  0x7a   : > { %s2473_s11 = scalar_lea.hbm %s3040_s1, %s1435_s10  ;;  %s2487_s10 = scalar_lea.sflag [#allocation8], %s401_s12 }
  0x7b   : > { %s1831_s2 = scalar_lea.hbm %s2473_s11, 128  ;;  %s1836_s30 = scalar_lea.hbm %s3040_s1, 2048 }
  0x7c   : > { %p1832_p3 = scmp.ne.s32.totalorder %s2473_s11, %s1831_s2  ;;  %p1837_p2 = scmp.lt.u32.totalorder %s2473_s11, %s3040_s1 }
  0x7d   : > { %p1838_p6 = scmp.lt.u32.totalorder %s1836_s30, %s1831_s2  ;;  %p1840_p9 = scmp.lt.u32.totalorder %s1831_s2, %s2473_s11 }
  0x7e   : > { %p1834_p13 = pnand %p1833_p10, %p1832_p3 }
  0x7f   : > { %p1839_p0 = por %p1838_p6, %p1837_p2 }
  0x80   : > { %p1835_p12 = pneg %p1834_p13 }
  0x81   : > { %p1841_p8 = por %p1840_p9, %p1839_p0 }
  0x83   : > { %p1842_p11 = pnand %p1841_p8, %p1835_p12 }
  0x85   : > { %1845 = shalt.err (!%p1842_p11)
}
  0x86   : > { %s1846_s12 = scalar_lea.vmem %s2483_s21, 128  ;;  %s2206_s13 = smov [#allocation7]  }
  0x87   : > { %p1847_p3 = scmp.ne.s32.totalorder %s2483_s21, %s1846_s12  ;;  %s1851_s3 = sshll.u32 %s2206_s13, 4  ;;  %s1852_s3 = int_to_ptr.vmem [resolvable:$false] %s1851_s3 }
  0x88   : > { %s1853_s19 = scalar_lea.vmem %s1852_s3, 256  ;;  %p1854_p5 = scmp.lt.s32.totalorder %s2483_s21, %s1852_s3 }
  0x89   : > { %p1849_p13 = pnand %p1847_p3, %p1833_p10  ;;  %p1855_p2 = scmp.lt.s32.totalorder %s1853_s19, %s1846_s12 }
  0x8b   : > { %p1850_p4 = pneg %p1849_p13  ;;  %p1856_p6 = por %p1855_p2, %p1854_p5 }
  0x8d   : > { %p1857_p0 = pnand %p1856_p6, %p1850_p4 }
  0x8f   : > { %1860 = shalt.err (!%p1857_p0)
}
  0x90   : > { %1612 = dma.hbm_to_vmem [thread:$0]  (!%p2479_p1), %s2473_s11, 128, %s2483_s21, %s2487_s10  }
  0x91   : > { %s3042_s4 = sld [smem:[#allocation47_spill]] }
  0x97   : > { %s1861_s5 = scalar_lea.hbm %s3042_s4, 16 }
  0x98   : > { %p1862_p8 = scmp.ne.s32.totalorder %s3042_s4, %s1861_s5  ;;  %p1868_p4 = scmp.lt.u32.totalorder %s1861_s5, %s3042_s4 }
  0x9a   : > { %p1864_p5 = pnand %p1862_p8, %p2375_p7 }
  0x9c   : > { %p1865_p11 = pneg %p1864_p5 }
  0x9e   : > { %p1870_p9 = pnand %p1868_p4, %p1865_p11 }
  0xa0   : > { %1873 = shalt.err (!%p1870_p9)
}
  0xa1   : > { %s1874_s3 = scalar_lea.vmem %s344_s26, 16  ;;  %s1881_s11 = scalar_lea.vmem %s344_s26, 32 }
  0xa2   : > { %p1875_p1 = scmp.ne.s32.totalorder %s344_s26, %s1874_s3  ;;  %p1882_p3 = scmp.lt.s32.totalorder %s344_s26, %s344_s26 }
  0xa3   : > { %p1883_p13 = scmp.lt.s32.totalorder %s1881_s11, %s1874_s3 }
  0xa4   : > { %p1877_p10 = pnand %p1875_p1, %p2375_p7 }
  0xa5   : > { %p1884_p2 = por %p1883_p13, %p1882_p3 }
  0xa6   : > { %p1878_p12 = pneg %p1877_p10 }
  0xa8   : > { %p1885_p6 = pnand %p1884_p2, %p1878_p12 }
  0xaa   : > { %1888 = shalt.err (!%p1885_p6)
}
  0xab   : > { %p3043_p0 = scmp.ne.s32.totalorder %s3028_s29, 0  ;;  %s2207_s2 = smov [#allocation15]  }
  0xac   : > { %s367_s30 = sshll.u32 %s2207_s2, 4  ;;  %s3044_s6 = sld [smem:[#allocation49_spill]]  ;;  %s368_s30 = int_to_ptr.vmem [resolvable:$true] %s367_s30 }
  0xad   : > { %1599 = dma.hbm_to_vmem [thread:$0]  (!%p3043_p0), %s3042_s4, 16, %s344_s26, [#allocation11]  }
  0xb2   : > { %s1889_s13 = scalar_lea.hbm %s3044_s6, 16 }
  0xb3   : > { %p1890_p8 = scmp.ne.s32.totalorder %s3044_s6, %s1889_s13  ;;  %p1896_p4 = scmp.lt.u32.totalorder %s1889_s13, %s3044_s6 }
  0xb5   : > { %p1892_p5 = pnand %p1890_p8, %p2375_p7 }
  0xb7   : > { %p1893_p11 = pneg %p1892_p5 }
  0xb9   : > { %p1898_p9 = pnand %p1896_p4, %p1893_p11 }
  0xbb   : > { %1901 = shalt.err (!%p1898_p9)
}
  0xbc   : > { %s1902_s26 = scalar_lea.vmem %s368_s30, 16  ;;  %s1909_s21 = scalar_lea.vmem %s368_s30, 32 }
  0xbd   : > { %p1903_p1 = scmp.ne.s32.totalorder %s368_s30, %s1902_s26  ;;  %p1910_p3 = scmp.lt.s32.totalorder %s368_s30, %s368_s30 }
  0xbe   : > { %p1911_p13 = scmp.lt.s32.totalorder %s1909_s21, %s1902_s26 }
  0xbf   : > { %p1905_p10 = pnand %p1903_p1, %p2375_p7 }
  0xc0   : > { %p1912_p2 = por %p1911_p13, %p1910_p3 }
  0xc1   : > { %p1906_p12 = pneg %p1905_p10 }
  0xc3   : > { %p1913_p6 = pnand %p1912_p2, %p1906_p12 }
  0xc5   : > { %1916 = shalt.err (!%p1913_p6)
}
  0xc6   : > { %1605 = dma.hbm_to_vmem [thread:$0]  (!%p3043_p0), %s3044_s6, 16, %s368_s30, [#allocation14]  }
  0xc7   : > { %s3004_s29 = sadd.s32 4294967294, %s2199_s22   ;;  %s55_s25 = sadd.s32 1, %s2179_s17 }
  0xc8   : > { %p3045_p7 = scmp.eq.s32.totalorder %s2437_s18, 0  ;;  %p62_p8 = scmp.ne.s32.totalorder %s2179_s17, %s2175_s16 }
  0xc9   : > { %p68_p5 = scmp.ne.s32.totalorder %s2175_s16, %s2171_s15  ;;  %p250_p11 = scmp.eq.s32.totalorder %s2348_s23, 3 }
  0xca   : > { %s2557_s5 = scalar_select %p3045_p7, %s2179_s17, %s55_s25  }
  0xcb   : > { %p256_p4 = scmp.eq.s32.totalorder %s3004_s29, 3  ;;  %p3047_p9 = scmp.eq.s32.totalorder %s2199_s22, 0 }
  0xcc   : > { %3046 = sst [smem:[#allocation42_spill]] %s2557_s5  ;;  %p3048_p10 = scmp.eq.s32.totalorder %s2348_s23, 0 }
  0xcd   : > { %p64_p1 = por %p3047_p9, %p62_p8  ;;  %p2574_p3 = por %p250_p11, %p62_p8 }
  0xce   : > { %p2570_p12 = por %p3048_p10, %p68_p5  ;;  %p2578_p0 = por %p256_p4, %p68_p5 }
  0xcf   : > { %s3050_s30 = scalar_select %p2574_p3, 1, 0 }
  0xd0   : > { %s3051_s18 = scalar_select %p2578_p0, 1, 0 }
  0xd1   : > { %s378_s13 = sand.u32 1, %s2179_s17   ;;  %s1430_s12 = sshll.u32 %s388_s20, 7 }
  0xd2   : > { %s1427_s8 = sshll.u32 %s378_s13, 5  ;;  %s3052_s0 = sld [smem:[#allocation43_spill]] }
  0xd3   : > { %s382_s21 = scalar_lea.vmem [#allocation4], %s1427_s8  ;;  %p3053_p13 = scmp.lt.s32.totalorder %s2199_s22, 4 }
  0xd4   : > { %s391_s19 = sshll.u32 %s382_s21, 4  ;;  %s2599_s20 = scalar_lea.sflag [#allocation5], %s378_s13  ;;  %s2597_s19 = int_to_ptr.vmem [resolvable:$true] %s391_s19 }
  0xd5   : > { %p2593_p2 = pnand %p3053_p13, %p64_p1 }
  0xd7   : > { %p1919_p7 = pneg %p2593_p2 }
  0xd8   : > { %s2589_s26 = scalar_lea.hbm %s3052_s0, %s1430_s12  ;;  %s1922_s3 = scalar_lea.hbm %s3052_s0, 2048 }
  0xd9   : > { %s1917_s25 = scalar_lea.hbm %s2589_s26, 512  ;;  %p1923_p11 = scmp.lt.u32.totalorder %s2589_s26, %s3052_s0 }
  0xda   : > { %p1918_p6 = scmp.ne.s32.totalorder %s2589_s26, %s1917_s25  ;;  %p1924_p4 = scmp.lt.u32.totalorder %s1922_s3, %s1917_s25 }
  0xdb   : > { %p1926_p1 = scmp.lt.u32.totalorder %s1917_s25, %s2589_s26 }
  0xdc   : > { %p1920_p8 = pnand %p1919_p7, %p1918_p6  ;;  %p1925_p9 = por %p1924_p4, %p1923_p11 }
  0xde   : > { %p1921_p5 = pneg %p1920_p8  ;;  %p1927_p10 = por %p1926_p1, %p1925_p9 }
  0xe0   : > { %p1928_p13 = pnand %p1927_p10, %p1921_p5 }
  0xe2   : > { %1931 = shalt.err (!%p1928_p13)
}
  0xe3   : > { %s1932_s13 = scalar_lea.vmem %s2597_s19, 512  ;;  %s2208_s12 = smov [#allocation4]  }
  0xe4   : > { %p1933_p6 = scmp.ne.s32.totalorder %s2597_s19, %s1932_s13  ;;  %s1937_s8 = sshll.u32 %s2208_s12, 4  ;;  %s1938_s8 = int_to_ptr.vmem [resolvable:$false] %s1937_s8 }
  0xe5   : > { %s1939_s11 = scalar_lea.vmem %s1938_s8, 1024  ;;  %p1940_p3 = scmp.lt.s32.totalorder %s2597_s19, %s1938_s8 }
  0xe6   : > { %p1935_p8 = pnand %p1933_p6, %p1919_p7  ;;  %p1941_p11 = scmp.lt.s32.totalorder %s1939_s11, %s1932_s13 }
  0xe8   : > { %p1936_p0 = pneg %p1935_p8  ;;  %p1942_p4 = por %p1941_p11, %p1940_p3 }
  0xea   : > { %p1943_p9 = pnand %p1942_p4, %p1936_p0 }
  0xec   : > { %1946 = shalt.err (!%p1943_p9)
}
  0xed   : > { %s2209_s25 = smov 128   ;;  %s3055_s3 = sld [smem:[#allocation29_spill]] }
  0xee   : > { %s3056_s21 = sld [smem:[#allocation28_spill]]  ;;  %s3057_s29 = sld [smem:[#allocation40_spill]] }
  0xef   : > { %s3058_s12 = sld [smem:[#allocation27_spill]]  ;;  %s3059_s8 = sld [smem:[#allocation39_spill]] }
  0xf0   : > { %s2210_s13 = smov 8   ;;  %s115_s11 = sadd.s32 4, %s2418_s27 }
  0xf1   : > { %1609 = dma.hbm_to_vmem [thread:$0]  (!%p2593_p2), %s2589_s26, 512, %s2597_s19, %s2599_s20, %s2209_s25, %s2209_s25, %s2210_s13  }
  0xf2   : > { %p116_p3 = scmp.lt.s32.totalorder %s115_s11, 7  ;;  %p3061_p5 = scmp.eq.s32.totalorder %s2199_s22, 0 }
  0xf3   : > { %s127_s0 = sadd.s32 1, %s3055_s3  ;;  %s427_s2 = sand.u32 1, %s3055_s3  }
  0xf4   : > { %p134_p0 = scmp.ne.s32.totalorder %s3055_s3, %s3056_s21  ;;  %p3060_p7 = scmp.lt.s32.totalorder %s3057_s29, 7 }
  0xf5   : > { %s3124_s11 = smov (!%p116_p3, %s115_s11), 7  ;;  %p140_p10 = scmp.ne.s32.totalorder %s3056_s21, %s3058_s12 }
  0xf6   : > { %s3122_s29 = smov (!%p3060_p7, %s3057_s29), 7  ;;  %p2636_p1 = por %p134_p0, %p3061_p5 }
  0xf7   : > { %s123_s4 = ssub.s32 %s3124_s11, %s3122_s29  ;;  %p3063_p2 = scmp.eq.s32.totalorder %s2348_s23, 0 }
  0xf8   : > { %s124_s6 = sor.u32 %s123_s4, %s3059_s8  ;;  %s1436_s26 = sshll.u32 %s427_s2, 3 }
  0xf9   : > { %p2646_p13 = por %p140_p10, %p3063_p2  ;;  %p125_p6 = scmp.eq.s32.totalorder %s124_s6, 0 }
  0xfa   : > { %s438_s19 = sadd.s32 %s2460_s7, %s3124_s11  ;;  %s429_s25 = scalar_lea.vmem [#allocation9], %s1436_s26 }
  0xfb   : > { %s3064_s27 = scalar_select %p2646_p13, 1, 0 }
  0xfc   : > { %s3126_s3 = smov (!%p125_p6, %s3055_s3), %s127_s0  ;;  %s1439_s20 = sshll.u32 %s438_s19, 7 }
  0xfd   : > { %s442_s13 = sshll.u32 %s429_s25, 4  ;;  %s3065_s28 = sld [smem:[#allocation45_spill]]  ;;  %s2659_s13 = int_to_ptr.vmem [resolvable:$true] %s442_s13 }
  0xfe   : > { %p3066_p8 = scmp.lt.s32.totalorder %s2199_s22, 4 }
 0x100   : > { %p2665_p11 = pnand %p3066_p8, %p2636_p1 }
 0x102   : > { %p1949_p9 = pneg %p2665_p11 }
 0x103   : > { %s2657_s21 = scalar_lea.hbm %s3065_s28, %s1439_s20  ;;  %s1952_s7 = scalar_lea.hbm %s3065_s28, 2048 }
 0x104   : > { %s1947_s0 = scalar_lea.hbm %s2657_s21, 128  ;;  %p1953_p7 = scmp.lt.u32.totalorder %s2657_s21, %s3065_s28 }
 0x105   : > { %p1948_p4 = scmp.ne.s32.totalorder %s2657_s21, %s1947_s0  ;;  %p1954_p5 = scmp.lt.u32.totalorder %s1952_s7, %s1947_s0 }
 0x106   : > { %p1956_p10 = scmp.lt.u32.totalorder %s1947_s0, %s2657_s21 }
 0x107   : > { %p1950_p3 = pnand %p1949_p9, %p1948_p4  ;;  %p1955_p1 = por %p1954_p5, %p1953_p7 }
 0x109   : > { %p1951_p0 = pneg %p1950_p3  ;;  %p1957_p2 = por %p1956_p10, %p1955_p1 }
 0x10b   : > { %p1958_p6 = pnand %p1957_p2, %p1951_p0 }
 0x10d   : > { %1961 = shalt.err (!%p1958_p6)
}
 0x10e   : > { %s1962_s5 = scalar_lea.vmem %s2659_s13, 128  ;;  %s2211_s12 = smov [#allocation9]  }
 0x10f   : > { %p1963_p8 = scmp.ne.s32.totalorder %s2659_s13, %s1962_s5  ;;  %s1967_s8 = sshll.u32 %s2211_s12, 4  ;;  %s1968_s8 = int_to_ptr.vmem [resolvable:$false] %s1967_s8 }
 0x110   : > { %s1969_s11 = scalar_lea.vmem %s1968_s8, 256  ;;  %p1970_p13 = scmp.lt.s32.totalorder %s2659_s13, %s1968_s8 }
 0x111   : > { %p1965_p4 = pnand %p1963_p8, %p1949_p9  ;;  %p1971_p7 = scmp.lt.s32.totalorder %s1969_s11, %s1962_s5 }
 0x113   : > { %p1966_p3 = pneg %p1965_p4  ;;  %p1972_p5 = por %p1971_p7, %p1970_p13 }
 0x115   : > { %p1973_p1 = pnand %p1972_p5, %p1966_p3 }
 0x117   : > { %1976 = shalt.err (!%p1973_p1)
}
 0x118   : > { %1615 = dma.hbm_to_vmem [thread:$0]  (!%p2665_p11), %s2657_s21, 128, %s2659_s13, %s2487_s10  }
 0x119   : > { %s3068_s2 = sld [smem:[#allocation36_spill]] }
 0x11f   : > { %p3069_p0 = scmp.ne.s32.totalorder %s3068_s2, 0 }
 0x120   : > { %s2698_s26 = sand.u32 (!%p3069_p0), 1, %s2175_s16  }
 0x121   : > { %451 = sbr.rel (%p3069_p0) target bundleno = 869 (0x365), region = 48  ;;  %s1441_s19 = sshll.u32 (!%p3069_p0), %s2698_s26, 5 }
 0x122   : > { %s454_s20 = scalar_lea.sflag (!%p3069_p0), [#allocation5], %s2698_s26  ;;  %s2704_s25 = scalar_lea.vmem (!%p3069_p0), [#allocation4], %s1441_s19 }
 0x128   : > { %2118 = dma.done.wait (%p2570_p12), %s454_s20, 512  }
 0x129   : > { %2120 = vsyncadd (%p2570_p12), %s454_s20, 4294966784  ;;  %s3070_s10 = sld [smem:[#allocation30_spill]]  ;;  %s462_s13 = sand.u32 1, %s2348_s23  }
 0x12a   : > { %s463_s0 = scalar_lea.sflag [#allocation8], %s462_s13  ;;  %p3071_p13 = scmp.ne.s32.totalorder %s3038_s24, 0 }
 0x12f   : > { %s464_s21 = sand.u32 1, %s3070_s10  }
 0x130   : > { %s1442_s4 = sshll.u32 %s464_s21, 3 }
 0x131   : > { %s466_s6 = scalar_lea.vmem [#allocation7], %s1442_s4 }
 0x132   : > { %2122 = dma.done.wait (%p3071_p13), %s463_s0, 128  }
 0x133   : > { %2124 = vsyncadd (%p3071_p13), %s463_s0, 4294967168  ;;  %s3072_s17 = sld [smem:[#allocation28_spill]]  ;;  %p3073_p12 = scmp.ne.s32.totalorder %s3064_s27, 0 }
 0x139   : > { %s473_s7 = sand.u32 1, %s3072_s17  }
 0x13a   : > { %s2719_s9 = sshll.u32 %s473_s7, 3 }
 0x13b   : > { %s475_s1 = scalar_lea.vmem [#allocation9], %s2719_s9 }
 0x13c   : > { %2126 = dma.done.wait (%p3073_p12), %s463_s0, 128  }
 0x13d   : > { %2128 = vsyncadd (%p3073_p12), %s463_s0, 4294967168  ;;  %p3074_p11 = scmp.eq.s32.totalorder %s2348_s23, 0 }
 0x13f   : > { %2130 = dma.done.wait (%p3074_p11), [#allocation11], 32   ;;  %p3075_p9 = pmov %p3074_p11 }
 0x141   : > { %2132 = vsyncadd (%p3075_p9), [#allocation11], 4294967264  ;;  %p3076_p10 = pmov %p3075_p9 }
 0x142   : > { %p3077_p2 = pmov %p3075_p9 }
 0x143   : > { %2134 = dma.done.wait (%p3076_p10), [#allocation14], 592  }
 0x144   : > { %2136 = vsyncadd (%p3077_p2), [#allocation14], 4294966704  ;;  %vm555_vm0 = vcmask 57344   ;;  %v2212_v0 = vmov 0.0   ;;  %v604_v1 = vld [vmem:[%s466_s6] sm:$0xff]  ;;  %v570_v7 = vld [vmem:[%s2704_s25 + $0x10] sm:$0xff] }
 0x145   : > { %556 = vst.msk [vmem:[#allocation2] sm:$0x1] %vm555_vm0, %v2212_v0  ;;  %557 = vst.msk [vmem:[#allocation2 + $0x10] sm:$0x1] %vm555_vm0, %v2212_v0  ;;  %v1451_v2 = vld [vmem:[#allocation10] ss:$0 sm:$0xff] }
 0x146   : > { %558 = vst.msk [vmem:[#allocation2 + $0x20] sm:$0x1] %vm555_vm0, %v2212_v0  ;;  %559 = vst.msk [vmem:[#allocation2 + $0x30] sm:$0x1] %vm555_vm0, %v2212_v0  ;;  %v1452_v3 = vld [vmem:[#allocation12] ss:$0 sm:$0xff]  ;;  %v612_v4 = vmul.f32 %v1451_v2, %v604_v1  ;;  %v581_v10 = vmul.f32 %v1451_v2, %v570_v7 }
 0x147   : > { %560 = vst.msk [vmem:[#allocation2 + $0x40] sm:$0x1] %vm555_vm0, %v2212_v0  ;;  %561 = vst.msk [vmem:[#allocation2 + $0x50] sm:$0x1] %vm555_vm0, %v2212_v0  ;;  %v568_v5 = vld [vmem:[%s2704_s25] sm:$0xff]  ;;  %v569_v6 = vld [vmem:[%s2704_s25 + $0x8] sm:$0xff] }
 0x148   : > { %562 = vst.msk [vmem:[#allocation2 + $0x9] sm:$0x1] %vm555_vm0, %v2212_v0  ;;  %563 = vst.msk [vmem:[#allocation2 + $0x19] sm:$0x1] %vm555_vm0, %v2212_v0  ;;  %v579_v8 = vmul.f32 %v1451_v2, %v568_v5  ;;  %v580_v9 = vmul.f32 %v1451_v2, %v569_v6  ;;  %v571_v11 = vld [vmem:[%s2704_s25 + $0x18] sm:$0xff]  ;;  %v620_v12 = vadd.f32 %v1452_v3, %v612_v4  ;;  %vm599_vm1 = vcmask 64512  }
 0x149   : > { %564 = vst.msk [vmem:[#allocation2 + $0x29] sm:$0x1] %vm555_vm0, %v2212_v0  ;;  %565 = vst.msk [vmem:[#allocation2 + $0x39] sm:$0x1] %vm555_vm0, %v2212_v0  ;;  %v582_v13 = vmul.f32 %v1451_v2, %v571_v11  ;;  %v592_v16 = vadd.f32 %v1452_v3, %v581_v10  ;;  %s2756_s24 = scalar_lea.vmem [#allocation16], %s1441_s19  ;;  %s537_s27 = scalar_lea.vmem [#allocation17], %s2698_s26 }
 0x14a   : > { %566 = vst.msk [vmem:[#allocation2 + $0x49] sm:$0x1] %vm555_vm0, %v2212_v0  ;;  %567 = vst.msk [vmem:[#allocation2 + $0x59] sm:$0x1] %vm555_vm0, %v2212_v0  ;;  %v590_v14 = vadd.f32 %v1452_v3, %v579_v8  ;;  %v591_v15 = vadd.f32 %v1452_v3, %v580_v9  ;;  %v621_v17 = vmax.f32 %v620_v12, 0.0  ;;  %s543_s29 = scalar_lea.vmem [#allocation19], %s2698_s26 }
 0x14b   : > { %v593_v18 = vadd.f32 %v1452_v3, %v582_v13  ;;  %v596_v21 = vmax.f32 %v592_v16, 0.0  ;;  %s3078_s5 = sld [smem:[#allocation32_spill]] }
 0x14c   : > { %v594_v19 = vmax.f32 %v590_v14, 0.0  ;;  %v595_v20 = vmax.f32 %v591_v15, 0.0 }
 0x14d   : > { %v597_v22 = vmax.f32 %v593_v18, 0.0  ;;  %602 = vst.msk [vmem:[#allocation2 + $0x31] sm:$0xff] %vm599_vm1, %v596_v21 }
 0x14e   : > { %600 = vst.msk [vmem:[#allocation2 + $0x11] sm:$0xff] %vm599_vm1, %v594_v19  ;;  %601 = vst.msk [vmem:[#allocation2 + $0x21] sm:$0xff] %vm599_vm1, %v595_v20 }
 0x14f   : > { %603 = vst.msk [vmem:[#allocation2 + $0x41] sm:$0xff] %vm599_vm1, %v597_v22 }
 0x151   : > { %p1453_p6 = scmp.ne.s32.totalorder %s3078_s5, 0 }
 0x152   : > { %v2213_v23 = vmov (!%p1453_p6), 0.0  }
 0x153   : > { %625 = sbr.rel (%p1453_p6) target bundleno = 346 (0x15a), region = 80  ;;  %626 = vst.msk [vmem:[#allocation2 + $0x1] sm:$0xff] (!%p1453_p6), %vm599_vm1, %v2213_v23 }
 0x15a PF: > { %s3079_s12 = sld [smem:[#allocation32_spill]] }
 0x160   : > { %p1454_p8 = scmp.eq.s32.totalorder %s3079_s12, 0 }
 0x161   : > { %631 = vst.msk [vmem:[#allocation2 + $0x1] sm:$0xff] (!%p1454_p8), %vm599_vm1, %v621_v17 }
 0x162   : > { %630 = sbr.rel (%p1454_p8) target bundleno = 361 (0x169), region = 84 }
 0x169 PF: > { %v632_v24 = vld [vmem:[%s475_s1] sm:$0xff]  ;;  %v1455_v25 = vld [vmem:[#allocation10] ss:$0 sm:$0xff]  ;;  %v1456_v26 = vld [vmem:[#allocation12] ss:$0 sm:$0xff]  ;;  %s3080_s8 = sld [smem:[#allocation32_spill]] }
 0x16a   : > { %v640_v27 = vmul.f32 %v1455_v25, %v632_v24 }
 0x16c   : > { %v648_v28 = vadd.f32 %v1456_v26, %v640_v27 }
 0x16e   : > { %v649_v29 = vmax.f32 %v648_v28, 0.0 }
 0x16f   : > { %p1457_p4 = scmp.ne.s32.totalorder %s3080_s8, 1 }
 0x170   : > { %v2214_v30 = vmov (!%p1457_p4), 0.0  }
 0x171   : > { %653 = sbr.rel (%p1457_p4) target bundleno = 376 (0x178), region = 88  ;;  %655 = vst.msk [vmem:[#allocation2 + $0x51] sm:$0xff] (!%p1457_p4), %vm599_vm1, %v2214_v30 }
 0x178 PF: > { %s3081_s11 = sld [smem:[#allocation32_spill]] }
 0x17e   : > { %p1458_p3 = scmp.eq.s32.totalorder %s3081_s11, 1 }
 0x17f   : > { %661 = vst.msk [vmem:[#allocation2 + $0x51] sm:$0xff] (!%p1458_p3), %vm599_vm1, %v649_v29 }
 0x180   : > { %659 = sbr.rel (%p1458_p3) target bundleno = 391 (0x187), region = 92 }
 0x187 PF: > { %v677_v31 = vld [vmem:[#allocation2 + $0x21] sm:$0xff]  ;;  %v678_v33 = vld [vmem:[#allocation2 + $0x31] sm:$0xff]  ;;  %vm670_vm2 = vcmask 60416   ;;  %s2215_s2 = smov 8   ;;  %s2216_s19 = smov 16   ;;  %vm1036_vm3 = vcmask 1043456  }
 0x188   : > { %v675_v32 = vld [vmem:[#allocation2 + $0x1] sm:$0xff]  ;;  %v2770_v34 = vpack.c.bf16 %v677_v31, %v677_v31  ;;  %v676_v36 = vld [vmem:[#allocation2 + $0x11] sm:$0xff]  ;;  %v2775_v38 = vpack.c.bf16 %v678_v33, %v678_v33  ;;  %s2217_s20 = smov 24   ;;  %s2218_s25 = smov 32   ;;  %vm707_vm4 = vcmask 126016   ;;  %vm744_vm5 = vcmask 191616  }
 0x189   : > { %v1511_v35 = vpack.c.bf16 %v675_v32, %v675_v32  ;;  %v750_v37 = vld [vmem:[#allocation2 + $0x20] sm:$0xff]  ;;  %v1512_v39 = vpack.c.bf16 %v676_v36, %v676_v36  ;;  %v749_v41 = vld [vmem:[#allocation2 + $0x10] sm:$0xff]  ;;  %s2219_s10 = smov 40   ;;  %s2220_s21 = smov 48   ;;  %vm781_vm6 = vcmask 257216   ;;  %vm818_vm7 = vcmask 322816  }
 0x18a   : > { %699 = vrot.lane.b32.xlu1 %v2770_v34, %s2215_s2  ;;  %v1520_v40 = vpack.c.bf16 %v750_v37, %v750_v37  ;;  %v751_v42 = vld [vmem:[#allocation2 + $0x30] sm:$0xff]  ;;  %v712_v44 = vld [vmem:[#allocation2 + $0x2] sm:$0xff]  ;;  %v1519_v45 = vpack.c.bf16 %v749_v41, %v749_v41  ;;  %s2221_s4 = smov 56   ;;  %s2222_s0 = smov 64   ;;  %vm855_vm8 = vcmask 388416   ;;  %vm893_vm9 = vcmask 454016  }
 0x18b   : > { %695 = vrot.lane.b32.xlu0 %v1511_v35, %s2215_s2  ;;  %v713_v43 = vld [vmem:[#allocation2 + $0x12] sm:$0xff]  ;;  %v1521_v46 = vpack.c.bf16 %v751_v42, %v751_v42  ;;  %v662_v47 = vld [vmem:[#allocation2] sm:$0xff]  ;;  %v1515_v52 = vpack.c.bf16 %v712_v44, %v712_v44  ;;  %vm930_vm10 = vcmask 519616   ;;  %s3082_s6 = sld [smem:[#allocation32_spill]]  ;;  %s3083_s17 = sld [smem:[#allocation33_spill]]  ;;  %vm967_vm11 = vcmask 585216  }
 0x18c   : > { %673 = vst.msk [vmem:[#allocation3 + $0x8] sm:$0xf] %vm670_vm2, %v1520_v40  ;;  %v715_v48 = vld [vmem:[#allocation2 + $0x32] sm:$0xff]  ;;  %v714_v49 = vld [vmem:[#allocation2 + $0x22] sm:$0xff]  ;;  %v666_v50 = vpack.c.bf16 %v662_v47, %v662_v47  ;;  %672 = vst.msk [vmem:[#allocation3 + $0x4] sm:$0xf] %vm670_vm2, %v1519_v45  ;;  %v1516_v51 = vpack.c.bf16 %v713_v43, %v713_v43 }
 0x18d   : > { %674 = vst.msk [vmem:[#allocation3 + $0xc] sm:$0xf] %vm670_vm2, %v1521_v46  ;;  %v1518_v53 = vpack.c.bf16 %v715_v48, %v715_v48  ;;  %v1517_v54 = vpack.c.bf16 %v714_v49, %v714_v49  ;;  %v752_v55 = vld [vmem:[#allocation2 + $0x40] sm:$0xff]  ;;  %v1768_v61 = vld [vmem:[#allocation13] sm:$0xff]   ;;  %v1771_v3 = vld [vmem:[#allocation13 + $0x18] sm:$0xff]   ;;  %vm1029_vm12 = vcmask 588800  }
 0x18e   : > { %701 = vrot.lane.b32.xlu1 %v2775_v38, %s2215_s2  ;;  %671 = vst.msk [vmem:[#allocation3] sm:$0xf] %vm670_vm2, %v666_v50  ;;  %v1522_v56 = vpack.c.bf16 %v752_v55, %v752_v55  ;;  %v789_v57 = vld [vmem:[#allocation2 + $0x41] sm:$0xff]  ;;  %v864_v62 = vld [vmem:[#allocation2 + $0x50] sm:$0xff]  ;;  %1550 = vmatprep.subr.bf16.mxu0 %v1768_v61  ;;  %v1491_v43 = vld [vmem:[#allocation15] ss:$0 sm:$0xff] }
 0x18f   : > { %697 = vrot.lane.b32.xlu0 %v1512_v39, %s2215_s2  ;;  %v1526_v58 = vpack.c.bf16 %v789_v57, %v789_v57  ;;  %v826_v59 = vld [vmem:[#allocation2 + $0x42] sm:$0xff]  ;;  %1551 = vmatpush3.bf16.msra.mxu0 %v1768_v61  ;;  %v1534_v0 = vpack.c.bf16 %v864_v62, %v864_v62  ;;  %v901_v2 = vld [vmem:[#allocation2 + $0x51] sm:$0xff]  ;;  %s1151_s5 = sshll.u32 %s2756_s24, 4  ;;  %p3086_p5 = scmp.ne.s32.totalorder %s3050_s30, 0  ;;  %s2793_s5 = int_to_ptr.vmem [resolvable:$true] %s1151_s5 }
 0x190   : > { %v1530_v60 = vpack.c.bf16 %v826_v59, %v826_v59  ;;  %v1769_v63 = vld [vmem:[#allocation13 + $0x8] sm:$0xff]   ;;  %v1770_v1 = vld [vmem:[#allocation13 + $0x10] sm:$0xff]   ;;  %v1772_v4 = vld [vmem:[#allocation13 + $0x20] ss:$0 sps:$4 sm:$0xff]   ;;  %v1538_v5 = vpack.c.bf16 %v901_v2, %v901_v2 }
 0x191   : > { %1552 = vmatprep.subr.bf16.mxu0 %v1769_v63  ;;  %v1038_v6 = vsel %vm1036_vm3, %v1772_v4, 0  ;;  %v938_v7 = vld [vmem:[#allocation2 + $0x52] sm:$0xff]  ;;  %s1502_s7 = sshll.u32 %s3082_s6, 2  ;;  %s1503_s9 = sshll.u32 %s3083_s17, 3 }
 0x192   : > { %734 = vrot.lane.b32.xlu1 %v1516_v51, %s2216_s19  ;;  %v1542_v8 = vpack.c.bf16 %v938_v7, %v938_v7  ;;  %s1148_s1 = sadd.s32 %s1503_s9, %s1502_s7 }
 0x193   : > { %732 = vrot.lane.b32.xlu0 %v1515_v52, %s2216_s19  ;;  %1553 = vmatpush3.bf16.msra.mxu0 %v1769_v63  ;;  %s1504_s12 = sshll.u32 %s1148_s1, 7 }
 0x194   : > { %1554 = vmatprep.subr.bf16.mxu0 %v1770_v1 }
 0x196   : > { %738 = vrot.lane.b32.xlu1 %v1518_v53, %s2216_s19 }
 0x197   : > { %736 = vrot.lane.b32.xlu0 %v1517_v54, %s2216_s19  ;;  %1555 = vmatpush3.bf16.msra.mxu0 %v1770_v1  ;;  %s3084_s19 = sld [smem:[#allocation50_spill]] }
 0x198   : > { %1556 = vmatprep.subr.bf16.mxu0 %v1771_v3 }
 0x19a   : > { %771 = vrot.lane.b32.xlu1 %v1520_v40, %s2217_s20 }
 0x19b   : > { %769 = vrot.lane.b32.xlu0 %v1519_v45, %s2217_s20  ;;  %1557 = vmatpush3.bf16.msra.mxu0 %v1771_v3 }
 0x19c   : > { %1564 = vmatprep.subr.msk.bf16.mxu0 %vm1036_vm3, %v1772_v4 }
 0x19e   : > { %775 = vrot.lane.b32.xlu1 %v1522_v56, %s2217_s20 }
 0x19f   : > { %773 = vrot.lane.b32.xlu0 %v1521_v46, %s2217_s20  ;;  %1559 = vmatpush3.bf16.msra.mxu0 %v1038_v6  ;;  %s2800_s20 = scalar_lea.hbm %s3084_s19, %s1504_s12 }
 0x1a2   : > { %808 = vrot.lane.b32.xlu1 %v2770_v34, %s2218_s25 }
 0x1a3   : > { %806 = vrot.lane.b32.xlu0 %v1512_v39, %s2218_s25 }
 0x1a6   : > { %812 = vrot.lane.b32.xlu1 %v1526_v58, %s2218_s25 }
 0x1a7   : > { %810 = vrot.lane.b32.xlu0 %v2775_v38, %s2218_s25  ;;  %s3085_s25 = smov %s3084_s19 }
 0x1aa   : > { %845 = vrot.lane.b32.xlu1 %v1517_v54, %s2219_s10 }
 0x1ab   : > { %843 = vrot.lane.b32.xlu0 %v1516_v51, %s2219_s10 }
 0x1ae   : > { %849 = vrot.lane.b32.xlu1 %v1530_v60, %s2219_s10 }
 0x1af   : > { %847 = vrot.lane.b32.xlu0 %v1518_v53, %s2219_s10  ;;  %s1128_s10 = scalar_lea.sflag [#allocation6], %s2698_s26 }
 0x1b2   : > { %883 = vrot.lane.b32.xlu1 %v1521_v46, %s2220_s21 }
 0x1b3   : > { %881 = vrot.lane.b32.xlu0 %v1520_v40, %s2220_s21 }
 0x1b6   : > { %887 = vrot.lane.b32.xlu1 %v1534_v0, %s2220_s21 }
 0x1b7   : > { %885 = vrot.lane.b32.xlu0 %v1522_v56, %s2220_s21  ;;  %s1977_s21 = scalar_lea.vmem %s2793_s5, 512 }
 0x1b8   : > { %p1978_p7 = scmp.ne.s32.totalorder %s2793_s5, %s1977_s21 }
 0x1ba   : > { %920 = vrot.lane.b32.xlu1 %v2775_v38, %s2221_s4  ;;  %p1979_p1 = pnand %p1978_p7, %p3086_p5 }
 0x1bb   : > { %918 = vrot.lane.b32.xlu0 %v2770_v34, %s2221_s4 }
 0x1bc   : > { %p1980_p0 = pneg %p1979_p1 }
 0x1be   : > { %924 = vrot.lane.b32.xlu1 %v1538_v5, %s2221_s4 }
 0x1bf   : > { %922 = vrot.lane.b32.xlu0 %v1526_v58, %s2221_s4  ;;  %s2223_s4 = smov [#allocation16]  }
 0x1c2   : > { %957 = vrot.lane.b32.xlu1 %v1518_v53, %s2222_s0 }
 0x1c3   : > { %955 = vrot.lane.b32.xlu0 %v1517_v54, %s2222_s0 }
 0x1c6   : > { %961 = vrot.lane.b32.xlu1 %v1542_v8, %s2222_s0 }
 0x1c7   : > { %959 = vrot.lane.b32.xlu0 %v1530_v60, %s2222_s0  ;;  %s1981_s0 = sshll.u32 %s2223_s4, 4  ;;  %s1982_s0 = int_to_ptr.vmem [resolvable:$false] %s1981_s0 }
 0x1c8   : > { %s1983_s7 = scalar_lea.vmem %s1982_s0, 1024  ;;  %p1984_p13 = scmp.lt.s32.totalorder %s2793_s5, %s1982_s0 }
 0x1c9   : > { %p1985_p12 = scmp.lt.s32.totalorder %s1983_s7, %s1977_s21 }
 0x1cb   : > { %p1986_p11 = por %p1985_p12, %p1984_p13 }
 0x1cd   : > { %p1987_p9 = pnand %p1986_p11, %p1980_p0 }
 0x1fc   : > { %v700_v9 = vpop.permute.xlu1 %699 }
 0x1fd   : > { %v696_v10 = vpop.permute.xlu0 %695  ;;  %710 = vst.msk [vmem:[#allocation3 + $0x8] sm:$0xf] %vm707_vm4, %v700_v9 }
 0x1fe   : > { %708 = vst.msk [vmem:[#allocation3] sm:$0xf] %vm707_vm4, %v696_v10 }
 0x200   : > { %v702_v11 = vpop.permute.xlu1 %701 }
 0x201   : > { %v698_v12 = vpop.permute.xlu0 %697  ;;  %711 = vst.msk [vmem:[#allocation3 + $0xc] sm:$0xf] %vm707_vm4, %v702_v11 }
 0x202   : > { %709 = vst.msk [vmem:[#allocation3 + $0x4] sm:$0xf] %vm707_vm4, %v698_v12 }
 0x204   : > { %v735_v13 = vpop.permute.xlu1 %734 }
 0x205   : > { %v733_v14 = vpop.permute.xlu0 %732  ;;  %746 = vst.msk [vmem:[#allocation3 + $0x4] sm:$0xf] %vm744_vm5, %v735_v13 }
 0x206   : > { %745 = vst.msk [vmem:[#allocation3] sm:$0xf] %vm744_vm5, %v733_v14 }
 0x208   : > { %v739_v15 = vpop.permute.xlu1 %738 }
 0x209   : > { %v737_v16 = vpop.permute.xlu0 %736  ;;  %748 = vst.msk [vmem:[#allocation3 + $0xc] sm:$0xf] %vm744_vm5, %v739_v15 }
 0x20a   : > { %747 = vst.msk [vmem:[#allocation3 + $0x8] sm:$0xf] %vm744_vm5, %v737_v16 }
 0x20c   : > { %v772_v17 = vpop.permute.xlu1 %771 }
 0x20d   : > { %v770_v18 = vpop.permute.xlu0 %769  ;;  %783 = vst.msk [vmem:[#allocation3 + $0x4] sm:$0xf] %vm781_vm6, %v772_v17 }
 0x20e   : > { %782 = vst.msk [vmem:[#allocation3] sm:$0xf] %vm781_vm6, %v770_v18 }
 0x210   : > { %v776_v19 = vpop.permute.xlu1 %775 }
 0x211   : > { %v774_v20 = vpop.permute.xlu0 %773  ;;  %785 = vst.msk [vmem:[#allocation3 + $0xc] sm:$0xf] %vm781_vm6, %v776_v19 }
 0x212   : > { %784 = vst.msk [vmem:[#allocation3 + $0x8] sm:$0xf] %vm781_vm6, %v774_v20 }
 0x214   : > { %v809_v21 = vpop.permute.xlu1 %808 }
 0x215   : > { %v807_v22 = vpop.permute.xlu0 %806  ;;  %820 = vst.msk [vmem:[#allocation3 + $0x4] sm:$0xf] %vm818_vm7, %v809_v21 }
 0x216   : > { %819 = vst.msk [vmem:[#allocation3] sm:$0xf] %vm818_vm7, %v807_v22 }
 0x218   : > { %v813_v23 = vpop.permute.xlu1 %812 }
 0x219   : > { %v811_v24 = vpop.permute.xlu0 %810  ;;  %822 = vst.msk [vmem:[#allocation3 + $0xc] sm:$0xf] %vm818_vm7, %v813_v23 }
 0x21a   : > { %821 = vst.msk [vmem:[#allocation3 + $0x8] sm:$0xf] %vm818_vm7, %v811_v24 }
 0x21c   : > { %v846_v25 = vpop.permute.xlu1 %845 }
 0x21d   : > { %v844_v26 = vpop.permute.xlu0 %843  ;;  %857 = vst.msk [vmem:[#allocation3 + $0x4] sm:$0xf] %vm855_vm8, %v846_v25 }
 0x21e   : > { %856 = vst.msk [vmem:[#allocation3] sm:$0xf] %vm855_vm8, %v844_v26 }
 0x220   : > { %v850_v27 = vpop.permute.xlu1 %849 }
 0x221   : > { %v848_v28 = vpop.permute.xlu0 %847  ;;  %859 = vst.msk [vmem:[#allocation3 + $0xc] sm:$0xf] %vm855_vm8, %v850_v27 }
 0x222   : > { %858 = vst.msk [vmem:[#allocation3 + $0x8] sm:$0xf] %vm855_vm8, %v848_v28 }
 0x224   : > { %v884_v29 = vpop.permute.xlu1 %883 }
 0x225   : > { %v882_v30 = vpop.permute.xlu0 %881  ;;  %895 = vst.msk [vmem:[#allocation3 + $0x4] sm:$0xf] %vm893_vm9, %v884_v29 }
 0x226   : > { %894 = vst.msk [vmem:[#allocation3] sm:$0xf] %vm893_vm9, %v882_v30 }
 0x228   : > { %v888_v31 = vpop.permute.xlu1 %887 }
 0x229   : > { %v886_v32 = vpop.permute.xlu0 %885  ;;  %897 = vst.msk [vmem:[#allocation3 + $0xc] sm:$0xf] %vm893_vm9, %v888_v31 }
 0x22a   : > { %896 = vst.msk [vmem:[#allocation3 + $0x8] sm:$0xf] %vm893_vm9, %v886_v32 }
 0x22c   : > { %v921_v33 = vpop.permute.xlu1 %920 }
 0x22d   : > { %v919_v34 = vpop.permute.xlu0 %918  ;;  %932 = vst.msk [vmem:[#allocation3 + $0x4] sm:$0xf] %vm930_vm10, %v921_v33 }
 0x22e   : > { %931 = vst.msk [vmem:[#allocation3] sm:$0xf] %vm930_vm10, %v919_v34 }
 0x230   : > { %v925_v35 = vpop.permute.xlu1 %924 }
 0x231   : > { %v923_v36 = vpop.permute.xlu0 %922  ;;  %934 = vst.msk [vmem:[#allocation3 + $0xc] sm:$0xf] %vm930_vm10, %v925_v35 }
 0x232   : > { %933 = vst.msk [vmem:[#allocation3 + $0x8] sm:$0xf] %vm930_vm10, %v923_v36 }
 0x234   : > { %v958_v37 = vpop.permute.xlu1 %957 }
 0x235   : > { %v956_v38 = vpop.permute.xlu0 %955  ;;  %969 = vst.msk [vmem:[#allocation3 + $0x4] sm:$0xf] %vm967_vm11, %v958_v37 }
 0x236   : > { %968 = vst.msk [vmem:[#allocation3] sm:$0xf] %vm967_vm11, %v956_v38 }
 0x238   : > { %v962_v39 = vpop.permute.xlu1 %961 }
 0x239   : > { %v960_v40 = vpop.permute.xlu0 %959  ;;  %971 = vst.msk [vmem:[#allocation3 + $0xc] sm:$0xf] %vm967_vm11, %v962_v39 }
 0x23a   : > { %970 = vst.msk [vmem:[#allocation3 + $0x8] sm:$0xf] %vm967_vm11, %v960_v40 }
 0x23d   : > { %v1773_v41 = vld [vmem:[#allocation3] sm:$0xff]  }
 0x23e   : > { %1560 = vmatprep.mubr.msk.bf16.mxu0 %vm1029_vm12, %v1773_v41 }
 0x241   : > { %v1774_v42 = vld [vmem:[#allocation3 + $0x8] sm:$0xff]  }
 0x242   : > { %1561 = vmatmul.mubr.msk.bf16.vlgmr.msra.gmra.mrb[0].mxu0 %vm1029_vm12, %v1774_v42 }
 0x315   : > { %v1562_v44 = vpop.f32.mrb[0].mxu0 }
 0x316   : > { %v1083_v45 = vadd.f32 %v1562_v44, %v1491_v43  ;;  %v1074_v46 = vpop.f32.mrb[1].mxu0 }
 0x317   : > { %v1075_v47 = vadd.f32 %v1491_v43, %v1074_v46  ;;  %v1563_v48 = vpop.f32.mrb[2].mxu0 }
 0x318   : > { %1091 = vst.msk [vmem:[%s2756_s24 + $0x10] sm:$0xff] %vm599_vm1, %v1083_v45  ;;  %v1086_v49 = vadd.f32 %v1563_v48, %v1491_v43  ;;  %v1077_v50 = vpop.f32.mrb[3].mxu0  ;;  %v1102_v53 = vmul.f32 %v1083_v45, %v1083_v45 }
 0x319   : > { %1089 = vst.msk [vmem:[%s2756_s24] sm:$0xff] %vm599_vm1, %v1075_v47  ;;  %v1100_v51 = vmul.f32 %v1075_v47, %v1075_v47  ;;  %v1078_v52 = vadd.f32 %v1491_v43, %v1077_v50  ;;  %v1093_v54 = vsel %vm599_vm1, %v1075_v47, 0.0 }
 0x31a   : > { %1092 = vst.msk [vmem:[%s2756_s24 + $0x18] sm:$0xff] %vm599_vm1, %v1086_v49 }
 0x31b   : > { %1090 = vst.msk [vmem:[%s2756_s24 + $0x8] sm:$0xff] %vm599_vm1, %v1078_v52  ;;  %v1094_v55 = vsel %vm599_vm1, %v1078_v52, 0.0  ;;  %v1101_v56 = vmul.f32 %v1078_v52, %v1078_v52 }
 0x31c   : > { %v1095_v57 = vadd.f32 %v1094_v55, %v1093_v54 }
 0x31d   : > { %1990 = shalt.err (!%p1987_p9)
}
 0x31e   : > { %s1991_s24 = scalar_lea.hbm %s2800_s20, 512  ;;  %s1995_s12 = scalar_lea.hbm %s3085_s25, 2048 }
 0x31f   : > { %p1992_p10 = scmp.ne.s32.totalorder %s2800_s20, %s1991_s24  ;;  %p1996_p8 = scmp.lt.u32.totalorder %s2800_s20, %s3085_s25 }
 0x320   : > { %p1997_p4 = scmp.lt.u32.totalorder %s1995_s12, %s1991_s24  ;;  %p1999_p7 = scmp.lt.u32.totalorder %s1991_s24, %s2800_s20 }
 0x321   : > { %p1993_p2 = pnand %p1992_p10, %p3086_p5 }
 0x322   : > { %p1998_p3 = por %p1997_p4, %p1996_p8 }
 0x323   : > { %p1994_p6 = pneg %p1993_p2 }
 0x324   : > { %p2000_p1 = por %p1999_p7, %p1998_p3 }
 0x326   : > { %p2001_p0 = pnand %p2000_p1, %p1994_p6 }
 0x328   : > { %2004 = shalt.err (!%p2001_p0)
}
 0x329   : > { %s2224_s19 = smov 128   ;;  %v1096_v58 = vsel %vm599_vm1, %v1083_v45, 0.0  ;;  %v1104_v59 = vsel %vm599_vm1, %v1100_v51, 0.0  ;;  %v1103_v60 = vmul.f32 %v1086_v49, %v1086_v49  ;;  %v1105_v61 = vsel %vm599_vm1, %v1101_v56, 0.0  ;;  %s1184_s21 = sshll.u32 %s543_s29, 4  ;;  %s2862_s21 = int_to_ptr.vmem [resolvable:$true] %s1184_s21 }
 0x32a   : > { %1587 = dma.vmem_to_hbm [thread:$0]  (%p3086_p5), %s2793_s5, 512, %s2800_s20, %s1128_s10, %s2224_s19, %s2224_s19, %s2215_s2   ;;  %v1097_v62 = vadd.f32 %v1096_v58, %v1095_v57  ;;  %v1106_v63 = vadd.f32 %v1105_v61, %v1104_v59  ;;  %v1107_v0 = vsel %vm599_vm1, %v1102_v53, 0.0  ;;  %v1098_v1 = vsel %vm599_vm1, %v1086_v49, 0.0 }
 0x32b   : > { %v1109_v4 = vsel %vm599_vm1, %v1103_v60, 0.0  ;;  %s1505_s2 = sshll.u32 %s3083_s17, 1  ;;  %s1169_s10 = sshll.u32 %s537_s27, 4  ;;  %s2852_s10 = int_to_ptr.vmem [resolvable:$true] %s1169_s10 }
 0x32c   : > { %v1108_v2 = vadd.f32 %v1107_v0, %v1106_v63  ;;  %v1099_v3 = vadd.f32 %v1098_v1, %v1097_v62  ;;  %s1165_s5 = sadd.s32 %s3082_s6, %s1505_s2  ;;  %s3087_s0 = sld [smem:[#allocation51_spill]] }
 0x32d   : > { %s1506_s20 = sshll.u32 %s1165_s5, 4  ;;  %s3088_s9 = sld [smem:[#allocation52_spill]] }
 0x32e   : > { %v1110_v5 = vadd.f32 %v1109_v4, %v1108_v2  ;;  %v1111_v6 = vsel %vm599_vm1, %v1099_v3, 0.0  ;;  %s2866_s12 = scalar_lea.sflag [#allocation18], %s462_s13  ;;  %s2005_s8 = scalar_lea.vmem %s2852_s10, 16 }
 0x32f   : > { %v1112_v7 = vrot.slane %v1111_v6, 4  ;;  %p2006_p13 = scmp.ne.s32.totalorder %s2852_s10, %s2005_s8  ;;  %s2225_s11 = smov [#allocation17]  }
 0x330   : > { %v1119_v8 = vsel %vm599_vm1, %v1110_v5, 0.0  ;;  %s2009_s19 = sshll.u32 %s2225_s11, 4  ;;  %s2010_s19 = int_to_ptr.vmem [resolvable:$false] %s2009_s19 }
 0x331   : > { %v1120_v9 = vrot.slane %v1119_v8, 4  ;;  %v1113_v10 = vadd.f32 %v1112_v7, %v1111_v6  ;;  %p2007_p12 = pnand %p2006_p13, %p3086_p5  ;;  %p2012_p9 = scmp.lt.s32.totalorder %s2852_s10, %s2010_s19 }
 0x332   : > { %s2850_s7 = scalar_lea.hbm %s3087_s0, %s1506_s20 }
 0x333   : > { %v1114_v11 = vrot.slane %v1113_v10, 2  ;;  %v1121_v12 = vadd.f32 %v1120_v9, %v1119_v8  ;;  %s2860_s1 = scalar_lea.hbm %s3088_s9, %s1506_s20  ;;  %p2008_p11 = pneg %p2007_p12 }
 0x335   : > { %v1115_v13 = vadd.f32 %v1114_v11, %v1113_v10  ;;  %v1122_v14 = vrot.slane %v1121_v12, 2 }
 0x337   : > { %v1116_v15 = vrot.slane %v1115_v13, 1  ;;  %v1123_v16 = vadd.f32 %v1122_v14, %v1121_v12 }
 0x339   : > { %v1117_v17 = vadd.f32 %v1116_v15, %v1115_v13  ;;  %v1124_v18 = vrot.slane %v1123_v16, 1 }
 0x33b   : > { %1118 = vst.msk [vmem:[%s537_s27] sm:$0x1] %vm555_vm0, %v1117_v17  ;;  %v1125_v19 = vadd.f32 %v1124_v18, %v1123_v16  ;;  %s2011_s27 = scalar_lea.vmem %s2010_s19, 32 }
 0x33c   : > { %p2013_p10 = scmp.lt.s32.totalorder %s2011_s27, %s2005_s8 }
 0x33e   : > { %p2014_p2 = por %p2013_p10, %p2012_p9 }
 0x340   : > { %p2015_p6 = pnand %p2014_p2, %p2008_p11 }
 0x342   : > { %2018 = shalt.err (!%p2015_p6)
}
 0x343   : > { %s2019_s23 = scalar_lea.hbm %s2850_s7, 16  ;;  %s2023_s5 = scalar_lea.hbm %s3087_s0, 64 }
 0x344   : > { %p2020_p8 = scmp.ne.s32.totalorder %s2850_s7, %s2019_s23  ;;  %p2024_p7 = scmp.lt.u32.totalorder %s2850_s7, %s3087_s0 }
 0x345   : > { %p2025_p1 = scmp.lt.u32.totalorder %s2023_s5, %s2019_s23  ;;  %p2027_p13 = scmp.lt.u32.totalorder %s2019_s23, %s2850_s7 }
 0x346   : > { %p2021_p4 = pnand %p2020_p8, %p3086_p5 }
 0x347   : > { %p2026_p0 = por %p2025_p1, %p2024_p7 }
 0x348   : > { %p2022_p3 = pneg %p2021_p4 }
 0x349   : > { %p2028_p12 = por %p2027_p13, %p2026_p0 }
 0x34b   : > { %p2029_p11 = pnand %p2028_p12, %p2022_p3 }
 0x34d   : > { %2032 = shalt.err (!%p2029_p11)
}
 0x34e   : > { %1588 = dma.vmem_to_hbm [thread:$0]  (%p3086_p5), %s2852_s10, 16, %s2850_s7, %s2866_s12   ;;  %1126 = vst.msk [vmem:[%s543_s29] sm:$0x1] %vm555_vm0, %v1125_v19 }
 0x34f   : > { %s2033_s17 = scalar_lea.vmem %s2862_s21, 16  ;;  %s2226_s6 = smov [#allocation19]  }
 0x350   : > { %p2034_p9 = scmp.ne.s32.totalorder %s2862_s21, %s2033_s17  ;;  %s2037_s24 = sshll.u32 %s2226_s6, 4  ;;  %s2038_s24 = int_to_ptr.vmem [resolvable:$false] %s2037_s24 }
 0x351   : > { %s2039_s8 = scalar_lea.vmem %s2038_s24, 32  ;;  %p2040_p6 = scmp.lt.s32.totalorder %s2862_s21, %s2038_s24 }
 0x352   : > { %p2035_p10 = pnand %p2034_p9, %p3086_p5  ;;  %p2041_p8 = scmp.lt.s32.totalorder %s2039_s8, %s2033_s17 }
 0x354   : > { %p2036_p2 = pneg %p2035_p10  ;;  %p2042_p4 = por %p2041_p8, %p2040_p6 }
 0x356   : > { %p2043_p3 = pnand %p2042_p4, %p2036_p2 }
 0x358   : > { %2046 = shalt.err (!%p2043_p3)
}
 0x359   : > { %s2047_s26 = scalar_lea.hbm %s2860_s1, 16  ;;  %s2051_s7 = scalar_lea.hbm %s3088_s9, 64 }
 0x35a   : > { %p2048_p7 = scmp.ne.s32.totalorder %s2860_s1, %s2047_s26  ;;  %p2052_p13 = scmp.lt.u32.totalorder %s2860_s1, %s3088_s9 }
 0x35b   : > { %p2053_p12 = scmp.lt.u32.totalorder %s2051_s7, %s2047_s26  ;;  %p2055_p9 = scmp.lt.u32.totalorder %s2047_s26, %s2860_s1 }
 0x35c   : > { %p2049_p1 = pnand %p2048_p7, %p3086_p5 }
 0x35d   : > { %p2054_p11 = por %p2053_p12, %p2052_p13 }
 0x35e   : > { %p2050_p0 = pneg %p2049_p1 }
 0x35f   : > { %p2056_p10 = por %p2055_p9, %p2054_p11 }
 0x361   : > { %p2057_p2 = pnand %p2056_p10, %p2050_p0 }
 0x363   : > { %2060 = shalt.err (!%p2057_p2)
}
 0x364   : > { %1589 = dma.vmem_to_hbm [thread:$0]  (%p3086_p5), %s2862_s21, 16, %s2860_s1, %s2866_s12  }
 0x365 PF: > { %p1635_p6 = scmp.ge.s32.totalorder %s2199_s22, 2  ;;  %s1196_s27 = sand.u32 1, %s2171_s15  }
 0x366   : > { %p3089_p8 = scmp.ne.s32.totalorder %s3051_s18, 0  ;;  %s1197_s23 = scalar_lea.sflag [#allocation6], %s1196_s27 }
 0x368   : > { %p1617_p4 = pnand %p1635_p6, %p3089_p8 }
 0x36a   : > { %2138 = dma.done.wait (!%p1617_p4), %s1197_s23, 512  }
 0x36b   : > { %2140 = vsyncadd (!%p1617_p4), %s1197_s23, 4294966784  ;;  %s3090_s13 = sadd.s32 4294967294, %s2199_s22  }
 0x36c   : > { %s1205_s2 = sand.u32 1, %s3090_s13  }
 0x36d   : > { %s1206_s5 = scalar_lea.sflag [#allocation18], %s1205_s2 }
 0x36e   : > { %2142 = dma.done.wait (!%p1617_p4), %s1206_s5, 32  }
 0x36f   : > { %2144 = vsyncadd (!%p1617_p4), %s1206_s5, 4294967264  ;;  %s34_s22 = sadd.s32 1, %s2199_s22   ;;  %s3092_s21 = sld [smem:[#allocation28_spill]] }
 0x370   : > { %p2922_p5 = scmp.ge.s32.totalorder %s34_s22, 6   ;;  %s3093_s10 = sld [smem:[#allocation29_spill]] }
 0x371   : > { %s3094_s12 = sld [smem:[#allocation30_spill]]  ;;  %s3095_s15 = sld [smem:[#allocation41_spill]] }
 0x372   : > { %s3096_s18 = sld [smem:[#allocation31_spill]]  ;;  %s3097_s17 = sld [smem:[#allocation42_spill]] }
 0x373   : > { %s3098_s1 = sld [smem:[#allocation34_spill]]  ;;  %s3099_s19 = sld [smem:[#allocation35_spill]] }
 0x374   : > { %s3100_s20 = sld [smem:[#allocation37_spill]]  ;;  %s3101_s4 = sld [smem:[#allocation38_spill]] }
 0x375   : > { %s3103_s30 = smov %s3092_s21  ;;  %s3104_s11 = smov %s3126_s3 }
 0x376   : > { %s3105_s13 = smov %s2167_s14  ;;  %33 = sbr.rel (!%p2922_p5) target bundleno = 27 (0x1b), region = 185 }
 0x377   : > { %s3106_s14 = smov %s3095_s15  ;;  %s3107_s15 = smov %s2175_s16 }
 0x378   : > { %s3108_s16 = smov %s3096_s18 }
 0x379   : > { %s3109_s18 = smov %s3098_s1 }
 0x37a   : > { %s3110_s21 = smov %s3101_s4 }
 0x37d   :  { %1218 = vsyncpa [#allocation5], 1 }
 0x37e   :  { %1220 = vsyncpa [#allocation5 + $0x1], 1 }
 0x37f   :  { %1221 = vsyncpa [#allocation8], 1 }
 0x380   :  { %1223 = vsyncpa [#allocation8 + $0x1], 1 }
 0x381   :  { %1224 = vsyncpa [#allocation11], 1 }
 0x382   :  { %1225 = vsyncpa [#allocation14], 1 }
 0x383   :  { %1226 = vsyncpa [#allocation6], 1 }
 0x384   :  { %1228 = vsyncpa [#allocation6 + $0x1], 1 }
 0x385   :  { %1229 = vsyncpa [#allocation18], 1 }
 0x386   :  { %1231 = vsyncpa [#allocation18 + $0x1], 1 }

</bundles_post_ra>
